<compile_context>
chip_gen: v7x
topology: tpu7x:2x2x1
jax: 0.10.0
libtpu: 0.0.40
codegen_flags: <defaults>
</compile_context>

<pallas_src>
import jax
import jax.numpy as jnp
from jax import lax
from jax.experimental import pallas as pl
from jax.experimental.pallas import tpu as pltpu

# ----- model hyper-parameters (small, consistent with the module) -----
NZ = 8     # nz  : latent dim
NGF = 8    # ngf : generator base width
NC = 3     # nc  : output channels
BATCH = 2
EPS = 1e-5


# ---------------------------------------------------------------------------
# Pallas kernels
# ---------------------------------------------------------------------------
def _gemm_bn_relu_kernel(w_ref, a_ref, g_ref, b_ref, o_ref):
    """Fused  relu( BN( W^T @ A^T ) )  for one whole layer (single block).

    w_ref: (Cout, K)  a_ref: (K, M)  g_ref/b_ref: (Cout, 1)  o_ref: (Cout, M)
    BatchNorm2d training-mode batch statistics (biased variance, eps=1e-5),
    reduced over the lane axis M = N*OH*OW, exactly like PyTorch at init
    (gamma=1, beta=0 handled by the passed-in params).
    """
    y = jnp.dot(w_ref[...], a_ref[...], preferred_element_type=jnp.float32)
    mean = jnp.mean(y, axis=1, keepdims=True)                  # (Cout, 1)
    var = jnp.mean((y - mean) ** 2, axis=1, keepdims=True)     # biased variance
    scale = g_ref[...] * lax.rsqrt(var + EPS)
    y = (y - mean) * scale + b_ref[...]
    o_ref[...] = jnp.maximum(y, 0.0).astype(o_ref.dtype)


def _gemm_tanh_kernel(w_ref, a_ref, o_ref):
    """o = tanh(W^T @ A^T_tile) for one M-tile of the final layer."""
    y = jnp.dot(w_ref[...], a_ref[...], preferred_element_type=jnp.float32)
    o_ref[...] = jnp.tanh(y).astype(o_ref.dtype)


def pallas_gemm_bn_relu(w_t, a_t, gamma, beta):
    """Whole-layer fused GEMM + BN + ReLU. Largest layer working set is the
    (256, 2048) f32 A^T (2 MiB), so a single full-array grid step is used."""
    cout, _ = w_t.shape
    m = a_t.shape[1]
    g = gamma.reshape(cout, 1).astype(jnp.float32)
    b = beta.reshape(cout, 1).astype(jnp.float32)
    return pl.pallas_call(
        _gemm_bn_relu_kernel,
        out_shape=jax.ShapeDtypeStruct((cout, m), jnp.float32),
    )(w_t, a_t, g, b)


def pallas_gemm_tanh(w_t, a_t, tm=2048):
    """Final layer: gridded over M (lane dim) so multiple parallel blocks are
    available for v7x megacore; tm=2048 amortizes per-step overhead."""
    cout, k = w_t.shape
    m = a_t.shape[1]
    if m % tm != 0:
        tm = m  # small / irregular M: single full tile
    return pl.pallas_call(
        _gemm_tanh_kernel,
        out_shape=jax.ShapeDtypeStruct((cout, m), jnp.float32),
        grid_spec=pltpu.PrefetchScalarGridSpec(
            num_scalar_prefetch=0,
            grid=(m // tm,),
            in_specs=[
                pl.BlockSpec((cout, k), lambda i: (0, 0)),
                pl.BlockSpec((k, tm), lambda i: (0, i)),
            ],
            out_specs=pl.BlockSpec((cout, tm), lambda i: (0, i)),
        ),
        compiler_params=pltpu.CompilerParams(dimension_semantics=("parallel",)),
    )(w_t, a_t)


# ---------------------------------------------------------------------------
# ConvTranspose2d as transposed im2col + Pallas GEMM (activations kept CNHW)
# ---------------------------------------------------------------------------
def _im2col_transposed(x_cnhw, stride, padding, k):
    """Build A^T (K, M) for ConvTranspose2d from a CNHW activation.

    x_cnhw: (Cin, N, H, W).  Transposed conv == dilate input by `stride`, pad
    by (k-1-padding), then cross-correlate with the spatially flipped kernel.
    A^T[ci*k*k + kh*k + kw, n*OH*OW + oh*OW + ow] = xd[ci, n, oh+kh, ow+kw]
    """
    c, n, h, w = x_cnhw.shape
    oh = (h - 1) * stride - 2 * padding + k
    ow = (w - 1) * stride - 2 * padding + k
    hd = (h - 1) * stride + 1
    wd = (w - 1) * stride + 1
    xd = jnp.zeros((c, n, hd, wd), x_cnhw.dtype).at[:, :, ::stride, ::stride].set(x_cnhw)
    pd = k - 1 - padding
    xd = jnp.pad(xd, ((0, 0), (0, 0), (pd, pd), (pd, pd)))
    # TODO(synk): the overlapping 4x4 window gather stays as (tiny) XLA glue;
    # it is not expressible with rectangular BlockSpec windows.
    cols = [xd[:, :, kh:kh + oh, kw:kw + ow] for kh in range(k) for kw in range(k)]
    pat = jnp.stack(cols, axis=1)                      # (Cin, k*k, N, OH, OW)
    return pat.reshape(c * k * k, n * oh * ow), (n, oh, ow)


def _weight_t(w):
    """PyTorch ConvTranspose2d weight (Cin, Cout, k, k) -> (Cout, Cin*k*k),
    spatially flipped to match the im2col row ordering of A^T."""
    cin, cout, k, _ = w.shape
    wf = w[:, :, ::-1, ::-1].transpose(1, 0, 2, 3)     # (Cout, Cin, k, k)
    return wf.reshape(cout, cin * k * k)


def conv_transpose_bn_relu(x_cnhw, w, stride, padding, gamma, beta):
    """ConvTranspose2d (no bias) -> BatchNorm2d (training stats) -> ReLU."""
    a_t, (n, oh, ow) = _im2col_transposed(x_cnhw, stride, padding, w.shape[2])
    w_t = _weight_t(w)
    y_t = pallas_gemm_bn_relu(w_t, a_t, gamma, beta)   # (Cout, N*OH*OW)
    return y_t.reshape(w.shape[1], n, oh, ow)          # CNHW, no transpose


def conv_transpose_tanh(x_cnhw, w, stride, padding):
    """Final ConvTranspose2d (no bias) -> Tanh, tanh fused into the GEMM."""
    a_t, (n, oh, ow) = _im2col_transposed(x_cnhw, stride, padding, w.shape[2])
    w_t = _weight_t(w)
    y_t = pallas_gemm_tanh(w_t, a_t)
    return y_t.reshape(w.shape[1], n, oh, ow)


# ---------------------------------------------------------------------------
# Generator
# ---------------------------------------------------------------------------
def init_generator_params(key):
    ks = jax.random.split(key, 5)
    shapes = [
        (NZ, NGF * 8, 4, 4),        # ConvTranspose2d(nz, ngf*8, 4, 1, 0)
        (NGF * 8, NGF * 4, 4, 4),   # ConvTranspose2d(ngf*8, ngf*4, 4, 2, 1)
        (NGF * 4, NGF * 2, 4, 4),   # ConvTranspose2d(ngf*4, ngf*2, 4, 2, 1)
        (NGF * 2, NGF, 4, 4),       # ConvTranspose2d(ngf*2, ngf, 4, 2, 1)
        (NGF, NC, 4, 4),            # ConvTranspose2d(ngf, nc, 4, 2, 1)
    ]
    params = {}
    for i, (k, s) in enumerate(zip(ks, shapes), start=1):
        params[f"w{i}"] = 0.02 * jax.random.normal(k, s, dtype=jnp.float32)
    for i, ch in enumerate([NGF * 8, NGF * 4, NGF * 2, NGF], start=1):
        params[f"g{i}"] = jnp.ones((ch,), jnp.float32)    # BN weight init
        params[f"b{i}"] = jnp.zeros((ch,), jnp.float32)   # BN bias init
    return params


@jax.jit
def generator_forward(z, params):
    x = z.transpose(1, 0, 2, 3)                                                     # NCHW -> CNHW
    x = conv_transpose_bn_relu(x, params["w1"], 1, 0, params["g1"], params["b1"])   # 4x4
    x = conv_transpose_bn_relu(x, params["w2"], 2, 1, params["g2"], params["b2"])   # 8x8
    x = conv_transpose_bn_relu(x, params["w3"], 2, 1, params["g3"], params["b3"])   # 16x16
    x = conv_transpose_bn_relu(x, params["w4"], 2, 1, params["g4"], params["b4"])   # 32x32
    x = conv_transpose_tanh(x, params["w5"], 2, 1)                                  # 64x64
    return x.transpose(1, 0, 2, 3)                                                  # CNHW -> NCHW


if __name__ == "__main__":
    key = jax.random.PRNGKey(0)
    kp, kz = jax.random.split(key)
    params = init_generator_params(kp)
    z = jax.random.normal(kz, (BATCH, NZ, 1, 1), dtype=jnp.float32)

    out = generator_forward(z, params)
    out = jax.block_until_ready(out)

    assert out.shape == (BATCH, NC, 64, 64), out.shape
    assert out.dtype == jnp.float32
    assert bool(jnp.all(jnp.isfinite(out)))
    assert bool(jnp.all(jnp.abs(out) <= 1.0))  # tanh range
    print("KERNEL_OK")
</pallas_src>

<mosaic_0001>
module attributes {stable_mosaic.version = 11 : i64} {
  func.func @_gemm_bn_relu_kernel(%arg0: memref<64x128xf32, #tpu.memory_space<vmem>>, %arg1: memref<128x32xf32, #tpu.memory_space<vmem>>, %arg2: memref<64x1xf32, #tpu.memory_space<vmem>>, %arg3: memref<64x1xf32, #tpu.memory_space<vmem>>, %arg4: memref<64x32xf32, #tpu.memory_space<vmem>>) attributes {dimension_semantics = [], scalar_prefetch = 0 : i64, scratch_operands = 0 : i64, tpu.core_type = #tpu.core_type<tc>} {
    %c0 = arith.constant 0 : index
    %c0_0 = arith.constant 0 : index
    %0 = vector.load %arg0[%c0, %c0_0] : memref<64x128xf32, #tpu.memory_space<vmem>>, vector<64x128xf32>
    %c0_1 = arith.constant 0 : index
    %c0_2 = arith.constant 0 : index
    %1 = vector.load %arg1[%c0_1, %c0_2] : memref<128x32xf32, #tpu.memory_space<vmem>>, vector<128x32xf32>
    %cst = arith.constant dense<0.000000e+00> : vector<64x32xf32>
    %2 = tpu.matmul %0, %1, %cst {dimension_numbers = #tpu.dot_dimension_numbers<[1], [0], [0], [1], [0, 0, 1, 1], [], []>} : vector<64x128xf32>, vector<128x32xf32>, vector<64x32xf32> -> vector<64x32xf32>
    %cst_3 = arith.constant dense<0.000000e+00> : vector<64xf32>
    %3 = vector.multi_reduction <add>, %2, %cst_3 [1] : vector<64x32xf32> to vector<64xf32>
    %4 = vector.shape_cast %3 : vector<64xf32> to vector<64x1xf32>
    %cst_4 = arith.constant 3.200000e+01 : f32
    %5 = vector.broadcast %cst_4 : f32 to vector<64x1xf32>
    %6 = arith.divf %4, %5 : vector<64x1xf32>
    %7 = vector.broadcast %6 : vector<64x1xf32> to vector<64x32xf32>
    %8 = arith.subf %2, %7 : vector<64x32xf32>
    %9 = arith.mulf %8, %8 : vector<64x32xf32>
    %cst_5 = arith.constant dense<0.000000e+00> : vector<64xf32>
    %10 = vector.multi_reduction <add>, %9, %cst_5 [1] : vector<64x32xf32> to vector<64xf32>
    %11 = vector.shape_cast %10 : vector<64xf32> to vector<64x1xf32>
    %cst_6 = arith.constant 3.200000e+01 : f32
    %12 = vector.broadcast %cst_6 : f32 to vector<64x1xf32>
    %13 = arith.divf %11, %12 : vector<64x1xf32>
    %c0_7 = arith.constant 0 : index
    %c0_8 = arith.constant 0 : index
    %14 = vector.load %arg2[%c0_7, %c0_8] : memref<64x1xf32, #tpu.memory_space<vmem>>, vector<64x1xf32>
    %cst_9 = arith.constant 9.99999974E-6 : f32
    %15 = vector.broadcast %cst_9 : f32 to vector<64x1xf32>
    %16 = arith.addf %13, %15 : vector<64x1xf32>
    %17 = math.rsqrt %16 : vector<64x1xf32>
    %18 = arith.mulf %14, %17 : vector<64x1xf32>
    %19 = vector.broadcast %6 : vector<64x1xf32> to vector<64x32xf32>
    %20 = arith.subf %2, %19 : vector<64x32xf32>
    %21 = vector.broadcast %18 : vector<64x1xf32> to vector<64x32xf32>
    %22 = arith.mulf %20, %21 : vector<64x32xf32>
    %c0_10 = arith.constant 0 : index
    %c0_11 = arith.constant 0 : index
    %23 = vector.load %arg3[%c0_10, %c0_11] : memref<64x1xf32, #tpu.memory_space<vmem>>, vector<64x1xf32>
    %24 = vector.broadcast %23 : vector<64x1xf32> to vector<64x32xf32>
    %25 = arith.addf %22, %24 : vector<64x32xf32>
    %cst_12 = arith.constant 0.000000e+00 : f32
    %26 = vector.broadcast %cst_12 : f32 to vector<64x32xf32>
    %27 = arith.maximumf %25, %26 : vector<64x32xf32>
    %c0_13 = arith.constant 0 : index
    %c0_14 = arith.constant 0 : index
    %28 = vector.load %arg4[%c0_13, %c0_14] : memref<64x32xf32, #tpu.memory_space<vmem>>, vector<64x32xf32>
    tpu.vector_store %arg4[%c0_13, %c0_14], %27 {strides = array<i32>} : memref<64x32xf32, #tpu.memory_space<vmem>>, vector<64x32xf32>,
    return
  }
}

module attributes {stable_mosaic.version = 11 : i64} {
  func.func @_gemm_bn_relu_kernel(%arg0: memref<32x1024xf32, #tpu.memory_space<vmem>>, %arg1: memref<1024x128xf32, #tpu.memory_space<vmem>>, %arg2: memref<32x1xf32, #tpu.memory_space<vmem>>, %arg3: memref<32x1xf32, #tpu.memory_space<vmem>>, %arg4: memref<32x128xf32, #tpu.memory_space<vmem>>) attributes {dimension_semantics = [], scalar_prefetch = 0 : i64, scratch_operands = 0 : i64, tpu.core_type = #tpu.core_type<tc>} {
    %c0 = arith.constant 0 : index
    %c0_0 = arith.constant 0 : index
    %0 = vector.load %arg0[%c0, %c0_0] : memref<32x1024xf32, #tpu.memory_space<vmem>>, vector<32x1024xf32>
    %c0_1 = arith.constant 0 : index
    %c0_2 = arith.constant 0 : index
    %1 = vector.load %arg1[%c0_1, %c0_2] : memref<1024x128xf32, #tpu.memory_space<vmem>>, vector<1024x128xf32>
    %cst = arith.constant dense<0.000000e+00> : vector<32x128xf32>
    %2 = tpu.matmul %0, %1, %cst {dimension_numbers = #tpu.dot_dimension_numbers<[1], [0], [0], [1], [0, 0, 1, 1], [], []>} : vector<32x1024xf32>, vector<1024x128xf32>, vector<32x128xf32> -> vector<32x128xf32>
    %cst_3 = arith.constant dense<0.000000e+00> : vector<32xf32>
    %3 = vector.multi_reduction <add>, %2, %cst_3 [1] : vector<32x128xf32> to vector<32xf32>
    %4 = vector.shape_cast %3 : vector<32xf32> to vector<32x1xf32>
    %cst_4 = arith.constant 1.280000e+02 : f32
    %5 = vector.broadcast %cst_4 : f32 to vector<32x1xf32>
    %6 = arith.divf %4, %5 : vector<32x1xf32>
    %7 = vector.broadcast %6 : vector<32x1xf32> to vector<32x128xf32>
    %8 = arith.subf %2, %7 : vector<32x128xf32>
    %9 = arith.mulf %8, %8 : vector<32x128xf32>
    %cst_5 = arith.constant dense<0.000000e+00> : vector<32xf32>
    %10 = vector.multi_reduction <add>, %9, %cst_5 [1] : vector<32x128xf32> to vector<32xf32>
    %11 = vector.shape_cast %10 : vector<32xf32> to vector<32x1xf32>
    %cst_6 = arith.constant 1.280000e+02 : f32
    %12 = vector.broadcast %cst_6 : f32 to vector<32x1xf32>
    %13 = arith.divf %11, %12 : vector<32x1xf32>
    %c0_7 = arith.constant 0 : index
    %c0_8 = arith.constant 0 : index
    %14 = vector.load %arg2[%c0_7, %c0_8] : memref<32x1xf32, #tpu.memory_space<vmem>>, vector<32x1xf32>
    %cst_9 = arith.constant 9.99999974E-6 : f32
    %15 = vector.broadcast %cst_9 : f32 to vector<32x1xf32>
    %16 = arith.addf %13, %15 : vector<32x1xf32>
    %17 = math.rsqrt %16 : vector<32x1xf32>
    %18 = arith.mulf %14, %17 : vector<32x1xf32>
    %19 = vector.broadcast %6 : vector<32x1xf32> to vector<32x128xf32>
    %20 = arith.subf %2, %19 : vector<32x128xf32>
    %21 = vector.broadcast %18 : vector<32x1xf32> to vector<32x128xf32>
    %22 = arith.mulf %20, %21 : vector<32x128xf32>
    %c0_10 = arith.constant 0 : index
    %c0_11 = arith.constant 0 : index
    %23 = vector.load %arg3[%c0_10, %c0_11] : memref<32x1xf32, #tpu.memory_space<vmem>>, vector<32x1xf32>
    %24 = vector.broadcast %23 : vector<32x1xf32> to vector<32x128xf32>
    %25 = arith.addf %22, %24 : vector<32x128xf32>
    %cst_12 = arith.constant 0.000000e+00 : f32
    %26 = vector.broadcast %cst_12 : f32 to vector<32x128xf32>
    %27 = arith.maximumf %25, %26 : vector<32x128xf32>
    %c0_13 = arith.constant 0 : index
    %c0_14 = arith.constant 0 : index
    %28 = vector.load %arg4[%c0_13, %c0_14] : memref<32x128xf32, #tpu.memory_space<vmem>>, vector<32x128xf32>
    tpu.vector_store %arg4[%c0_13, %c0_14], %27 {strides = array<i32>} : memref<32x128xf32, #tpu.memory_space<vmem>>, vector<32x128xf32>,
    return
  }
}

module attributes {stable_mosaic.version = 11 : i64} {
  func.func @_gemm_bn_relu_kernel(%arg0: memref<16x512xf32, #tpu.memory_space<vmem>>, %arg1: memref<512x512xf32, #tpu.memory_space<vmem>>, %arg2: memref<16x1xf32, #tpu.memory_space<vmem>>, %arg3: memref<16x1xf32, #tpu.memory_space<vmem>>, %arg4: memref<16x512xf32, #tpu.memory_space<vmem>>) attributes {dimension_semantics = [], scalar_prefetch = 0 : i64, scratch_operands = 0 : i64, tpu.core_type = #tpu.core_type<tc>} {
    %c0 = arith.constant 0 : index
    %c0_0 = arith.constant 0 : index
    %0 = vector.load %arg0[%c0, %c0_0] : memref<16x512xf32, #tpu.memory_space<vmem>>, vector<16x512xf32>
    %c0_1 = arith.constant 0 : index
    %c0_2 = arith.constant 0 : index
    %1 = vector.load %arg1[%c0_1, %c0_2] : memref<512x512xf32, #tpu.memory_space<vmem>>, vector<512x512xf32>
    %cst = arith.constant dense<0.000000e+00> : vector<16x512xf32>
    %2 = tpu.matmul %0, %1, %cst {dimension_numbers = #tpu.dot_dimension_numbers<[1], [0], [0], [1], [0, 0, 1, 1], [], []>} : vector<16x512xf32>, vector<512x512xf32>, vector<16x512xf32> -> vector<16x512xf32>
    %cst_3 = arith.constant dense<0.000000e+00> : vector<16xf32>
    %3 = vector.multi_reduction <add>, %2, %cst_3 [1] : vector<16x512xf32> to vector<16xf32>
    %4 = vector.shape_cast %3 : vector<16xf32> to vector<16x1xf32>
    %cst_4 = arith.constant 5.120000e+02 : f32
    %5 = vector.broadcast %cst_4 : f32 to vector<16x1xf32>
    %6 = arith.divf %4, %5 : vector<16x1xf32>
    %7 = vector.broadcast %6 : vector<16x1xf32> to vector<16x512xf32>
    %8 = arith.subf %2, %7 : vector<16x512xf32>
    %9 = arith.mulf %8, %8 : vector<16x512xf32>
    %cst_5 = arith.constant dense<0.000000e+00> : vector<16xf32>
    %10 = vector.multi_reduction <add>, %9, %cst_5 [1] : vector<16x512xf32> to vector<16xf32>
    %11 = vector.shape_cast %10 : vector<16xf32> to vector<16x1xf32>
    %cst_6 = arith.constant 5.120000e+02 : f32
    %12 = vector.broadcast %cst_6 : f32 to vector<16x1xf32>
    %13 = arith.divf %11, %12 : vector<16x1xf32>
    %c0_7 = arith.constant 0 : index
    %c0_8 = arith.constant 0 : index
    %14 = vector.load %arg2[%c0_7, %c0_8] : memref<16x1xf32, #tpu.memory_space<vmem>>, vector<16x1xf32>
    %cst_9 = arith.constant 9.99999974E-6 : f32
    %15 = vector.broadcast %cst_9 : f32 to vector<16x1xf32>
    %16 = arith.addf %13, %15 : vector<16x1xf32>
    %17 = math.rsqrt %16 : vector<16x1xf32>
    %18 = arith.mulf %14, %17 : vector<16x1xf32>
    %19 = vector.broadcast %6 : vector<16x1xf32> to vector<16x512xf32>
    %20 = arith.subf %2, %19 : vector<16x512xf32>
    %21 = vector.broadcast %18 : vector<16x1xf32> to vector<16x512xf32>
    %22 = arith.mulf %20, %21 : vector<16x512xf32>
    %c0_10 = arith.constant 0 : index
    %c0_11 = arith.constant 0 : index
    %23 = vector.load %arg3[%c0_10, %c0_11] : memref<16x1xf32, #tpu.memory_space<vmem>>, vector<16x1xf32>
    %24 = vector.broadcast %23 : vector<16x1xf32> to vector<16x512xf32>
    %25 = arith.addf %22, %24 : vector<16x512xf32>
    %cst_12 = arith.constant 0.000000e+00 : f32
    %26 = vector.broadcast %cst_12 : f32 to vector<16x512xf32>
    %27 = arith.maximumf %25, %26 : vector<16x512xf32>
    %c0_13 = arith.constant 0 : index
    %c0_14 = arith.constant 0 : index
    %28 = vector.load %arg4[%c0_13, %c0_14] : memref<16x512xf32, #tpu.memory_space<vmem>>, vector<16x512xf32>
    tpu.vector_store %arg4[%c0_13, %c0_14], %27 {strides = array<i32>} : memref<16x512xf32, #tpu.memory_space<vmem>>, vector<16x512xf32>,
    return
  }
}

module attributes {stable_mosaic.version = 11 : i64} {
  func.func @_gemm_bn_relu_kernel(%arg0: memref<8x256xf32, #tpu.memory_space<vmem>>, %arg1: memref<256x2048xf32, #tpu.memory_space<vmem>>, %arg2: memref<8x1xf32, #tpu.memory_space<vmem>>, %arg3: memref<8x1xf32, #tpu.memory_space<vmem>>, %arg4: memref<8x2048xf32, #tpu.memory_space<vmem>>) attributes {dimension_semantics = [], scalar_prefetch = 0 : i64, scratch_operands = 0 : i64, tpu.core_type = #tpu.core_type<tc>} {
    %c0 = arith.constant 0 : index
    %c0_0 = arith.constant 0 : index
    %0 = vector.load %arg0[%c0, %c0_0] : memref<8x256xf32, #tpu.memory_space<vmem>>, vector<8x256xf32>
    %c0_1 = arith.constant 0 : index
    %c0_2 = arith.constant 0 : index
    %1 = vector.load %arg1[%c0_1, %c0_2] : memref<256x2048xf32, #tpu.memory_space<vmem>>, vector<256x2048xf32>
    %cst = arith.constant dense<0.000000e+00> : vector<8x2048xf32>
    %2 = tpu.matmul %0, %1, %cst {dimension_numbers = #tpu.dot_dimension_numbers<[1], [0], [0], [1], [0, 0, 1, 1], [], []>} : vector<8x256xf32>, vector<256x2048xf32>, vector<8x2048xf32> -> vector<8x2048xf32>
    %cst_3 = arith.constant dense<0.000000e+00> : vector<8xf32>
    %3 = vector.multi_reduction <add>, %2, %cst_3 [1] : vector<8x2048xf32> to vector<8xf32>
    %4 = vector.shape_cast %3 : vector<8xf32> to vector<8x1xf32>
    %cst_4 = arith.constant 2.048000e+03 : f32
    %5 = vector.broadcast %cst_4 : f32 to vector<8x1xf32>
    %6 = arith.divf %4, %5 : vector<8x1xf32>
    %7 = vector.broadcast %6 : vector<8x1xf32> to vector<8x2048xf32>
    %8 = arith.subf %2, %7 : vector<8x2048xf32>
    %9 = arith.mulf %8, %8 : vector<8x2048xf32>
    %cst_5 = arith.constant dense<0.000000e+00> : vector<8xf32>
    %10 = vector.multi_reduction <add>, %9, %cst_5 [1] : vector<8x2048xf32> to vector<8xf32>
    %11 = vector.shape_cast %10 : vector<8xf32> to vector<8x1xf32>
    %cst_6 = arith.constant 2.048000e+03 : f32
    %12 = vector.broadcast %cst_6 : f32 to vector<8x1xf32>
    %13 = arith.divf %11, %12 : vector<8x1xf32>
    %c0_7 = arith.constant 0 : index
    %c0_8 = arith.constant 0 : index
    %14 = vector.load %arg2[%c0_7, %c0_8] : memref<8x1xf32, #tpu.memory_space<vmem>>, vector<8x1xf32>
    %cst_9 = arith.constant 9.99999974E-6 : f32
    %15 = vector.broadcast %cst_9 : f32 to vector<8x1xf32>
    %16 = arith.addf %13, %15 : vector<8x1xf32>
    %17 = math.rsqrt %16 : vector<8x1xf32>
    %18 = arith.mulf %14, %17 : vector<8x1xf32>
    %19 = vector.broadcast %6 : vector<8x1xf32> to vector<8x2048xf32>
    %20 = arith.subf %2, %19 : vector<8x2048xf32>
    %21 = vector.broadcast %18 : vector<8x1xf32> to vector<8x2048xf32>
    %22 = arith.mulf %20, %21 : vector<8x2048xf32>
    %c0_10 = arith.constant 0 : index
    %c0_11 = arith.constant 0 : index
    %23 = vector.load %arg3[%c0_10, %c0_11] : memref<8x1xf32, #tpu.memory_space<vmem>>, vector<8x1xf32>
    %24 = vector.broadcast %23 : vector<8x1xf32> to vector<8x2048xf32>
    %25 = arith.addf %22, %24 : vector<8x2048xf32>
    %cst_12 = arith.constant 0.000000e+00 : f32
    %26 = vector.broadcast %cst_12 : f32 to vector<8x2048xf32>
    %27 = arith.maximumf %25, %26 : vector<8x2048xf32>
    %c0_13 = arith.constant 0 : index
    %c0_14 = arith.constant 0 : index
    %28 = vector.load %arg4[%c0_13, %c0_14] : memref<8x2048xf32, #tpu.memory_space<vmem>>, vector<8x2048xf32>
    tpu.vector_store %arg4[%c0_13, %c0_14], %27 {strides = array<i32>} : memref<8x2048xf32, #tpu.memory_space<vmem>>, vector<8x2048xf32>,
    return
  }
}

module attributes {stable_mosaic.version = 11 : i64} {
  func.func @_gemm_tanh_kernel(%arg0: i32, %arg1: memref<3x128xf32, #tpu.memory_space<vmem>>, %arg2: memref<128x2048xf32, #tpu.memory_space<vmem>>, %arg3: memref<3x2048xf32, #tpu.memory_space<vmem>>) attributes {dimension_semantics = [#tpu.dimension_semantics<parallel>], iteration_bounds = array<i64: 4>, scalar_prefetch = 0 : i64, scratch_operands = 0 : i64, tpu.core_type = #tpu.core_type<tc>, window_params = [{pipeline_mode = #tpu.pipeline_mode<synchronous>, transform_indices = @transform_0, window_bounds = array<i64: 3, 128>}, {transform_indices = @transform_1, window_bounds = array<i64: 128, 2048>}, {transform_indices = @transform_2, window_bounds = array<i64: 3, 2048>}]} {
    %c0 = arith.constant 0 : index
    %c0_0 = arith.constant 0 : index
    %0 = vector.load %arg1[%c0, %c0_0] : memref<3x128xf32, #tpu.memory_space<vmem>>, vector<3x128xf32>
    %c0_1 = arith.constant 0 : index
    %c0_2 = arith.constant 0 : index
    %1 = vector.load %arg2[%c0_1, %c0_2] : memref<128x2048xf32, #tpu.memory_space<vmem>>, vector<128x2048xf32>
    %cst = arith.constant dense<0.000000e+00> : vector<3x2048xf32>
    %2 = tpu.matmul %0, %1, %cst {dimension_numbers = #tpu.dot_dimension_numbers<[1], [0], [0], [1], [0, 0, 1, 1], [], []>} : vector<3x128xf32>, vector<128x2048xf32>, vector<3x2048xf32> -> vector<3x2048xf32>
    %3 = math.tanh %2 : vector<3x2048xf32>
    %c0_3 = arith.constant 0 : index
    %c0_4 = arith.constant 0 : index
    %4 = vector.load %arg3[%c0_3, %c0_4] : memref<3x2048xf32, #tpu.memory_space<vmem>>, vector<3x2048xf32>
    tpu.vector_store %arg3[%c0_3, %c0_4], %3 {strides = array<i32>} : memref<3x2048xf32, #tpu.memory_space<vmem>>, vector<3x2048xf32>,
    return
  }
  func.func @transform_0(%arg0: i32) -> (i32, i32) {
    %c0_i32 = arith.constant 0 : i32
    %c0_i32_0 = arith.constant 0 : i32
    %c0_i32_1 = arith.constant 0 : i32
    return %c0_i32, %c0_i32_0 : i32, i32
  }
  func.func @transform_1(%arg0: i32) -> (i32, i32) {
    %c0_i32 = arith.constant 0 : i32
    %c0_i32_0 = arith.constant 0 : i32
    return %c0_i32, %arg0 : i32, i32
  }
  func.func @transform_2(%arg0: i32) -> (i32, i32) {
    %c0_i32 = arith.constant 0 : i32
    %c0_i32_0 = arith.constant 0 : i32
    return %c0_i32, %arg0 : i32, i32
  }
}

</mosaic_0001>

<bundles_post_ra>
// kernel: generator_forward.5
= control target key start
LH: loop header
LB: loop body
LE: loop exit
PB: predicated region body
PF: predicated region fallthrough
CT: control target
= control target key end

     0   :  { %vm146_vm0 = vcmask 261120   ;;  %v519_v48 = vmov 0   ;;  %s753_s1 = inlined_call_operand.vmem [shape: f32[128,32], index: 1, kind: input, shape index: {}]   ;;  %s754_s0 = inlined_call_operand.vmem [shape: f32[64,128], index: 0, kind: input, shape index: {}]   ;;  %s755_s3 = inlined_call_operand.vmem [shape: f32[64,1], index: 3, kind: input, shape index: {}]   ;;  %s756_s2 = inlined_call_operand.vmem [shape: f32[64,1], index: 2, kind: input, shape index: {}]   ;;  %s757_s4 = inlined_call_operand.vmem [shape: f32[64,32], index: 4, kind: output, shape index: {}]  }
   0x1   :  { %v25_v0 = vld [vmem:[%s753_s1] sm:$0xff]  ;;  %v26_v1 = vld [vmem:[%s753_s1 + $0x8] sm:$0xff]  ;;  %v27_v2 = vld [vmem:[%s753_s1 + $0x10] sm:$0xff]  ;;  %501 = vset.pattern.permute.xlu1 %v519_v48  ;;  %502 = vset.pattern.permute.xlu0 %v519_v48 }
   0x2   :  { %v452_v3 = vpack.c.bf16 %v26_v1, %v25_v0  ;;  %v28_v4 = vld [vmem:[%s753_s1 + $0x18] sm:$0xff]  ;;  %v29_v6 = vld [vmem:[%s753_s1 + $0x20] sm:$0xff]  ;;  %v30_v7 = vld [vmem:[%s753_s1 + $0x28] sm:$0xff] }
   0x3   :  { %v456_v5 = vpack.c.bf16 %v28_v4, %v27_v2  ;;  %v460_v8 = vpack.c.bf16 %v30_v7, %v29_v6  ;;  %v17_v9 = vld [vmem:[%s754_s0] sm:$0xff]  ;;  %v31_v11 = vld [vmem:[%s753_s1 + $0x30] sm:$0xff]  ;;  %v32_v12 = vld [vmem:[%s753_s1 + $0x38] sm:$0xff] }
   0x4   :  { %453 = vmatprep.subr.bf16.mxu0 %v452_v3  ;;  %484 = vmatprep.subr.bf16.mxu1 %v452_v3  ;;  %v21_v10 = vld [vmem:[%s754_s0 + $0x20] sm:$0xff]  ;;  %v464_v13 = vpack.c.bf16 %v32_v12, %v31_v11  ;;  %v34_v15 = vld [vmem:[%s753_s1 + $0x48] sm:$0xff]  ;;  %v35_v17 = vld [vmem:[%s753_s1 + $0x50] sm:$0xff] }
   0x5   :  { %455 = vmatpush3.bf16.msra.mxu0 %v452_v3  ;;  %492 = vmatpush3.bf16.msra.mxu1 %v452_v3  ;;  %v33_v14 = vld [vmem:[%s753_s1 + $0x40] sm:$0xff]  ;;  %v36_v18 = vld [vmem:[%s753_s1 + $0x58] sm:$0xff]  ;;  %v38_v21 = vld [vmem:[%s753_s1 + $0x68] sm:$0xff] }
   0x6   :  { %457 = vmatprep.subr.bf16.mxu0 %v456_v5  ;;  %485 = vmatprep.subr.bf16.mxu1 %v456_v5  ;;  %v468_v16 = vpack.c.bf16 %v34_v15, %v33_v14  ;;  %v472_v19 = vpack.c.bf16 %v36_v18, %v35_v17  ;;  %v37_v20 = vld [vmem:[%s753_s1 + $0x60] sm:$0xff]  ;;  %v39_v23 = vld [vmem:[%s753_s1 + $0x70] sm:$0xff]  ;;  %v40_v24 = vld [vmem:[%s753_s1 + $0x78] sm:$0xff] }
   0x7   :  { %440 = vmatprep.mubr.f32.mxu0 %v17_v9  ;;  %446 = vmatprep.mubr.f32.mxu1 %v21_v10  ;;  %v476_v22 = vpack.c.bf16 %v38_v21, %v37_v20  ;;  %v480_v25 = vpack.c.bf16 %v40_v24, %v39_v23  ;;  %v18_v26 = vld [vmem:[%s754_s0 + $0x8] sm:$0xff]  ;;  %v19_v28 = vld [vmem:[%s754_s0 + $0x10] sm:$0xff]  ;;  %v20_v30 = vld [vmem:[%s754_s0 + $0x18] sm:$0xff] }
   0x8   :  { %v22_v27 = vld [vmem:[%s754_s0 + $0x28] sm:$0xff]  ;;  %v23_v29 = vld [vmem:[%s754_s0 + $0x30] sm:$0xff]  ;;  %v24_v31 = vld [vmem:[%s754_s0 + $0x38] sm:$0xff] }
   0x9   :  { %459 = vmatpush3.bf16.msra.mxu0 %v456_v5  ;;  %493 = vmatpush3.bf16.msra.mxu1 %v456_v5 }
   0xa   :  { %461 = vmatprep.subr.bf16.mxu0 %v460_v8  ;;  %486 = vmatprep.subr.bf16.mxu1 %v460_v8 }
   0xd   :  { %463 = vmatpush3.bf16.msra.mxu0 %v460_v8  ;;  %494 = vmatpush3.bf16.msra.mxu1 %v460_v8 }
   0xe   :  { %465 = vmatprep.subr.bf16.mxu0 %v464_v13  ;;  %487 = vmatprep.subr.bf16.mxu1 %v464_v13 }
  0x11   :  { %467 = vmatpush3.bf16.msra.mxu0 %v464_v13  ;;  %495 = vmatpush3.bf16.msra.mxu1 %v464_v13 }
  0x12   :  { %469 = vmatprep.subr.bf16.mxu0 %v468_v16  ;;  %488 = vmatprep.subr.bf16.mxu1 %v468_v16 }
  0x15   :  { %471 = vmatpush3.bf16.msra.mxu0 %v468_v16  ;;  %496 = vmatpush3.bf16.msra.mxu1 %v468_v16 }
  0x16   :  { %473 = vmatprep.subr.bf16.mxu0 %v472_v19  ;;  %489 = vmatprep.subr.bf16.mxu1 %v472_v19 }
  0x19   :  { %475 = vmatpush3.bf16.msra.mxu0 %v472_v19  ;;  %497 = vmatpush3.bf16.msra.mxu1 %v472_v19 }
  0x1a   :  { %477 = vmatprep.subr.bf16.mxu0 %v476_v22  ;;  %490 = vmatprep.subr.bf16.mxu1 %v476_v22 }
  0x1d   :  { %479 = vmatpush3.bf16.msra.mxu0 %v476_v22  ;;  %498 = vmatpush3.bf16.msra.mxu1 %v476_v22 }
  0x1e   :  { %481 = vmatprep.subr.bf16.mxu0 %v480_v25  ;;  %491 = vmatprep.subr.bf16.mxu1 %v480_v25 }
  0x21   :  { %483 = vmatpush3.bf16.msra.mxu0 %v480_v25  ;;  %499 = vmatpush3.bf16.msra.mxu1 %v480_v25  ;;  %v308_v25 = vld [vmem:[%s755_s3] sm:$0xff] }
  0x24   :  { %441 = vmatmul.mubr.f32.vlgmr.msra.gmra.mrb[0].mxu0 %v18_v26  ;;  %447 = vmatmul.mubr.f32.vlgmr.msra.gmra.mrb[0].mxu1 %v22_v27  ;;  %v310_v26 = vld [vmem:[%s755_s3 + $0x10] sm:$0xff]  ;;  %v312_v27 = vld [vmem:[%s755_s3 + $0x20] sm:$0xff] }
  0x25   :  { %443 = vmatprep.mubr.f32.mxu0 %v19_v28  ;;  %449 = vmatprep.mubr.f32.mxu1 %v23_v29  ;;  %v309_v28 = vld [vmem:[%s755_s3 + $0x8] sm:$0xff]  ;;  %v311_v29 = vld [vmem:[%s755_s3 + $0x18] sm:$0xff] }
  0x28   :  { %444 = vmatmul.mubr.f32.gmra.mrb[2].mxu0 %v20_v30  ;;  %450 = vmatmul.mubr.f32.gmra.mrb[2].mxu1 %v24_v31  ;;  %v313_v30 = vld [vmem:[%s755_s3 + $0x28] sm:$0xff] }
  0xf7   :  { %v442_v32 = vpop.f32.mrb[0].mxu0  ;;  %v448_v33 = vpop.f32.mrb[0].mxu1 }
  0xf8   :  { %v107_v34 = vpop.f32.mrb[1].mxu0  ;;  %v162_v35 = vsel %vm146_vm0, %v448_v33, 0.0  ;;  %v150_v36 = vsel %vm146_vm0, %v442_v32, 0.0  ;;  %v127_v37 = vpop.f32.mrb[1].mxu1 }
  0xf9   :  { %163 = vadd.xlane.f32.xlu1 %v162_v35  ;;  %151 = vadd.xlane.f32.xlu0 %v150_v36  ;;  %v147_v40 = vsel %vm146_vm0, %v107_v34, 0.0  ;;  %v159_v45 = vsel %vm146_vm0, %v127_v37, 0.0 }
  0xfb   :  { %v445_v38 = vpop.f32.mrb[2].mxu0  ;;  %v451_v39 = vpop.f32.mrb[2].mxu1 }
  0xfc   :  { %v156_v41 = vsel %vm146_vm0, %v445_v38, 0.0  ;;  %v117_v42 = vpop.f32.mrb[3].mxu0  ;;  %v137_v43 = vpop.f32.mrb[3].mxu1  ;;  %v168_v47 = vsel %vm146_vm0, %v451_v39, 0.0 }
  0xfd   :  { %148 = vadd.xlane.f32.xlu0 %v147_v40  ;;  %157 = vadd.xlane.f32.xlu1 %v156_v41  ;;  %v153_v44 = vsel %vm146_vm0, %v117_v42, 0.0  ;;  %v165_v46 = vsel %vm146_vm0, %v137_v43, 0.0 }
 0x101   :  { %160 = vadd.xlane.f32.xlu0 %v159_v45  ;;  %154 = vadd.xlane.f32.xlu1 %v153_v44 }
 0x105   :  { %166 = vadd.xlane.f32.xlu0 %v165_v46  ;;  %169 = vadd.xlane.f32.xlu1 %v168_v47 }
 0x186   :  { %v164_v49 = vpop.xlane.xlu1 %163  ;;  %v152_v50 = vpop.xlane.xlu0 %151 }
 0x187   :  { %v177_v51 = vmul.f32 0.03125, %v164_v49  ;;  %v173_v52 = vmul.f32 0.03125, %v152_v50  ;;  %v229_v49 = vld [vmem:[%s756_s2 + $0x8] sm:$0xff] }
 0x189   :  { %v625_v53 = vsub.f32 %v448_v33, %v177_v51  ;;  %v627_v54 = vsub.f32 %v442_v32, %v173_v52 }
 0x18a   :  { %v149_v55 = vpop.xlane.xlu0 %148  ;;  %v158_v56 = vpop.xlane.xlu1 %157 }
 0x18b   :  { %v172_v57 = vmul.f32 0.03125, %v149_v55  ;;  %v175_v58 = vmul.f32 0.03125, %v158_v56  ;;  %v189_v59 = vmul.f32 %v627_v54, %v627_v54  ;;  %v193_v63 = vmul.f32 %v625_v53, %v625_v53 }
 0x18d   :  { %v631_v60 = vsub.f32 %v107_v34, %v172_v57  ;;  %v633_v61 = vsub.f32 %v445_v38, %v175_v58  ;;  %v199_v62 = vsel %vm146_vm0, %v189_v59, 0.0  ;;  %v211_v9 = vsel %vm146_vm0, %v193_v63, 0.0  ;;  %v228_v57 = vld [vmem:[%s756_s2] sm:$0xff]  ;;  %v233_v58 = vld [vmem:[%s756_s2 + $0x28] sm:$0xff] }
 0x18e   :  { %v161_v0 = vpop.xlane.xlu0 %160  ;;  %200 = vadd.xlane.f32.xlu1 %v199_v62  ;;  %v155_v1 = vpop.xlane.xlu1 %154 }
 0x18f   :  { %v176_v2 = vmul.f32 0.03125, %v161_v0  ;;  %v174_v3 = vmul.f32 0.03125, %v155_v1  ;;  %v188_v4 = vmul.f32 %v631_v60, %v631_v60  ;;  %v191_v5 = vmul.f32 %v633_v61, %v633_v61 }
 0x191   :  { %v642_v6 = vsub.f32 %v127_v37, %v176_v2  ;;  %v644_v7 = vsub.f32 %v117_v42, %v174_v3  ;;  %v196_v8 = vsel %vm146_vm0, %v188_v4, 0.0  ;;  %v205_v15 = vsel %vm146_vm0, %v191_v5, 0.0  ;;  %v232_v3 = vld [vmem:[%s756_s2 + $0x20] sm:$0xff]  ;;  %v315_v5 = vld [vmem:[%s755_s3 + $0x38] sm:$0xff] }
 0x192   :  { %197 = vadd.xlane.f32.xlu0 %v196_v8  ;;  %v167_v10 = vpop.xlane.xlu0 %166  ;;  %212 = vadd.xlane.f32.xlu1 %v211_v9  ;;  %v170_v11 = vpop.xlane.xlu1 %169 }
 0x193   :  { %v178_v12 = vmul.f32 0.03125, %v167_v10  ;;  %v179_v13 = vmul.f32 0.03125, %v170_v11  ;;  %v192_v14 = vmul.f32 %v642_v6, %v642_v6  ;;  %v190_v19 = vmul.f32 %v644_v7, %v644_v7  ;;  %v231_v11 = vld [vmem:[%s756_s2 + $0x18] sm:$0xff] }
 0x195   :  { %v651_v16 = vsub.f32 %v137_v43, %v178_v12  ;;  %v653_v17 = vsub.f32 %v451_v39, %v179_v13  ;;  %v208_v18 = vsel %vm146_vm0, %v192_v14, 0.0  ;;  %v202_v21 = vsel %vm146_vm0, %v190_v19, 0.0  ;;  %v235_v14 = vld [vmem:[%s756_s2 + $0x38] sm:$0xff]  ;;  %v230_v19 = vld [vmem:[%s756_s2 + $0x10] sm:$0xff] }
 0x196   :  { %209 = vadd.xlane.f32.xlu0 %v208_v18  ;;  %206 = vadd.xlane.f32.xlu1 %v205_v15 }
 0x197   :  { %v195_v20 = vmul.f32 %v653_v17, %v653_v17  ;;  %v194_v23 = vmul.f32 %v651_v16, %v651_v16 }
 0x199   :  { %v217_v22 = vsel %vm146_vm0, %v195_v20, 0.0  ;;  %v214_v24 = vsel %vm146_vm0, %v194_v23, 0.0 }
 0x19a   :  { %203 = vadd.xlane.f32.xlu0 %v202_v21  ;;  %218 = vadd.xlane.f32.xlu1 %v217_v22  ;;  %v234_v22 = vld [vmem:[%s756_s2 + $0x30] sm:$0xff] }
 0x19e   :  { %215 = vadd.xlane.f32.xlu0 %v214_v24  ;;  %v314_v24 = vld [vmem:[%s755_s3 + $0x30] sm:$0xff] }
 0x1ab   :  { %318 = vperm.xlu1 %501, %v308_v25  }
 0x1af   :  { %328 = vperm.xlu1 %501, %v310_v26  }
 0x1b3   :  { %338 = vperm.xlu1 %501, %v312_v27  }
 0x1b4   :  { %323 = vperm.xlu0 %502, %v309_v28  }
 0x1b8   :  { %333 = vperm.xlu0 %502, %v311_v29  }
 0x1bc   :  { %343 = vperm.xlu0 %502, %v313_v30  }
 0x21b   :  { %v201_v31 = vpop.xlane.xlu1 %200 }
 0x21c   :  { %v221_v32 = vmul.f32 0.03125, %v201_v31 }
 0x21e   :  { %v237_v33 = vadd.f32 1e-05, %v221_v32 }
 0x21f   :  { %v198_v34 = vpop.xlane.xlu0 %197  ;;  %v213_v35 = vpop.xlane.xlu1 %212 }
 0x220   :  { %503 = vrsqrt.f32 %v237_v33  ;;  %v220_v36 = vmul.f32 0.03125, %v198_v34  ;;  %v225_v37 = vmul.f32 0.03125, %v213_v35 }
 0x222   :  { %v236_v38 = vadd.f32 1e-05, %v220_v36  ;;  %v241_v39 = vadd.f32 1e-05, %v225_v37 }
 0x223   :  { %v210_v40 = vpop.xlane.xlu0 %209  ;;  %v207_v41 = vpop.xlane.xlu1 %206 }
 0x224   :  { %505 = vrsqrt.f32 %v236_v38  ;;  %v224_v42 = vmul.f32 0.03125, %v210_v40  ;;  %v223_v43 = vmul.f32 0.03125, %v207_v41 }
 0x225   :  { %507 = vrsqrt.f32 %v241_v39 }
 0x226   :  { %v240_v44 = vadd.f32 1e-05, %v224_v42  ;;  %v239_v45 = vadd.f32 1e-05, %v223_v43 }
 0x227   :  { %v204_v46 = vpop.xlane.xlu0 %203  ;;  %v219_v47 = vpop.xlane.xlu1 %218 }
 0x228   :  { %509 = vrsqrt.f32 %v240_v44  ;;  %v227_v48 = vmul.f32 0.03125, %v219_v47  ;;  %v222_v51 = vmul.f32 0.03125, %v204_v46 }
 0x229   :  { %511 = vrsqrt.f32 %v239_v45 }
 0x22a   :  { %v504_v50 = vpop.eup %503  ;;  %v243_v52 = vadd.f32 1e-05, %v227_v48  ;;  %v238_v63 = vadd.f32 1e-05, %v222_v51 }
 0x22b   :  { %v253_v55 = vmul.f32 %v504_v50, %v229_v49  ;;  %v216_v56 = vpop.xlane.xlu0 %215  ;;  %v319_v25 = vpop.permute.xlu1 %318 }
 0x22c   :  { %513 = vrsqrt.f32 %v243_v52  ;;  %v226_v0 = vmul.f32 0.03125, %v216_v56 }
 0x22d   :  { %267 = vperm.xlu1 %501, %v253_v55   ;;  %515 = vrsqrt.f32 %v238_v63 }
 0x22e   :  { %v506_v59 = vpop.eup %505  ;;  %v242_v8 = vadd.f32 1e-05, %v226_v0 }
 0x22f   :  { %v508_v62 = vpop.eup %507  ;;  %v252_v1 = vmul.f32 %v506_v59, %v228_v57  ;;  %v329_v27 = vpop.permute.xlu1 %328 }
 0x230   :  { %v257_v2 = vmul.f32 %v508_v62, %v233_v58  ;;  %517 = vrsqrt.f32 %v242_v8 }
 0x231   :  { %262 = vperm.xlu0 %502, %v252_v1  }
 0x232   :  { %v510_v4 = vpop.eup %509  ;;  %287 = vperm.xlu1 %501, %v257_v2  }
 0x233   :  { %v256_v9 = vmul.f32 %v510_v4, %v232_v3  ;;  %v512_v10 = vpop.eup %511  ;;  %v324_v26 = vpop.permute.xlu0 %323 }
 0x234   :  { %v255_v12 = vmul.f32 %v512_v10, %v231_v11  ;;  %v339_v29 = vpop.permute.xlu1 %338 }
 0x235   :  { %353 = vperm.xlu0 %502, %v315_v5  }
 0x236   :  { %282 = vperm.xlu1 %501, %v256_v9   ;;  %v514_v13 = vpop.eup %513 }
 0x237   :  { %v259_v15 = vmul.f32 %v514_v13, %v235_v14  ;;  %v516_v18 = vpop.eup %515  ;;  %v334_v28 = vpop.permute.xlu0 %333 }
 0x238   :  { %v254_v20 = vmul.f32 %v516_v18, %v230_v19 }
 0x23a   :  { %277 = vperm.xlu1 %501, %v255_v12   ;;  %v518_v21 = vpop.eup %517 }
 0x23b   :  { %v258_v23 = vmul.f32 %v518_v21, %v234_v22  ;;  %v344_v30 = vpop.permute.xlu0 %343 }
 0x23e   :  { %297 = vperm.xlu1 %501, %v259_v15  }
 0x242   :  { %272 = vperm.xlu1 %501, %v254_v20  }
 0x246   :  { %292 = vperm.xlu1 %501, %v258_v23  }
 0x24a   :  { %348 = vperm.xlu1 %501, %v314_v24  }
 0x2ac   :  { %v268_v31 = vpop.permute.xlu1 %267 }
 0x2ad   :  { %v301_v32 = vmul.f32 %v268_v31, %v627_v54 }
 0x2af   :  { %v357_v33 = vadd.f32 %v324_v26, %v301_v32 }
 0x2b0   :  { %v263_v34 = vpop.permute.xlu0 %262 }
 0x2b1   :  { %v365_v35 = vmax.f32 %v357_v33, 0.0  ;;  %v300_v36 = vmul.f32 %v263_v34, %v631_v60  ;;  %v288_v37 = vpop.permute.xlu1 %287 }
 0x2b2   :  { %v305_v38 = vmul.f32 %v288_v37, %v625_v53 }
 0x2b3   :  { %373 = vst.msk [vmem:[%s757_s4 + $0x8] sm:$0xff] %vm146_vm0, %v365_v35  ;;  %v356_v39 = vadd.f32 %v319_v25, %v300_v36 }
 0x2b4   :  { %v361_v40 = vadd.f32 %v344_v30, %v305_v38  ;;  %v354_v49 = vpop.permute.xlu0 %353 }
 0x2b5   :  { %v364_v41 = vmax.f32 %v356_v39, 0.0  ;;  %v283_v42 = vpop.permute.xlu1 %282 }
 0x2b6   :  { %v369_v43 = vmax.f32 %v361_v40, 0.0  ;;  %v304_v54 = vmul.f32 %v283_v42, %v642_v6 }
 0x2b7   :  { %372 = vst.msk [vmem:[%s757_s4] sm:$0xff] %vm146_vm0, %v364_v41 }
 0x2b8   :  { %377 = vst.msk [vmem:[%s757_s4 + $0x28] sm:$0xff] %vm146_vm0, %v369_v43  ;;  %v360_v53 = vadd.f32 %v339_v29, %v304_v54 }
 0x2b9   :  { %v278_v60 = vpop.permute.xlu1 %277 }
 0x2ba   :  { %v368_v44 = vmax.f32 %v360_v53, 0.0  ;;  %v303_v45 = vmul.f32 %v278_v60, %v633_v61 }
 0x2bc   :  { %376 = vst.msk [vmem:[%s757_s4 + $0x20] sm:$0xff] %vm146_vm0, %v368_v44  ;;  %v359_v6 = vadd.f32 %v334_v28, %v303_v45 }
 0x2bd   :  { %v298_v46 = vpop.permute.xlu1 %297 }
 0x2be   :  { %v367_v47 = vmax.f32 %v359_v6, 0.0  ;;  %v307_v48 = vmul.f32 %v298_v46, %v653_v17 }
 0x2c0   :  { %375 = vst.msk [vmem:[%s757_s4 + $0x18] sm:$0xff] %vm146_vm0, %v367_v47  ;;  %v363_v50 = vadd.f32 %v354_v49, %v307_v48 }
 0x2c1   :  { %v273_v51 = vpop.permute.xlu1 %272 }
 0x2c2   :  { %v371_v52 = vmax.f32 %v363_v50, 0.0  ;;  %v302_v61 = vmul.f32 %v273_v51, %v644_v7 }
 0x2c4   :  { %379 = vst.msk [vmem:[%s757_s4 + $0x38] sm:$0xff] %vm146_vm0, %v371_v52  ;;  %v358_v55 = vadd.f32 %v329_v27, %v302_v61 }
 0x2c5   :  { %v293_v56 = vpop.permute.xlu1 %292 }
 0x2c6   :  { %v366_v57 = vmax.f32 %v358_v55, 0.0  ;;  %v306_v17 = vmul.f32 %v293_v56, %v651_v16 }
 0x2c8   :  { %374 = vst.msk [vmem:[%s757_s4 + $0x10] sm:$0xff] %vm146_vm0, %v366_v57 }
 0x2c9   :  { %v349_v58 = vpop.permute.xlu1 %348 }
 0x2ca   :  { %v362_v59 = vadd.f32 %v349_v58, %v306_v17 }
 0x2cc   :  { %v370_v62 = vmax.f32 %v362_v59, 0.0 }
 0x2ce   :  { %378 = vst.msk [vmem:[%s757_s4 + $0x30] sm:$0xff] %vm146_vm0, %v370_v62 }

// kernel: generator_forward.6
= control target key start
LH: loop header
LB: loop body
LE: loop exit
PB: predicated region body
PF: predicated region fallthrough
CT: control target
= control target key end

     0   :  { %s1507_s1 = inlined_call_operand.vmem [shape: f32[1024,128], index: 1, kind: input, shape index: {}]   ;;  %s1508_s0 = inlined_call_operand.vmem [shape: f32[32,1024], index: 0, kind: input, shape index: {}]   ;;  %s1509_s3 = inlined_call_operand.vmem [shape: f32[32,1], index: 3, kind: input, shape index: {}]   ;;  %s1510_s2 = inlined_call_operand.vmem [shape: f32[32,1], index: 2, kind: input, shape index: {}]   ;;  %s1511_s4 = inlined_call_operand.vmem [shape: f32[32,128], index: 4, kind: output, shape index: {}]  }
   0x1   :  { %v65_v0 = vld [vmem:[%s1507_s1 + $0x80] sm:$0xff]  ;;  %v66_v1 = vld [vmem:[%s1507_s1 + $0x88] sm:$0xff]  ;;  %v67_v11 = vld [vmem:[%s1507_s1 + $0x90] sm:$0xff] }
   0x2   :  { %v97_v2 = vld [vmem:[%s1507_s1 + $0x180] sm:$0xff]  ;;  %v806_v3 = vpack.c.bf16 %v66_v1, %v65_v0  ;;  %v98_v4 = vld [vmem:[%s1507_s1 + $0x188] sm:$0xff]  ;;  %v68_v13 = vld [vmem:[%s1507_s1 + $0x98] sm:$0xff] }
   0x3   :  { %v49_v5 = vld [vmem:[%s1507_s1] sm:$0xff]  ;;  %v50_v6 = vld [vmem:[%s1507_s1 + $0x8] sm:$0xff]  ;;  %v838_v7 = vpack.c.bf16 %v98_v4, %v97_v2  ;;  %v99_v14 = vld [vmem:[%s1507_s1 + $0x190] sm:$0xff]  ;;  %v810_v16 = vpack.c.bf16 %v68_v13, %v67_v11 }
   0x4   :  { %v808_v8 = vpack.c.bf16 %v50_v6, %v49_v5  ;;  %v81_v9 = vld [vmem:[%s1507_s1 + $0x100] sm:$0xff]  ;;  %v82_v10 = vld [vmem:[%s1507_s1 + $0x108] sm:$0xff]  ;;  %807 = vmatprep.subr.bf16.mxu0 %v806_v3  ;;  %v100_v15 = vld [vmem:[%s1507_s1 + $0x198] sm:$0xff] }
   0x5   :  { %v840_v12 = vpack.c.bf16 %v82_v10, %v81_v9  ;;  %839 = vmatprep.subr.bf16.mxu1 %v838_v7  ;;  %v842_v17 = vpack.c.bf16 %v100_v15, %v99_v14  ;;  %v51_v18 = vld [vmem:[%s1507_s1 + $0x10] sm:$0xff]  ;;  %v52_v19 = vld [vmem:[%s1507_s1 + $0x18] sm:$0xff]  ;;  %v69_v23 = vld [vmem:[%s1507_s1 + $0xa0] sm:$0xff] }
   0x6   :  { %809 = vmatpush3.bf16.msra.mxu0 %v808_v8  ;;  %v83_v20 = vld [vmem:[%s1507_s1 + $0x110] sm:$0xff]  ;;  %v812_v21 = vpack.c.bf16 %v52_v19, %v51_v18  ;;  %v84_v22 = vld [vmem:[%s1507_s1 + $0x118] sm:$0xff]  ;;  %v70_v24 = vld [vmem:[%s1507_s1 + $0xa8] sm:$0xff] }
   0x7   :  { %841 = vmatpush3.bf16.msra.mxu1 %v840_v12  ;;  %811 = vmatprep.subr.bf16.mxu0 %v810_v16  ;;  %v844_v25 = vpack.c.bf16 %v84_v22, %v83_v20  ;;  %v814_v26 = vpack.c.bf16 %v70_v24, %v69_v23  ;;  %v101_v27 = vld [vmem:[%s1507_s1 + $0x1a0] sm:$0xff]  ;;  %v102_v28 = vld [vmem:[%s1507_s1 + $0x1a8] sm:$0xff]  ;;  %v71_v35 = vld [vmem:[%s1507_s1 + $0xb0] sm:$0xff] }
   0x8   :  { %843 = vmatprep.subr.bf16.mxu1 %v842_v17  ;;  %v53_v29 = vld [vmem:[%s1507_s1 + $0x20] sm:$0xff]  ;;  %v846_v30 = vpack.c.bf16 %v102_v28, %v101_v27  ;;  %v54_v31 = vld [vmem:[%s1507_s1 + $0x28] sm:$0xff]  ;;  %v72_v36 = vld [vmem:[%s1507_s1 + $0xb8] sm:$0xff] }
   0x9   :  { %v85_v32 = vld [vmem:[%s1507_s1 + $0x120] sm:$0xff]  ;;  %v86_v33 = vld [vmem:[%s1507_s1 + $0x128] sm:$0xff]  ;;  %v816_v34 = vpack.c.bf16 %v54_v31, %v53_v29  ;;  %v103_v37 = vld [vmem:[%s1507_s1 + $0x1b0] sm:$0xff]  ;;  %v818_v39 = vpack.c.bf16 %v72_v36, %v71_v35 }
   0xa   :  { %813 = vmatpush3.bf16.msra.mxu0 %v812_v21  ;;  %v848_v38 = vpack.c.bf16 %v86_v33, %v85_v32  ;;  %v104_v40 = vld [vmem:[%s1507_s1 + $0x1b8] sm:$0xff]  ;;  %v55_v41 = vld [vmem:[%s1507_s1 + $0x30] sm:$0xff]  ;;  %v73_v46 = vld [vmem:[%s1507_s1 + $0xc0] sm:$0xff] }
   0xb   :  { %845 = vmatpush3.bf16.msra.mxu1 %v844_v25  ;;  %815 = vmatprep.subr.bf16.mxu0 %v814_v26  ;;  %v56_v42 = vld [vmem:[%s1507_s1 + $0x38] sm:$0xff]  ;;  %v850_v43 = vpack.c.bf16 %v104_v40, %v103_v37  ;;  %v87_v44 = vld [vmem:[%s1507_s1 + $0x130] sm:$0xff]  ;;  %v74_v47 = vld [vmem:[%s1507_s1 + $0xc8] sm:$0xff] }
   0xc   :  { %847 = vmatprep.subr.bf16.mxu1 %v846_v30  ;;  %v88_v45 = vld [vmem:[%s1507_s1 + $0x138] sm:$0xff]  ;;  %v105_v48 = vld [vmem:[%s1507_s1 + $0x1c0] sm:$0xff]  ;;  %v106_v49 = vld [vmem:[%s1507_s1 + $0x1c8] sm:$0xff]  ;;  %v820_v50 = vpack.c.bf16 %v56_v42, %v55_v41  ;;  %v822_v52 = vpack.c.bf16 %v74_v47, %v73_v46 }
   0xd   :  { %v852_v51 = vpack.c.bf16 %v88_v45, %v87_v44  ;;  %v57_v53 = vld [vmem:[%s1507_s1 + $0x40] sm:$0xff]  ;;  %v58_v54 = vld [vmem:[%s1507_s1 + $0x48] sm:$0xff]  ;;  %v854_v56 = vpack.c.bf16 %v106_v49, %v105_v48  ;;  %v75_v58 = vld [vmem:[%s1507_s1 + $0xd0] sm:$0xff] }
   0xe   :  { %817 = vmatpush3.bf16.msra.mxu0 %v816_v34  ;;  %v89_v55 = vld [vmem:[%s1507_s1 + $0x140] sm:$0xff]  ;;  %v90_v57 = vld [vmem:[%s1507_s1 + $0x148] sm:$0xff]  ;;  %v76_v59 = vld [vmem:[%s1507_s1 + $0xd8] sm:$0xff]  ;;  %v824_v62 = vpack.c.bf16 %v58_v54, %v57_v53 }
   0xf   :  { %849 = vmatpush3.bf16.msra.mxu1 %v848_v38  ;;  %819 = vmatprep.subr.bf16.mxu0 %v818_v39  ;;  %v107_v60 = vld [vmem:[%s1507_s1 + $0x1d0] sm:$0xff]  ;;  %v108_v61 = vld [vmem:[%s1507_s1 + $0x1d8] sm:$0xff]  ;;  %v856_v63 = vpack.c.bf16 %v90_v57, %v89_v55  ;;  %v826_v0 = vpack.c.bf16 %v76_v59, %v75_v58  ;;  %v77_v6 = vld [vmem:[%s1507_s1 + $0xe0] sm:$0xff] }
  0x10   :  { %851 = vmatprep.subr.bf16.mxu1 %v850_v43  ;;  %v59_v1 = vld [vmem:[%s1507_s1 + $0x50] sm:$0xff]  ;;  %v60_v2 = vld [vmem:[%s1507_s1 + $0x58] sm:$0xff]  ;;  %v858_v4 = vpack.c.bf16 %v108_v61, %v107_v60  ;;  %v78_v7 = vld [vmem:[%s1507_s1 + $0xe8] sm:$0xff] }
  0x11   :  { %v91_v3 = vld [vmem:[%s1507_s1 + $0x150] sm:$0xff]  ;;  %v92_v5 = vld [vmem:[%s1507_s1 + $0x158] sm:$0xff]  ;;  %v109_v8 = vld [vmem:[%s1507_s1 + $0x1e0] sm:$0xff]  ;;  %v828_v10 = vpack.c.bf16 %v60_v2, %v59_v1  ;;  %v830_v14 = vpack.c.bf16 %v78_v7, %v77_v6 }
  0x12   :  { %821 = vmatpush3.bf16.msra.mxu0 %v820_v50  ;;  %v110_v9 = vld [vmem:[%s1507_s1 + $0x1e8] sm:$0xff]  ;;  %v61_v11 = vld [vmem:[%s1507_s1 + $0x60] sm:$0xff]  ;;  %v860_v13 = vpack.c.bf16 %v92_v5, %v91_v3  ;;  %v20_v17 = vld [vmem:[%s1508_s0 + $0x18] sm:$0xff] }
  0x13   :  { %853 = vmatpush3.bf16.msra.mxu1 %v852_v51  ;;  %823 = vmatprep.subr.bf16.mxu0 %v822_v52  ;;  %v62_v12 = vld [vmem:[%s1507_s1 + $0x68] sm:$0xff]  ;;  %v93_v15 = vld [vmem:[%s1507_s1 + $0x160] sm:$0xff]  ;;  %v862_v18 = vpack.c.bf16 %v110_v9, %v109_v8  ;;  %v79_v20 = vld [vmem:[%s1507_s1 + $0xf0] sm:$0xff] }
  0x14   :  { %855 = vmatprep.subr.bf16.mxu1 %v854_v56  ;;  %v18_v16 = vld [vmem:[%s1508_s0 + $0x8] sm:$0xff]  ;;  %v80_v21 = vld [vmem:[%s1507_s1 + $0xf8] sm:$0xff]  ;;  %v111_v22 = vld [vmem:[%s1507_s1 + $0x1f0] sm:$0xff]  ;;  %326 = vmatprep.mubr.f32.mxu1 %v20_v17  ;;  %v832_v24 = vpack.c.bf16 %v62_v12, %v61_v11 }
  0x15   :  { %v94_v19 = vld [vmem:[%s1507_s1 + $0x168] sm:$0xff]  ;;  %241 = vmatprep.mubr.f32.mxu0 %v18_v16  ;;  %v112_v23 = vld [vmem:[%s1507_s1 + $0x1f8] sm:$0xff]  ;;  %v834_v26 = vpack.c.bf16 %v80_v21, %v79_v20  ;;  %v63_v27 = vld [vmem:[%s1507_s1 + $0x70] sm:$0xff] }
  0x16   :  { %825 = vmatpush3.bf16.msra.mxu0 %v824_v62  ;;  %v864_v25 = vpack.c.bf16 %v94_v19, %v93_v15  ;;  %v64_v28 = vld [vmem:[%s1507_s1 + $0x78] sm:$0xff]  ;;  %v95_v29 = vld [vmem:[%s1507_s1 + $0x170] sm:$0xff]  ;;  %v866_v30 = vpack.c.bf16 %v112_v23, %v111_v22  ;;  %v129_v32 = vld [vmem:[%s1507_s1 + $0x280] sm:$0xff] }
  0x17   :  { %857 = vmatpush3.bf16.msra.mxu1 %v856_v63  ;;  %827 = vmatprep.subr.bf16.mxu0 %v826_v0  ;;  %v96_v31 = vld [vmem:[%s1507_s1 + $0x178] sm:$0xff]  ;;  %v130_v33 = vld [vmem:[%s1507_s1 + $0x288] sm:$0xff]  ;;  %v161_v34 = vld [vmem:[%s1507_s1 + $0x380] sm:$0xff]  ;;  %v836_v36 = vpack.c.bf16 %v64_v28, %v63_v27 }
  0x18   :  { %859 = vmatprep.subr.bf16.mxu1 %v858_v4  ;;  %v162_v35 = vld [vmem:[%s1507_s1 + $0x388] sm:$0xff]  ;;  %v868_v37 = vpack.c.bf16 %v96_v31, %v95_v29  ;;  %v870_v38 = vpack.c.bf16 %v130_v33, %v129_v32  ;;  %v113_v39 = vld [vmem:[%s1507_s1 + $0x200] sm:$0xff]  ;;  %v131_v44 = vld [vmem:[%s1507_s1 + $0x290] sm:$0xff] }
  0x19   :  { %v114_v40 = vld [vmem:[%s1507_s1 + $0x208] sm:$0xff]  ;;  %v145_v41 = vld [vmem:[%s1507_s1 + $0x300] sm:$0xff]  ;;  %v902_v42 = vpack.c.bf16 %v162_v35, %v161_v34  ;;  %v132_v45 = vld [vmem:[%s1507_s1 + $0x298] sm:$0xff] }
  0x1a   :  { %829 = vmatpush3.bf16.msra.mxu0 %v828_v10  ;;  %v146_v43 = vld [vmem:[%s1507_s1 + $0x308] sm:$0xff]  ;;  %v163_v46 = vld [vmem:[%s1507_s1 + $0x390] sm:$0xff]  ;;  %v164_v47 = vld [vmem:[%s1507_s1 + $0x398] sm:$0xff]  ;;  %v872_v50 = vpack.c.bf16 %v114_v40, %v113_v39  ;;  %v874_v52 = vpack.c.bf16 %v132_v45, %v131_v44 }
  0x1b   :  { %861 = vmatpush3.bf16.msra.mxu1 %v860_v13  ;;  %831 = vmatprep.subr.bf16.mxu0 %v830_v14  ;;  %v17_v48 = vld [vmem:[%s1508_s0] sm:$0xff]  ;;  %v19_v49 = vld [vmem:[%s1508_s0 + $0x10] sm:$0xff]  ;;  %v904_v51 = vpack.c.bf16 %v146_v43, %v145_v41  ;;  %v116_v54 = vld [vmem:[%s1507_s1 + $0x218] sm:$0xff]  ;;  %v906_v56 = vpack.c.bf16 %v164_v47, %v163_v46 }
  0x1c   :  { %863 = vmatprep.subr.bf16.mxu1 %v862_v18  ;;  %v115_v53 = vld [vmem:[%s1507_s1 + $0x210] sm:$0xff]  ;;  %v148_v57 = vld [vmem:[%s1507_s1 + $0x318] sm:$0xff]  ;;  %v133_v58 = vld [vmem:[%s1507_s1 + $0x2a0] sm:$0xff] }
  0x1d   :  { %v147_v55 = vld [vmem:[%s1507_s1 + $0x310] sm:$0xff]  ;;  %v134_v59 = vld [vmem:[%s1507_s1 + $0x2a8] sm:$0xff]  ;;  %v165_v60 = vld [vmem:[%s1507_s1 + $0x3a0] sm:$0xff]  ;;  %v876_v63 = vpack.c.bf16 %v116_v54, %v115_v53 }
  0x1e   :  { %833 = vmatpush3.bf16.msra.mxu0 %v832_v24  ;;  %v166_v61 = vld [vmem:[%s1507_s1 + $0x3a8] sm:$0xff]  ;;  %v117_v0 = vld [vmem:[%s1507_s1 + $0x220] sm:$0xff]  ;;  %v28_v1 = vld [vmem:[%s1508_s0 + $0x58] sm:$0xff]  ;;  %v908_v3 = vpack.c.bf16 %v148_v57, %v147_v55  ;;  %v878_v4 = vpack.c.bf16 %v134_v59, %v133_v58 }
  0x1f   :  { %865 = vmatpush3.bf16.msra.mxu1 %v864_v25  ;;  %835 = vmatprep.subr.bf16.mxu0 %v834_v26  ;;  %v26_v62 = vld [vmem:[%s1508_s0 + $0x48] sm:$0xff]  ;;  %v25_v2 = vld [vmem:[%s1508_s0 + $0x40] sm:$0xff]  ;;  %v27_v7 = vld [vmem:[%s1508_s0 + $0x50] sm:$0xff]  ;;  %v910_v8 = vpack.c.bf16 %v166_v61, %v165_v60 }
  0x20   :  { %867 = vmatprep.subr.bf16.mxu1 %v866_v30  ;;  %v118_v5 = vld [vmem:[%s1507_s1 + $0x228] sm:$0xff]  ;;  %v149_v6 = vld [vmem:[%s1507_s1 + $0x320] sm:$0xff]  ;;  %v135_v10 = vld [vmem:[%s1507_s1 + $0x2b0] sm:$0xff] }
  0x21   :  { %v150_v9 = vld [vmem:[%s1507_s1 + $0x328] sm:$0xff]  ;;  %v136_v11 = vld [vmem:[%s1507_s1 + $0x2b8] sm:$0xff]  ;;  %v167_v12 = vld [vmem:[%s1507_s1 + $0x3b0] sm:$0xff]  ;;  %v880_v15 = vpack.c.bf16 %v118_v5, %v117_v0 }
  0x22   :  { %837 = vmatpush3.bf16.msra.mxu0 %v836_v36  ;;  %v168_v13 = vld [vmem:[%s1507_s1 + $0x3b8] sm:$0xff]  ;;  %v34_v14 = vld [vmem:[%s1508_s0 + $0x88] sm:$0xff]  ;;  %v119_v16 = vld [vmem:[%s1507_s1 + $0x230] sm:$0xff]  ;;  %v912_v19 = vpack.c.bf16 %v150_v9, %v149_v6  ;;  %v882_v20 = vpack.c.bf16 %v136_v11, %v135_v10 }
  0x23   :  { %869 = vmatpush3.bf16.msra.mxu1 %v868_v37  ;;  %871 = vmatprep.subr.bf16.mxu0 %v870_v38  ;;  %v36_v17 = vld [vmem:[%s1508_s0 + $0x98] sm:$0xff]  ;;  %v33_v18 = vld [vmem:[%s1508_s0 + $0x80] sm:$0xff]  ;;  %v151_v22 = vld [vmem:[%s1507_s1 + $0x330] sm:$0xff]  ;;  %v914_v24 = vpack.c.bf16 %v168_v13, %v167_v12 }
  0x24   :  { %903 = vmatprep.subr.bf16.mxu1 %v902_v42  ;;  %v120_v21 = vld [vmem:[%s1507_s1 + $0x238] sm:$0xff]  ;;  %v35_v23 = vld [vmem:[%s1508_s0 + $0x90] sm:$0xff]  ;;  %v137_v26 = vld [vmem:[%s1507_s1 + $0x2c0] sm:$0xff] }
  0x25   :  { %242 = vmatmul.mubr.f32.vlgmr.msra.gmra.mrb[0].mxu0 %v17_v48  ;;  %v152_v25 = vld [vmem:[%s1507_s1 + $0x338] sm:$0xff]  ;;  %v138_v27 = vld [vmem:[%s1507_s1 + $0x2c8] sm:$0xff]  ;;  %v169_v28 = vld [vmem:[%s1507_s1 + $0x3c0] sm:$0xff]  ;;  %v884_v31 = vpack.c.bf16 %v120_v21, %v119_v16 }
  0x26   :  { %327 = vmatmul.mubr.f32.vlgmr.msra.gmra.mrb[0].mxu1 %v19_v49  ;;  %873 = vmatpush3.bf16.msra.mxu0 %v872_v50  ;;  %v170_v29 = vld [vmem:[%s1507_s1 + $0x3c8] sm:$0xff]  ;;  %v121_v32 = vld [vmem:[%s1507_s1 + $0x240] sm:$0xff]  ;;  %v44_v33 = vld [vmem:[%s1508_s0 + $0xd8] sm:$0xff]  ;;  %v916_v35 = vpack.c.bf16 %v152_v25, %v151_v22  ;;  %v886_v36 = vpack.c.bf16 %v138_v27, %v137_v26 }
  0x27   :  { %905 = vmatpush3.bf16.msra.mxu1 %v904_v51  ;;  %875 = vmatprep.subr.bf16.mxu0 %v874_v52  ;;  %v42_v30 = vld [vmem:[%s1508_s0 + $0xc8] sm:$0xff]  ;;  %v41_v34 = vld [vmem:[%s1508_s0 + $0xc0] sm:$0xff]  ;;  %v43_v39 = vld [vmem:[%s1508_s0 + $0xd0] sm:$0xff]  ;;  %v918_v40 = vpack.c.bf16 %v170_v29, %v169_v28 }
  0x28   :  { %907 = vmatprep.subr.bf16.mxu1 %v906_v56  ;;  %246 = vmatprep.mubr.f32.mxu0 %v26_v62  ;;  %v122_v37 = vld [vmem:[%s1507_s1 + $0x248] sm:$0xff]  ;;  %v153_v38 = vld [vmem:[%s1507_s1 + $0x340] sm:$0xff]  ;;  %v139_v42 = vld [vmem:[%s1507_s1 + $0x2d0] sm:$0xff] }
  0x29   :  { %331 = vmatprep.mubr.f32.mxu1 %v28_v1  ;;  %247 = vmatmul.mubr.f32.gmra.mrb[2].mxu0 %v25_v2  ;;  %v154_v41 = vld [vmem:[%s1507_s1 + $0x348] sm:$0xff]  ;;  %v140_v43 = vld [vmem:[%s1507_s1 + $0x2d8] sm:$0xff]  ;;  %v171_v44 = vld [vmem:[%s1507_s1 + $0x3d0] sm:$0xff]  ;;  %v888_v46 = vpack.c.bf16 %v122_v37, %v121_v32 }
  0x2a   :  { %877 = vmatpush3.bf16.msra.mxu0 %v876_v63  ;;  %332 = vmatmul.mubr.f32.gmra.mrb[2].mxu1 %v27_v7  ;;  %v172_v45 = vld [vmem:[%s1507_s1 + $0x3d8] sm:$0xff]  ;;  %v22_v47 = vld [vmem:[%s1508_s0 + $0x28] sm:$0xff]  ;;  %v920_v49 = vpack.c.bf16 %v154_v41, %v153_v38  ;;  %v890_v50 = vpack.c.bf16 %v140_v43, %v139_v42  ;;  %v123_v51 = vld [vmem:[%s1507_s1 + $0x250] sm:$0xff] }
  0x2b   :  { %909 = vmatpush3.bf16.msra.mxu1 %v908_v3  ;;  %879 = vmatprep.subr.bf16.mxu0 %v878_v4  ;;  %v24_v48 = vld [vmem:[%s1508_s0 + $0x38] sm:$0xff]  ;;  %v155_v53 = vld [vmem:[%s1507_s1 + $0x350] sm:$0xff]  ;;  %v922_v54 = vpack.c.bf16 %v172_v45, %v171_v44  ;;  %v141_v56 = vld [vmem:[%s1507_s1 + $0x2e0] sm:$0xff] }
  0x2c   :  { %911 = vmatprep.subr.bf16.mxu1 %v910_v8  ;;  %251 = vmatprep.mubr.f32.mxu0 %v34_v14  ;;  %v124_v52 = vld [vmem:[%s1507_s1 + $0x258] sm:$0xff]  ;;  %v142_v57 = vld [vmem:[%s1507_s1 + $0x2e8] sm:$0xff]  ;;  %v173_v58 = vld [vmem:[%s1507_s1 + $0x3e0] sm:$0xff] }
  0x2d   :  { %336 = vmatprep.mubr.f32.mxu1 %v36_v17  ;;  %252 = vmatmul.mubr.f32.gmra.mrb[4].mxu0 %v33_v18  ;;  %v156_v55 = vld [vmem:[%s1507_s1 + $0x358] sm:$0xff]  ;;  %v174_v59 = vld [vmem:[%s1507_s1 + $0x3e8] sm:$0xff]  ;;  %v892_v60 = vpack.c.bf16 %v124_v52, %v123_v51  ;;  %v894_v62 = vpack.c.bf16 %v142_v57, %v141_v56  ;;  %v125_v63 = vld [vmem:[%s1507_s1 + $0x260] sm:$0xff] }
  0x2e   :  { %881 = vmatpush3.bf16.msra.mxu0 %v880_v15  ;;  %337 = vmatmul.mubr.f32.gmra.mrb[4].mxu1 %v35_v23  ;;  %v924_v61 = vpack.c.bf16 %v156_v55, %v155_v53  ;;  %v126_v0 = vld [vmem:[%s1507_s1 + $0x268] sm:$0xff]  ;;  %v157_v1 = vld [vmem:[%s1507_s1 + $0x360] sm:$0xff]  ;;  %v926_v2 = vpack.c.bf16 %v174_v59, %v173_v58  ;;  %v143_v4 = vld [vmem:[%s1507_s1 + $0x2f0] sm:$0xff] }
  0x2f   :  { %913 = vmatpush3.bf16.msra.mxu1 %v912_v19  ;;  %883 = vmatprep.subr.bf16.mxu0 %v882_v20  ;;  %v158_v3 = vld [vmem:[%s1507_s1 + $0x368] sm:$0xff]  ;;  %v144_v5 = vld [vmem:[%s1507_s1 + $0x2f8] sm:$0xff]  ;;  %v175_v6 = vld [vmem:[%s1507_s1 + $0x3f0] sm:$0xff]  ;;  %v896_v8 = vpack.c.bf16 %v126_v0, %v125_v63 }
  0x30   :  { %915 = vmatprep.subr.bf16.mxu1 %v914_v24  ;;  %256 = vmatprep.mubr.f32.mxu0 %v42_v30  ;;  %v176_v7 = vld [vmem:[%s1507_s1 + $0x3f8] sm:$0xff]  ;;  %v928_v9 = vpack.c.bf16 %v158_v3, %v157_v1  ;;  %v898_v10 = vpack.c.bf16 %v144_v5, %v143_v4  ;;  %v127_v11 = vld [vmem:[%s1507_s1 + $0x270] sm:$0xff]  ;;  %v21_v18 = vld [vmem:[%s1508_s0 + $0x20] sm:$0xff] }
  0x31   :  { %341 = vmatprep.mubr.f32.mxu1 %v44_v33  ;;  %257 = vmatmul.mubr.f32.gmra.mrb[6].mxu0 %v41_v34  ;;  %v128_v12 = vld [vmem:[%s1507_s1 + $0x278] sm:$0xff]  ;;  %v930_v13 = vpack.c.bf16 %v176_v7, %v175_v6  ;;  %v159_v14 = vld [vmem:[%s1507_s1 + $0x370] sm:$0xff]  ;;  %v30_v20 = vld [vmem:[%s1508_s0 + $0x68] sm:$0xff] }
  0x32   :  { %885 = vmatpush3.bf16.msra.mxu0 %v884_v31  ;;  %342 = vmatmul.mubr.f32.gmra.mrb[6].mxu1 %v43_v39  ;;  %v160_v15 = vld [vmem:[%s1507_s1 + $0x378] sm:$0xff]  ;;  %v900_v16 = vpack.c.bf16 %v128_v12, %v127_v11  ;;  %v23_v19 = vld [vmem:[%s1508_s0 + $0x30] sm:$0xff]  ;;  %v29_v22 = vld [vmem:[%s1508_s0 + $0x60] sm:$0xff] }
  0x33   :  { %917 = vmatpush3.bf16.msra.mxu1 %v916_v35  ;;  %887 = vmatprep.subr.bf16.mxu0 %v886_v36  ;;  %v932_v17 = vpack.c.bf16 %v160_v15, %v159_v14  ;;  %v32_v21 = vld [vmem:[%s1508_s0 + $0x78] sm:$0xff]  ;;  %v31_v23 = vld [vmem:[%s1508_s0 + $0x70] sm:$0xff]  ;;  %v38_v24 = vld [vmem:[%s1508_s0 + $0xa8] sm:$0xff] }
  0x34   :  { %919 = vmatprep.subr.bf16.mxu1 %v918_v40  ;;  %411 = vmatprep.mubr.f32.mxu0 %v22_v47  ;;  %v40_v25 = vld [vmem:[%s1508_s0 + $0xb8] sm:$0xff]  ;;  %v37_v26 = vld [vmem:[%s1508_s0 + $0xa0] sm:$0xff]  ;;  %v39_v27 = vld [vmem:[%s1508_s0 + $0xb0] sm:$0xff] }
  0x35   :  { %496 = vmatprep.mubr.f32.mxu1 %v24_v48  ;;  %v46_v28 = vld [vmem:[%s1508_s0 + $0xe8] sm:$0xff]  ;;  %v48_v29 = vld [vmem:[%s1508_s0 + $0xf8] sm:$0xff]  ;;  %v45_v30 = vld [vmem:[%s1508_s0 + $0xe0] sm:$0xff] }
  0x36   :  { %889 = vmatpush3.bf16.msra.mxu0 %v888_v46  ;;  %v47_v31 = vld [vmem:[%s1508_s0 + $0xf0] sm:$0xff] }
  0x37   :  { %921 = vmatpush3.bf16.msra.mxu1 %v920_v49  ;;  %891 = vmatprep.subr.bf16.mxu0 %v890_v50 }
  0x38   :  { %923 = vmatprep.subr.bf16.mxu1 %v922_v54 }
  0x3a   :  { %893 = vmatpush3.bf16.msra.mxu0 %v892_v60 }
  0x3b   :  { %925 = vmatpush3.bf16.msra.mxu1 %v924_v61  ;;  %895 = vmatprep.subr.bf16.mxu0 %v894_v62 }
  0x3c   :  { %927 = vmatprep.subr.bf16.mxu1 %v926_v2 }
  0x3e   :  { %897 = vmatpush3.bf16.msra.mxu0 %v896_v8 }
  0x3f   :  { %929 = vmatpush3.bf16.msra.mxu1 %v928_v9  ;;  %899 = vmatprep.subr.bf16.mxu0 %v898_v10 }
  0x40   :  { %931 = vmatprep.subr.bf16.mxu1 %v930_v13 }
  0x42   :  { %901 = vmatpush3.bf16.msra.mxu0 %v900_v16 }
  0x43   :  { %933 = vmatpush3.bf16.msra.mxu1 %v932_v17 }
  0x45   :  { %412 = vmatmul.mubr.f32.vlgmr.msra.gmra.mrb[8].mxu0 %v21_v18 }
  0x46   :  { %497 = vmatmul.mubr.f32.vlgmr.msra.gmra.mrb[8].mxu1 %v23_v19  ;;  %416 = vmatprep.mubr.f32.mxu0 %v30_v20 }
  0x47   :  { %501 = vmatprep.mubr.f32.mxu1 %v32_v21 }
  0x49   :  { %417 = vmatmul.mubr.f32.gmra.mrb[10].mxu0 %v29_v22 }
  0x4a   :  { %502 = vmatmul.mubr.f32.gmra.mrb[10].mxu1 %v31_v23  ;;  %421 = vmatprep.mubr.f32.mxu0 %v38_v24 }
  0x4b   :  { %506 = vmatprep.mubr.f32.mxu1 %v40_v25 }
  0x4d   :  { %422 = vmatmul.mubr.f32.gmra.mrb[12].mxu0 %v37_v26 }
  0x4e   :  { %507 = vmatmul.mubr.f32.gmra.mrb[12].mxu1 %v39_v27  ;;  %426 = vmatprep.mubr.f32.mxu0 %v46_v28 }
  0x4f   :  { %511 = vmatprep.mubr.f32.mxu1 %v48_v29 }
  0x51   :  { %427 = vmatmul.mubr.f32.gmra.mrb[14].mxu0 %v45_v30 }
  0x52   :  { %512 = vmatmul.mubr.f32.gmra.mrb[14].mxu1 %v47_v31 }
  0xf8   :  { %v662_v32 = vpop.f32.mrb[0].mxu0 }
  0xf9   :  { %v706_v33 = vpop.f32.mrb[0].mxu1  ;;  %v663_v34 = vpop.f32.mrb[1].mxu0 }
  0xfa   :  { %v664_v35 = vadd.f32 %v663_v34, %v662_v32  ;;  %v707_v36 = vpop.f32.mrb[1].mxu1 }
  0xfb   :  { %v708_v37 = vadd.f32 %v707_v36, %v706_v33 }
  0xfc   :  { %v665_v38 = vpop.f32.mrb[2].mxu0 }
  0xfd   :  { %v329_v39 = vadd.f32 %v708_v37, %v664_v35  ;;  %v709_v40 = vpop.f32.mrb[2].mxu1  ;;  %v666_v41 = vpop.f32.mrb[3].mxu0 }
  0xfe   :  { %v667_v42 = vadd.f32 %v666_v41, %v665_v38  ;;  %v710_v43 = vpop.f32.mrb[3].mxu1 }
  0xff   :  { %v711_v44 = vadd.f32 %v710_v43, %v709_v40 }
 0x100   :  { %v668_v45 = vpop.f32.mrb[4].mxu0 }
 0x101   :  { %v334_v46 = vadd.f32 %v711_v44, %v667_v42  ;;  %v712_v47 = vpop.f32.mrb[4].mxu1  ;;  %v669_v48 = vpop.f32.mrb[5].mxu0  ;;  %v945_v44 = vmov 0  }
 0x102   :  { %v670_v49 = vadd.f32 %v669_v48, %v668_v45  ;;  %v713_v50 = vpop.f32.mrb[5].mxu1  ;;  %936 = vset.pattern.permute.xlu1 %v945_v44  ;;  %935 = vset.pattern.permute.xlu0 %v945_v44  ;;  %v590_v45 = vld [vmem:[%s1509_s3] sm:$0xff] }
 0x103   :  { %v714_v51 = vadd.f32 %v713_v50, %v712_v47  ;;  %v592_v47 = vld [vmem:[%s1509_s3 + $0x10] sm:$0xff] }
 0x104   :  { %v671_v52 = vpop.f32.mrb[6].mxu0 }
 0x105   :  { %v339_v53 = vadd.f32 %v714_v51, %v670_v49  ;;  %v715_v54 = vpop.f32.mrb[6].mxu1  ;;  %v672_v55 = vpop.f32.mrb[7].mxu0 }
 0x106   :  { %v673_v56 = vadd.f32 %v672_v55, %v671_v52  ;;  %v716_v57 = vpop.f32.mrb[7].mxu1 }
 0x107   :  { %v717_v58 = vadd.f32 %v716_v57, %v715_v54 }
 0x109   :  { %v344_v59 = vadd.f32 %v717_v58, %v673_v56 }
 0x118   :  { %v750_v60 = vpop.f32.mrb[8].mxu0 }
 0x119   :  { %v751_v61 = vpop.f32.mrb[9].mxu0  ;;  %v794_v62 = vpop.f32.mrb[8].mxu1 }
 0x11a   :  { %v752_v63 = vadd.f32 %v751_v61, %v750_v60  ;;  %v795_v0 = vpop.f32.mrb[9].mxu1 }
 0x11b   :  { %v796_v1 = vadd.f32 %v795_v0, %v794_v62 }
 0x11c   :  { %v414_v2 = vadd.f32 %v752_v63, %v329_v39  ;;  %v753_v3 = vpop.f32.mrb[10].mxu0  ;;  %v551_v63 = vld [vmem:[%s1510_s2 + $0x8] sm:$0xff] }
 0x11d   :  { %v754_v4 = vpop.f32.mrb[11].mxu0  ;;  %v797_v5 = vpop.f32.mrb[10].mxu1 }
 0x11e   :  { %v755_v6 = vadd.f32 %v754_v4, %v753_v3  ;;  %v798_v7 = vpop.f32.mrb[11].mxu1  ;;  %v499_v8 = vadd.f32 %v796_v1, %v414_v2  ;;  %v552_v2 = vld [vmem:[%s1510_s2 + $0x10] sm:$0xff] }
 0x11f   :  { %v799_v9 = vadd.f32 %v798_v7, %v797_v5  ;;  %v553_v5 = vld [vmem:[%s1510_s2 + $0x18] sm:$0xff] }
 0x120   :  { %v419_v10 = vadd.f32 %v755_v6, %v334_v46  ;;  %v756_v11 = vpop.f32.mrb[12].mxu0  ;;  %517 = vadd.xlane.f32.xlu0 %v499_v8  ;;  %v591_v46 = vld [vmem:[%s1509_s3 + $0x8] sm:$0xff] }
 0x121   :  { %v757_v12 = vpop.f32.mrb[13].mxu0  ;;  %v800_v13 = vpop.f32.mrb[12].mxu1 }
 0x122   :  { %v758_v14 = vadd.f32 %v757_v12, %v756_v11  ;;  %v801_v15 = vpop.f32.mrb[13].mxu1  ;;  %v504_v16 = vadd.f32 %v799_v9, %v419_v10 }
 0x123   :  { %v802_v17 = vadd.f32 %v801_v15, %v800_v13 }
 0x124   :  { %v424_v18 = vadd.f32 %v758_v14, %v339_v53  ;;  %v759_v19 = vpop.f32.mrb[14].mxu0  ;;  %519 = vadd.xlane.f32.xlu0 %v504_v16 }
 0x125   :  { %v760_v20 = vpop.f32.mrb[15].mxu0  ;;  %v803_v21 = vpop.f32.mrb[14].mxu1 }
 0x126   :  { %v761_v22 = vadd.f32 %v760_v20, %v759_v19  ;;  %v804_v23 = vpop.f32.mrb[15].mxu1  ;;  %v509_v24 = vadd.f32 %v802_v17, %v424_v18 }
 0x127   :  { %v805_v25 = vadd.f32 %v804_v23, %v803_v21 }
 0x128   :  { %v429_v26 = vadd.f32 %v761_v22, %v344_v59  ;;  %521 = vadd.xlane.f32.xlu1 %v509_v24  ;;  %v550_v59 = vld [vmem:[%s1510_s2] sm:$0xff] }
 0x12a   :  { %v514_v27 = vadd.f32 %v805_v25, %v429_v26 }
 0x12c   :  { %523 = vadd.xlane.f32.xlu1 %v514_v27 }
 0x1ad   :  { %v518_v28 = vpop.xlane.xlu0 %517 }
 0x1ae   :  { %v526_v29 = vmul.f32 0.0078125, %v518_v28 }
 0x1b0   :  { %v1451_v30 = vsub.f32 %v499_v8, %v526_v29  ;;  %v593_v8 = vld [vmem:[%s1509_s3 + $0x18] sm:$0xff] }
 0x1b1   :  { %v520_v31 = vpop.xlane.xlu0 %519 }
 0x1b2   :  { %v527_v32 = vmul.f32 0.0078125, %v520_v31  ;;  %v534_v33 = vmul.f32 %v1451_v30, %v1451_v30 }
 0x1b4   :  { %v1455_v34 = vsub.f32 %v504_v16, %v527_v32  ;;  %538 = vadd.xlane.f32.xlu0 %v534_v33 }
 0x1b5   :  { %v522_v35 = vpop.xlane.xlu1 %521 }
 0x1b6   :  { %v528_v36 = vmul.f32 0.0078125, %v522_v35  ;;  %v535_v37 = vmul.f32 %v1455_v34, %v1455_v34 }
 0x1b8   :  { %v1459_v38 = vsub.f32 %v509_v24, %v528_v36  ;;  %540 = vadd.xlane.f32.xlu1 %v535_v37 }
 0x1b9   :  { %v524_v39 = vpop.xlane.xlu1 %523 }
 0x1ba   :  { %v529_v40 = vmul.f32 0.0078125, %v524_v39  ;;  %v536_v41 = vmul.f32 %v1459_v38, %v1459_v38 }
 0x1bc   :  { %v1463_v42 = vsub.f32 %v514_v27, %v529_v40  ;;  %542 = vadd.xlane.f32.xlu0 %v536_v41 }
 0x1be   :  { %v537_v43 = vmul.f32 %v1463_v42, %v1463_v42 }
 0x1c0   :  { %544 = vadd.xlane.f32.xlu1 %v537_v43 }
 0x1d1   :  { %596 = vperm.xlu1 %936, %v590_v45  }
 0x1d5   :  { %601 = vperm.xlu1 %936, %v591_v46  }
 0x1d9   :  { %606 = vperm.xlu1 %936, %v592_v47  }
 0x241   :  { %v539_v48 = vpop.xlane.xlu0 %538 }
 0x242   :  { %v546_v49 = vmul.f32 0.0078125, %v539_v48 }
 0x244   :  { %v554_v50 = vadd.f32 1e-05, %v546_v49 }
 0x245   :  { %v541_v51 = vpop.xlane.xlu1 %540 }
 0x246   :  { %937 = vrsqrt.f32 %v554_v50  ;;  %v547_v52 = vmul.f32 0.0078125, %v541_v51 }
 0x248   :  { %v555_v53 = vadd.f32 1e-05, %v547_v52 }
 0x249   :  { %v543_v54 = vpop.xlane.xlu0 %542 }
 0x24a   :  { %939 = vrsqrt.f32 %v555_v53  ;;  %v548_v55 = vmul.f32 0.0078125, %v543_v54 }
 0x24c   :  { %v556_v56 = vadd.f32 1e-05, %v548_v55 }
 0x24d   :  { %v545_v57 = vpop.xlane.xlu1 %544 }
 0x24e   :  { %941 = vrsqrt.f32 %v556_v56  ;;  %v549_v58 = vmul.f32 0.0078125, %v545_v57 }
 0x250   :  { %v938_v60 = vpop.eup %937  ;;  %v557_v61 = vadd.f32 1e-05, %v549_v58 }
 0x251   :  { %v562_v62 = vmul.f32 %v938_v60, %v550_v59  ;;  %v597_v9 = vpop.permute.xlu1 %596 }
 0x252   :  { %943 = vrsqrt.f32 %v557_v61 }
 0x253   :  { %568 = vperm.xlu0 %935, %v562_v62  }
 0x254   :  { %v940_v0 = vpop.eup %939 }
 0x255   :  { %v563_v1 = vmul.f32 %v940_v0, %v551_v63  ;;  %v602_v10 = vpop.permute.xlu1 %601 }
 0x257   :  { %573 = vperm.xlu1 %936, %v563_v1  }
 0x258   :  { %v942_v3 = vpop.eup %941 }
 0x259   :  { %v564_v4 = vmul.f32 %v942_v3, %v552_v2  ;;  %v607_v11 = vpop.permute.xlu1 %606 }
 0x25b   :  { %578 = vperm.xlu1 %936, %v564_v4  }
 0x25c   :  { %v944_v6 = vpop.eup %943 }
 0x25d   :  { %v565_v7 = vmul.f32 %v944_v6, %v553_v5 }
 0x25f   :  { %583 = vperm.xlu1 %936, %v565_v7  }
 0x263   :  { %611 = vperm.xlu1 %936, %v593_v8  }
 0x2d2   :  { %v569_v12 = vpop.permute.xlu0 %568 }
 0x2d3   :  { %v586_v13 = vmul.f32 %v569_v12, %v1451_v30 }
 0x2d5   :  { %v614_v14 = vadd.f32 %v597_v9, %v586_v13 }
 0x2d6   :  { %v574_v15 = vpop.permute.xlu1 %573 }
 0x2d7   :  { %v618_v16 = vmax.f32 %v614_v14, 0.0  ;;  %v587_v17 = vmul.f32 %v574_v15, %v1455_v34 }
 0x2d9   :  { %622 = vst [vmem:[%s1511_s4] sm:$0xff] %v618_v16  ;;  %v615_v18 = vadd.f32 %v602_v10, %v587_v17 }
 0x2da   :  { %v579_v19 = vpop.permute.xlu1 %578 }
 0x2db   :  { %v619_v20 = vmax.f32 %v615_v18, 0.0  ;;  %v588_v21 = vmul.f32 %v579_v19, %v1459_v38 }
 0x2dd   :  { %623 = vst [vmem:[%s1511_s4 + $0x8] sm:$0xff] %v619_v20  ;;  %v616_v22 = vadd.f32 %v607_v11, %v588_v21 }
 0x2de   :  { %v584_v23 = vpop.permute.xlu1 %583 }
 0x2df   :  { %v620_v24 = vmax.f32 %v616_v22, 0.0  ;;  %v589_v25 = vmul.f32 %v584_v23, %v1463_v42 }
 0x2e1   :  { %624 = vst [vmem:[%s1511_s4 + $0x10] sm:$0xff] %v620_v24 }
 0x2e2   :  { %v612_v26 = vpop.permute.xlu1 %611 }
 0x2e3   :  { %v617_v27 = vadd.f32 %v612_v26, %v589_v25 }
 0x2e5   :  { %v621_v28 = vmax.f32 %v617_v27, 0.0 }
 0x2e7   :  { %625 = vst [vmem:[%s1511_s4 + $0x18] sm:$0xff] %v621_v28 }

// kernel: generator_forward.7
= control target key start
LH: loop header
LB: loop body
LE: loop exit
PB: predicated region body
PF: predicated region fallthrough
CT: control target
= control target key end

     0   :  { %s1821_s1 = inlined_call_operand.vmem [shape: f32[512,512], index: 1, kind: input, shape index: {}]   ;;  %s1822_s0 = inlined_call_operand.vmem [shape: f32[16,512], index: 0, kind: input, shape index: {}]   ;;  %s1823_s3 = inlined_call_operand.vmem [shape: f32[16,1], index: 3, kind: input, shape index: {}]   ;;  %s1824_s2 = inlined_call_operand.vmem [shape: f32[16,1], index: 2, kind: input, shape index: {}]   ;;  %s1825_s4 = inlined_call_operand.vmem [shape: f32[16,512], index: 4, kind: output, shape index: {}]  }
   0x1   :  { %v26_v0 = vld [vmem:[%s1821_s1 + $0x8] sm:$0xff]  ;;  %v28_v2 = vld [vmem:[%s1821_s1 + $0x18] sm:$0xff]  ;;  %v25_v5 = vld [vmem:[%s1821_s1] sm:$0xff] }
   0x2   :  { %v30_v1 = vld [vmem:[%s1821_s1 + $0x28] sm:$0xff]  ;;  %v32_v4 = vld [vmem:[%s1821_s1 + $0x38] sm:$0xff]  ;;  %v29_v6 = vld [vmem:[%s1821_s1 + $0x20] sm:$0xff] }
   0x3   :  { %v696_v3 = vpack.c.bf16 %v30_v1, %v26_v0  ;;  %v824_v7 = vpack.c.bf16 %v32_v4, %v28_v2  ;;  %v698_v8 = vpack.c.bf16 %v29_v6, %v25_v5  ;;  %v27_v9 = vld [vmem:[%s1821_s1 + $0x10] sm:$0xff]  ;;  %v34_v11 = vld [vmem:[%s1821_s1 + $0x48] sm:$0xff]  ;;  %v36_v14 = vld [vmem:[%s1821_s1 + $0x58] sm:$0xff] }
   0x4   :  { %v31_v10 = vld [vmem:[%s1821_s1 + $0x30] sm:$0xff]  ;;  %v38_v13 = vld [vmem:[%s1821_s1 + $0x68] sm:$0xff]  ;;  %v40_v15 = vld [vmem:[%s1821_s1 + $0x78] sm:$0xff] }
   0x5   :  { %697 = vmatprep.subr.bf16.mxu0 %v696_v3  ;;  %v826_v12 = vpack.c.bf16 %v31_v10, %v27_v9  ;;  %825 = vmatprep.subr.bf16.mxu1 %v824_v7  ;;  %v700_v16 = vpack.c.bf16 %v38_v13, %v34_v11  ;;  %v828_v17 = vpack.c.bf16 %v40_v15, %v36_v14  ;;  %v33_v18 = vld [vmem:[%s1821_s1 + $0x40] sm:$0xff]  ;;  %v35_v20 = vld [vmem:[%s1821_s1 + $0x50] sm:$0xff]  ;;  %v42_v23 = vld [vmem:[%s1821_s1 + $0x88] sm:$0xff] }
   0x6   :  { %699 = vmatpush1.bf16.msra.mxu0 %v698_v8  ;;  %v37_v19 = vld [vmem:[%s1821_s1 + $0x60] sm:$0xff]  ;;  %v39_v22 = vld [vmem:[%s1821_s1 + $0x70] sm:$0xff]  ;;  %v46_v24 = vld [vmem:[%s1821_s1 + $0xa8] sm:$0xff] }
   0x7   :  { %827 = vmatpush1.bf16.msra.mxu1 %v826_v12  ;;  %v702_v21 = vpack.c.bf16 %v37_v19, %v33_v18  ;;  %701 = vmatprep.subr.bf16.mxu0 %v700_v16  ;;  %v830_v25 = vpack.c.bf16 %v39_v22, %v35_v20  ;;  %v704_v26 = vpack.c.bf16 %v46_v24, %v42_v23  ;;  %v44_v27 = vld [vmem:[%s1821_s1 + $0x98] sm:$0xff]  ;;  %v41_v29 = vld [vmem:[%s1821_s1 + $0x80] sm:$0xff]  ;;  %v43_v32 = vld [vmem:[%s1821_s1 + $0x90] sm:$0xff] }
   0x8   :  { %829 = vmatprep.subr.bf16.mxu1 %v828_v17  ;;  %v48_v28 = vld [vmem:[%s1821_s1 + $0xb8] sm:$0xff]  ;;  %v45_v31 = vld [vmem:[%s1821_s1 + $0xa0] sm:$0xff]  ;;  %v47_v33 = vld [vmem:[%s1821_s1 + $0xb0] sm:$0xff] }
   0x9   :  { %v832_v30 = vpack.c.bf16 %v48_v28, %v44_v27  ;;  %v706_v34 = vpack.c.bf16 %v45_v31, %v41_v29  ;;  %v50_v35 = vld [vmem:[%s1821_s1 + $0xc8] sm:$0xff]  ;;  %v52_v37 = vld [vmem:[%s1821_s1 + $0xd8] sm:$0xff]  ;;  %v834_v38 = vpack.c.bf16 %v47_v33, %v43_v32  ;;  %v49_v41 = vld [vmem:[%s1821_s1 + $0xc0] sm:$0xff] }
   0xa   :  { %703 = vmatpush1.bf16.msra.mxu0 %v702_v21  ;;  %v54_v36 = vld [vmem:[%s1821_s1 + $0xe8] sm:$0xff]  ;;  %v56_v40 = vld [vmem:[%s1821_s1 + $0xf8] sm:$0xff]  ;;  %v53_v42 = vld [vmem:[%s1821_s1 + $0xe0] sm:$0xff] }
   0xb   :  { %831 = vmatpush1.bf16.msra.mxu1 %v830_v25  ;;  %705 = vmatprep.subr.bf16.mxu0 %v704_v26  ;;  %v708_v39 = vpack.c.bf16 %v54_v36, %v50_v35  ;;  %v836_v43 = vpack.c.bf16 %v56_v40, %v52_v37  ;;  %v51_v44 = vld [vmem:[%s1821_s1 + $0xd0] sm:$0xff]  ;;  %v58_v46 = vld [vmem:[%s1821_s1 + $0x108] sm:$0xff]  ;;  %v60_v48 = vld [vmem:[%s1821_s1 + $0x118] sm:$0xff]  ;;  %v710_v50 = vpack.c.bf16 %v53_v42, %v49_v41 }
   0xc   :  { %833 = vmatprep.subr.bf16.mxu1 %v832_v30  ;;  %v55_v45 = vld [vmem:[%s1821_s1 + $0xf0] sm:$0xff]  ;;  %v62_v47 = vld [vmem:[%s1821_s1 + $0x128] sm:$0xff]  ;;  %v64_v49 = vld [vmem:[%s1821_s1 + $0x138] sm:$0xff] }
   0xd   :  { %v838_v51 = vpack.c.bf16 %v55_v45, %v51_v44  ;;  %v712_v52 = vpack.c.bf16 %v62_v47, %v58_v46  ;;  %v57_v53 = vld [vmem:[%s1821_s1 + $0x100] sm:$0xff]  ;;  %v59_v55 = vld [vmem:[%s1821_s1 + $0x110] sm:$0xff]  ;;  %v840_v56 = vpack.c.bf16 %v64_v49, %v60_v48  ;;  %v66_v58 = vld [vmem:[%s1821_s1 + $0x148] sm:$0xff] }
   0xe   :  { %707 = vmatpush1.bf16.msra.mxu0 %v706_v34  ;;  %v61_v54 = vld [vmem:[%s1821_s1 + $0x120] sm:$0xff]  ;;  %v63_v57 = vld [vmem:[%s1821_s1 + $0x130] sm:$0xff]  ;;  %v70_v59 = vld [vmem:[%s1821_s1 + $0x168] sm:$0xff] }
   0xf   :  { %835 = vmatpush1.bf16.msra.mxu1 %v834_v38  ;;  %709 = vmatprep.subr.bf16.mxu0 %v708_v39  ;;  %v68_v60 = vld [vmem:[%s1821_s1 + $0x158] sm:$0xff]  ;;  %v714_v62 = vpack.c.bf16 %v61_v54, %v57_v53  ;;  %v842_v63 = vpack.c.bf16 %v63_v57, %v59_v55  ;;  %v716_v0 = vpack.c.bf16 %v70_v59, %v66_v58  ;;  %v65_v1 = vld [vmem:[%s1821_s1 + $0x140] sm:$0xff]  ;;  %v67_v3 = vld [vmem:[%s1821_s1 + $0x150] sm:$0xff] }
  0x10   :  { %837 = vmatprep.subr.bf16.mxu1 %v836_v43  ;;  %v72_v61 = vld [vmem:[%s1821_s1 + $0x178] sm:$0xff]  ;;  %v69_v2 = vld [vmem:[%s1821_s1 + $0x160] sm:$0xff]  ;;  %v71_v5 = vld [vmem:[%s1821_s1 + $0x170] sm:$0xff] }
  0x11   :  { %v844_v4 = vpack.c.bf16 %v72_v61, %v68_v60  ;;  %v74_v6 = vld [vmem:[%s1821_s1 + $0x188] sm:$0xff]  ;;  %v76_v8 = vld [vmem:[%s1821_s1 + $0x198] sm:$0xff]  ;;  %v718_v10 = vpack.c.bf16 %v69_v2, %v65_v1  ;;  %v846_v11 = vpack.c.bf16 %v71_v5, %v67_v3  ;;  %v73_v13 = vld [vmem:[%s1821_s1 + $0x180] sm:$0xff] }
  0x12   :  { %711 = vmatpush1.bf16.msra.mxu0 %v710_v50  ;;  %v78_v7 = vld [vmem:[%s1821_s1 + $0x1a8] sm:$0xff]  ;;  %v80_v9 = vld [vmem:[%s1821_s1 + $0x1b8] sm:$0xff]  ;;  %v77_v14 = vld [vmem:[%s1821_s1 + $0x1a0] sm:$0xff] }
  0x13   :  { %839 = vmatpush1.bf16.msra.mxu1 %v838_v51  ;;  %713 = vmatprep.subr.bf16.mxu0 %v712_v52  ;;  %v720_v12 = vpack.c.bf16 %v78_v7, %v74_v6  ;;  %v75_v15 = vld [vmem:[%s1821_s1 + $0x190] sm:$0xff]  ;;  %v848_v16 = vpack.c.bf16 %v80_v9, %v76_v8  ;;  %v82_v18 = vld [vmem:[%s1821_s1 + $0x1c8] sm:$0xff]  ;;  %v84_v20 = vld [vmem:[%s1821_s1 + $0x1d8] sm:$0xff]  ;;  %v722_v22 = vpack.c.bf16 %v77_v14, %v73_v13 }
  0x14   :  { %841 = vmatprep.subr.bf16.mxu1 %v840_v56  ;;  %v79_v17 = vld [vmem:[%s1821_s1 + $0x1b0] sm:$0xff]  ;;  %v86_v19 = vld [vmem:[%s1821_s1 + $0x1e8] sm:$0xff]  ;;  %v88_v21 = vld [vmem:[%s1821_s1 + $0x1f8] sm:$0xff] }
  0x15   :  { %v850_v23 = vpack.c.bf16 %v79_v17, %v75_v15  ;;  %v724_v24 = vpack.c.bf16 %v86_v19, %v82_v18  ;;  %v81_v25 = vld [vmem:[%s1821_s1 + $0x1c0] sm:$0xff]  ;;  %v83_v27 = vld [vmem:[%s1821_s1 + $0x1d0] sm:$0xff]  ;;  %v852_v28 = vpack.c.bf16 %v88_v21, %v84_v20  ;;  %v90_v30 = vld [vmem:[%s1821_s1 + $0x208] sm:$0xff] }
  0x16   :  { %715 = vmatpush1.bf16.msra.mxu0 %v714_v62  ;;  %v85_v26 = vld [vmem:[%s1821_s1 + $0x1e0] sm:$0xff]  ;;  %v87_v29 = vld [vmem:[%s1821_s1 + $0x1f0] sm:$0xff]  ;;  %v94_v31 = vld [vmem:[%s1821_s1 + $0x228] sm:$0xff] }
  0x17   :  { %843 = vmatpush1.bf16.msra.mxu1 %v842_v63  ;;  %717 = vmatprep.subr.bf16.mxu0 %v716_v0  ;;  %v92_v32 = vld [vmem:[%s1821_s1 + $0x218] sm:$0xff]  ;;  %v726_v34 = vpack.c.bf16 %v85_v26, %v81_v25  ;;  %v854_v35 = vpack.c.bf16 %v87_v29, %v83_v27  ;;  %v728_v36 = vpack.c.bf16 %v94_v31, %v90_v30  ;;  %v89_v37 = vld [vmem:[%s1821_s1 + $0x200] sm:$0xff]  ;;  %v91_v39 = vld [vmem:[%s1821_s1 + $0x210] sm:$0xff] }
  0x18   :  { %845 = vmatprep.subr.bf16.mxu1 %v844_v4  ;;  %v96_v33 = vld [vmem:[%s1821_s1 + $0x238] sm:$0xff]  ;;  %v93_v38 = vld [vmem:[%s1821_s1 + $0x220] sm:$0xff]  ;;  %v95_v41 = vld [vmem:[%s1821_s1 + $0x230] sm:$0xff] }
  0x19   :  { %v856_v40 = vpack.c.bf16 %v96_v33, %v92_v32  ;;  %v98_v42 = vld [vmem:[%s1821_s1 + $0x248] sm:$0xff]  ;;  %v100_v44 = vld [vmem:[%s1821_s1 + $0x258] sm:$0xff]  ;;  %v730_v46 = vpack.c.bf16 %v93_v38, %v89_v37  ;;  %v858_v47 = vpack.c.bf16 %v95_v41, %v91_v39  ;;  %v97_v49 = vld [vmem:[%s1821_s1 + $0x240] sm:$0xff] }
  0x1a   :  { %719 = vmatpush1.bf16.msra.mxu0 %v718_v10  ;;  %v102_v43 = vld [vmem:[%s1821_s1 + $0x268] sm:$0xff]  ;;  %v104_v45 = vld [vmem:[%s1821_s1 + $0x278] sm:$0xff]  ;;  %v101_v50 = vld [vmem:[%s1821_s1 + $0x260] sm:$0xff] }
  0x1b   :  { %847 = vmatpush1.bf16.msra.mxu1 %v846_v11  ;;  %721 = vmatprep.subr.bf16.mxu0 %v720_v12  ;;  %v732_v48 = vpack.c.bf16 %v102_v43, %v98_v42  ;;  %v99_v51 = vld [vmem:[%s1821_s1 + $0x250] sm:$0xff]  ;;  %v860_v52 = vpack.c.bf16 %v104_v45, %v100_v44  ;;  %v106_v54 = vld [vmem:[%s1821_s1 + $0x288] sm:$0xff]  ;;  %v108_v56 = vld [vmem:[%s1821_s1 + $0x298] sm:$0xff]  ;;  %v734_v58 = vpack.c.bf16 %v101_v50, %v97_v49 }
  0x1c   :  { %849 = vmatprep.subr.bf16.mxu1 %v848_v16  ;;  %v103_v53 = vld [vmem:[%s1821_s1 + $0x270] sm:$0xff]  ;;  %v110_v55 = vld [vmem:[%s1821_s1 + $0x2a8] sm:$0xff]  ;;  %v112_v57 = vld [vmem:[%s1821_s1 + $0x2b8] sm:$0xff] }
  0x1d   :  { %v862_v59 = vpack.c.bf16 %v103_v53, %v99_v51  ;;  %v736_v60 = vpack.c.bf16 %v110_v55, %v106_v54  ;;  %v105_v61 = vld [vmem:[%s1821_s1 + $0x280] sm:$0xff]  ;;  %v107_v63 = vld [vmem:[%s1821_s1 + $0x290] sm:$0xff]  ;;  %v864_v0 = vpack.c.bf16 %v112_v57, %v108_v56  ;;  %v114_v2 = vld [vmem:[%s1821_s1 + $0x2c8] sm:$0xff] }
  0x1e   :  { %723 = vmatpush1.bf16.msra.mxu0 %v722_v22  ;;  %v109_v62 = vld [vmem:[%s1821_s1 + $0x2a0] sm:$0xff]  ;;  %v111_v1 = vld [vmem:[%s1821_s1 + $0x2b0] sm:$0xff]  ;;  %v118_v3 = vld [vmem:[%s1821_s1 + $0x2e8] sm:$0xff] }
  0x1f   :  { %851 = vmatpush1.bf16.msra.mxu1 %v850_v23  ;;  %725 = vmatprep.subr.bf16.mxu0 %v724_v24  ;;  %v116_v4 = vld [vmem:[%s1821_s1 + $0x2d8] sm:$0xff]  ;;  %v738_v6 = vpack.c.bf16 %v109_v62, %v105_v61  ;;  %v113_v7 = vld [vmem:[%s1821_s1 + $0x2c0] sm:$0xff]  ;;  %v866_v8 = vpack.c.bf16 %v111_v1, %v107_v63  ;;  %v740_v9 = vpack.c.bf16 %v118_v3, %v114_v2  ;;  %v115_v11 = vld [vmem:[%s1821_s1 + $0x2d0] sm:$0xff] }
  0x20   :  { %853 = vmatprep.subr.bf16.mxu1 %v852_v28  ;;  %v120_v5 = vld [vmem:[%s1821_s1 + $0x2f8] sm:$0xff]  ;;  %v117_v10 = vld [vmem:[%s1821_s1 + $0x2e0] sm:$0xff]  ;;  %v119_v12 = vld [vmem:[%s1821_s1 + $0x2f0] sm:$0xff] }
  0x21   :  { %v868_v13 = vpack.c.bf16 %v120_v5, %v116_v4  ;;  %v122_v14 = vld [vmem:[%s1821_s1 + $0x308] sm:$0xff]  ;;  %v124_v17 = vld [vmem:[%s1821_s1 + $0x318] sm:$0xff]  ;;  %v742_v19 = vpack.c.bf16 %v117_v10, %v113_v7  ;;  %v870_v20 = vpack.c.bf16 %v119_v12, %v115_v11  ;;  %v121_v22 = vld [vmem:[%s1821_s1 + $0x300] sm:$0xff] }
  0x22   :  { %727 = vmatpush1.bf16.msra.mxu0 %v726_v34  ;;  %v126_v15 = vld [vmem:[%s1821_s1 + $0x328] sm:$0xff]  ;;  %v128_v18 = vld [vmem:[%s1821_s1 + $0x338] sm:$0xff]  ;;  %v125_v23 = vld [vmem:[%s1821_s1 + $0x320] sm:$0xff] }
  0x23   :  { %855 = vmatpush1.bf16.msra.mxu1 %v854_v35  ;;  %729 = vmatprep.subr.bf16.mxu0 %v728_v36  ;;  %v18_v16 = vld [vmem:[%s1822_s0 + $0x8] sm:$0xff]  ;;  %v744_v21 = vpack.c.bf16 %v126_v15, %v122_v14  ;;  %v123_v24 = vld [vmem:[%s1821_s1 + $0x310] sm:$0xff]  ;;  %v872_v25 = vpack.c.bf16 %v128_v18, %v124_v17  ;;  %v132_v29 = vld [vmem:[%s1821_s1 + $0x358] sm:$0xff]  ;;  %v746_v31 = vpack.c.bf16 %v125_v23, %v121_v22 }
  0x24   :  { %857 = vmatprep.subr.bf16.mxu1 %v856_v40  ;;  %345 = vmatprep.mubr.f32.mxu0 %v18_v16  ;;  %v127_v26 = vld [vmem:[%s1821_s1 + $0x330] sm:$0xff]  ;;  %v130_v27 = vld [vmem:[%s1821_s1 + $0x348] sm:$0xff]  ;;  %v136_v30 = vld [vmem:[%s1821_s1 + $0x378] sm:$0xff] }
  0x25   :  { %499 = vmatprep.mubr.f32.mxu1 %v18_v16  ;;  %v134_v28 = vld [vmem:[%s1821_s1 + $0x368] sm:$0xff]  ;;  %v874_v32 = vpack.c.bf16 %v127_v26, %v123_v24  ;;  %v129_v34 = vld [vmem:[%s1821_s1 + $0x340] sm:$0xff]  ;;  %v131_v36 = vld [vmem:[%s1821_s1 + $0x350] sm:$0xff]  ;;  %v876_v37 = vpack.c.bf16 %v136_v30, %v132_v29 }
  0x26   :  { %731 = vmatpush1.bf16.msra.mxu0 %v730_v46  ;;  %v748_v33 = vpack.c.bf16 %v134_v28, %v130_v27  ;;  %v133_v35 = vld [vmem:[%s1821_s1 + $0x360] sm:$0xff]  ;;  %v135_v38 = vld [vmem:[%s1821_s1 + $0x370] sm:$0xff]  ;;  %v138_v39 = vld [vmem:[%s1821_s1 + $0x388] sm:$0xff] }
  0x27   :  { %859 = vmatpush1.bf16.msra.mxu1 %v858_v47  ;;  %733 = vmatprep.subr.bf16.mxu0 %v732_v48  ;;  %v142_v40 = vld [vmem:[%s1821_s1 + $0x3a8] sm:$0xff]  ;;  %v140_v41 = vld [vmem:[%s1821_s1 + $0x398] sm:$0xff]  ;;  %v750_v43 = vpack.c.bf16 %v133_v35, %v129_v34  ;;  %v878_v44 = vpack.c.bf16 %v135_v38, %v131_v36  ;;  %v137_v46 = vld [vmem:[%s1821_s1 + $0x380] sm:$0xff] }
  0x28   :  { %861 = vmatprep.subr.bf16.mxu1 %v860_v52  ;;  %v144_v42 = vld [vmem:[%s1821_s1 + $0x3b8] sm:$0xff]  ;;  %v752_v45 = vpack.c.bf16 %v142_v40, %v138_v39  ;;  %v141_v47 = vld [vmem:[%s1821_s1 + $0x3a0] sm:$0xff]  ;;  %v139_v48 = vld [vmem:[%s1821_s1 + $0x390] sm:$0xff] }
  0x29   :  { %v880_v49 = vpack.c.bf16 %v144_v42, %v140_v41  ;;  %v143_v50 = vld [vmem:[%s1821_s1 + $0x3b0] sm:$0xff]  ;;  %v146_v51 = vld [vmem:[%s1821_s1 + $0x3c8] sm:$0xff]  ;;  %v148_v53 = vld [vmem:[%s1821_s1 + $0x3d8] sm:$0xff]  ;;  %v754_v55 = vpack.c.bf16 %v141_v47, %v137_v46 }
  0x2a   :  { %735 = vmatpush1.bf16.msra.mxu0 %v734_v58  ;;  %v150_v52 = vld [vmem:[%s1821_s1 + $0x3e8] sm:$0xff]  ;;  %v152_v54 = vld [vmem:[%s1821_s1 + $0x3f8] sm:$0xff]  ;;  %v882_v56 = vpack.c.bf16 %v143_v50, %v139_v48  ;;  %v145_v58 = vld [vmem:[%s1821_s1 + $0x3c0] sm:$0xff] }
  0x2b   :  { %863 = vmatpush1.bf16.msra.mxu1 %v862_v59  ;;  %737 = vmatprep.subr.bf16.mxu0 %v736_v60  ;;  %v756_v57 = vpack.c.bf16 %v150_v52, %v146_v51  ;;  %v149_v59 = vld [vmem:[%s1821_s1 + $0x3e0] sm:$0xff]  ;;  %v147_v60 = vld [vmem:[%s1821_s1 + $0x3d0] sm:$0xff]  ;;  %v884_v61 = vpack.c.bf16 %v152_v54, %v148_v53  ;;  %v154_v63 = vld [vmem:[%s1821_s1 + $0x408] sm:$0xff] }
  0x2c   :  { %865 = vmatprep.subr.bf16.mxu1 %v864_v0  ;;  %v151_v62 = vld [vmem:[%s1821_s1 + $0x3f0] sm:$0xff]  ;;  %v158_v0 = vld [vmem:[%s1821_s1 + $0x428] sm:$0xff]  ;;  %v156_v1 = vld [vmem:[%s1821_s1 + $0x418] sm:$0xff]  ;;  %v758_v3 = vpack.c.bf16 %v149_v59, %v145_v58 }
  0x2d   :  { %v160_v2 = vld [vmem:[%s1821_s1 + $0x438] sm:$0xff]  ;;  %v886_v4 = vpack.c.bf16 %v151_v62, %v147_v60  ;;  %v760_v5 = vpack.c.bf16 %v158_v0, %v154_v63  ;;  %v157_v7 = vld [vmem:[%s1821_s1 + $0x420] sm:$0xff]  ;;  %v159_v10 = vld [vmem:[%s1821_s1 + $0x430] sm:$0xff] }
  0x2e   :  { %739 = vmatpush1.bf16.msra.mxu0 %v738_v6  ;;  %v153_v6 = vld [vmem:[%s1821_s1 + $0x400] sm:$0xff]  ;;  %v162_v11 = vld [vmem:[%s1821_s1 + $0x448] sm:$0xff]  ;;  %v168_v14 = vld [vmem:[%s1821_s1 + $0x478] sm:$0xff] }
  0x2f   :  { %867 = vmatpush1.bf16.msra.mxu1 %v866_v8  ;;  %741 = vmatprep.subr.bf16.mxu0 %v740_v9  ;;  %v155_v8 = vld [vmem:[%s1821_s1 + $0x410] sm:$0xff]  ;;  %v888_v9 = vpack.c.bf16 %v160_v2, %v156_v1  ;;  %v166_v12 = vld [vmem:[%s1821_s1 + $0x468] sm:$0xff]  ;;  %v17_v15 = vld [vmem:[%s1822_s0] sm:$0xff]  ;;  %v762_v16 = vpack.c.bf16 %v157_v7, %v153_v6 }
  0x30   :  { %869 = vmatprep.subr.bf16.mxu1 %v868_v13  ;;  %v164_v13 = vld [vmem:[%s1821_s1 + $0x458] sm:$0xff]  ;;  %v890_v17 = vpack.c.bf16 %v159_v10, %v155_v8  ;;  %v764_v18 = vpack.c.bf16 %v166_v12, %v162_v11  ;;  %v167_v23 = vld [vmem:[%s1821_s1 + $0x470] sm:$0xff]  ;;  %v170_v24 = vld [vmem:[%s1821_s1 + $0x488] sm:$0xff] }
  0x31   :  { %v892_v22 = vpack.c.bf16 %v168_v14, %v164_v13  ;;  %v172_v26 = vld [vmem:[%s1821_s1 + $0x498] sm:$0xff]  ;;  %v175_v35 = vld [vmem:[%s1821_s1 + $0x4b0] sm:$0xff]  ;;  %v178_v36 = vld [vmem:[%s1821_s1 + $0x4c8] sm:$0xff] }
  0x32   :  { %743 = vmatpush1.bf16.msra.mxu0 %v742_v19  ;;  %v161_v19 = vld [vmem:[%s1821_s1 + $0x440] sm:$0xff]  ;;  %v176_v27 = vld [vmem:[%s1821_s1 + $0x4b8] sm:$0xff]  ;;  %v183_v47 = vld [vmem:[%s1821_s1 + $0x4f0] sm:$0xff] }
  0x33   :  { %871 = vmatpush1.bf16.msra.mxu1 %v870_v20  ;;  %745 = vmatprep.subr.bf16.mxu0 %v744_v21  ;;  %v165_v20 = vld [vmem:[%s1821_s1 + $0x460] sm:$0xff]  ;;  %v163_v21 = vld [vmem:[%s1821_s1 + $0x450] sm:$0xff]  ;;  %v896_v34 = vpack.c.bf16 %v176_v27, %v172_v26  ;;  %v180_v38 = vld [vmem:[%s1821_s1 + $0x4d8] sm:$0xff] }
  0x34   :  { %873 = vmatprep.subr.bf16.mxu1 %v872_v25  ;;  %v174_v25 = vld [vmem:[%s1821_s1 + $0x4a8] sm:$0xff]  ;;  %v766_v28 = vpack.c.bf16 %v165_v20, %v161_v19  ;;  %v894_v29 = vpack.c.bf16 %v167_v23, %v163_v21  ;;  %v184_v39 = vld [vmem:[%s1821_s1 + $0x4f8] sm:$0xff]  ;;  %v191_v59 = vld [vmem:[%s1821_s1 + $0x530] sm:$0xff] }
  0x35   :  { %v768_v30 = vpack.c.bf16 %v174_v25, %v170_v24  ;;  %v900_v46 = vpack.c.bf16 %v184_v39, %v180_v38  ;;  %v186_v48 = vld [vmem:[%s1821_s1 + $0x508] sm:$0xff]  ;;  %v188_v50 = vld [vmem:[%s1821_s1 + $0x518] sm:$0xff]  ;;  %v199_v7 = vld [vmem:[%s1821_s1 + $0x570] sm:$0xff] }
  0x36   :  { %747 = vmatpush1.bf16.msra.mxu0 %v746_v31  ;;  %v169_v31 = vld [vmem:[%s1821_s1 + $0x480] sm:$0xff]  ;;  %v192_v51 = vld [vmem:[%s1821_s1 + $0x538] sm:$0xff]  ;;  %v194_v60 = vld [vmem:[%s1821_s1 + $0x548] sm:$0xff] }
  0x37   :  { %875 = vmatpush1.bf16.msra.mxu1 %v874_v32  ;;  %749 = vmatprep.subr.bf16.mxu0 %v748_v33  ;;  %v173_v32 = vld [vmem:[%s1821_s1 + $0x4a0] sm:$0xff]  ;;  %v171_v33 = vld [vmem:[%s1821_s1 + $0x490] sm:$0xff]  ;;  %v904_v58 = vpack.c.bf16 %v192_v51, %v188_v50  ;;  %v196_v62 = vld [vmem:[%s1821_s1 + $0x558] sm:$0xff] }
  0x38   :  { %877 = vmatprep.subr.bf16.mxu1 %v876_v37  ;;  %v182_v37 = vld [vmem:[%s1821_s1 + $0x4e8] sm:$0xff]  ;;  %v770_v40 = vpack.c.bf16 %v173_v32, %v169_v31  ;;  %v898_v41 = vpack.c.bf16 %v175_v35, %v171_v33  ;;  %v200_v63 = vld [vmem:[%s1821_s1 + $0x578] sm:$0xff]  ;;  %v201_v14 = vld [vmem:[%s1821_s1 + $0x580] sm:$0xff] }
  0x39   :  { %v772_v42 = vpack.c.bf16 %v182_v37, %v178_v36  ;;  %v908_v6 = vpack.c.bf16 %v200_v63, %v196_v62  ;;  %v202_v8 = vld [vmem:[%s1821_s1 + $0x588] sm:$0xff]  ;;  %v204_v10 = vld [vmem:[%s1821_s1 + $0x598] sm:$0xff]  ;;  %v203_v19 = vld [vmem:[%s1821_s1 + $0x590] sm:$0xff] }
  0x3a   :  { %751 = vmatpush1.bf16.msra.mxu0 %v750_v43  ;;  %v177_v43 = vld [vmem:[%s1821_s1 + $0x4c0] sm:$0xff]  ;;  %v208_v11 = vld [vmem:[%s1821_s1 + $0x5b8] sm:$0xff]  ;;  %v22_v12 = vld [vmem:[%s1822_s0 + $0x28] sm:$0xff] }
  0x3b   :  { %879 = vmatpush1.bf16.msra.mxu1 %v878_v44  ;;  %753 = vmatprep.subr.bf16.mxu0 %v752_v45  ;;  %v181_v44 = vld [vmem:[%s1821_s1 + $0x4e0] sm:$0xff]  ;;  %v179_v45 = vld [vmem:[%s1821_s1 + $0x4d0] sm:$0xff]  ;;  %v912_v21 = vpack.c.bf16 %v208_v11, %v204_v10  ;;  %v214_v23 = vld [vmem:[%s1821_s1 + $0x5e8] sm:$0xff] }
  0x3c   :  { %881 = vmatprep.subr.bf16.mxu1 %v880_v49  ;;  %v190_v49 = vld [vmem:[%s1821_s1 + $0x528] sm:$0xff]  ;;  %v774_v52 = vpack.c.bf16 %v181_v44, %v177_v43  ;;  %v902_v53 = vpack.c.bf16 %v183_v47, %v179_v45  ;;  %v207_v20 = vld [vmem:[%s1821_s1 + $0x5b0] sm:$0xff]  ;;  %v20_v24 = vld [vmem:[%s1822_s0 + $0x18] sm:$0xff] }
  0x3d   :  { %v776_v54 = vpack.c.bf16 %v190_v49, %v186_v48  ;;  %v212_v25 = vld [vmem:[%s1821_s1 + $0x5d8] sm:$0xff]  ;;  %v213_v31 = vld [vmem:[%s1821_s1 + $0x5e0] sm:$0xff]  ;;  %v211_v32 = vld [vmem:[%s1821_s1 + $0x5d0] sm:$0xff] }
  0x3e   :  { %755 = vmatpush1.bf16.msra.mxu0 %v754_v55  ;;  %v185_v55 = vld [vmem:[%s1821_s1 + $0x500] sm:$0xff]  ;;  %v216_v26 = vld [vmem:[%s1821_s1 + $0x5f8] sm:$0xff]  ;;  %v218_v35 = vld [vmem:[%s1821_s1 + $0x608] sm:$0xff] }
  0x3f   :  { %883 = vmatpush1.bf16.msra.mxu1 %v882_v56  ;;  %757 = vmatprep.subr.bf16.mxu0 %v756_v57  ;;  %v189_v56 = vld [vmem:[%s1821_s1 + $0x520] sm:$0xff]  ;;  %v187_v57 = vld [vmem:[%s1821_s1 + $0x510] sm:$0xff]  ;;  %v916_v33 = vpack.c.bf16 %v216_v26, %v212_v25  ;;  %v222_v36 = vld [vmem:[%s1821_s1 + $0x628] sm:$0xff] }
  0x40   :  { %885 = vmatprep.subr.bf16.mxu1 %v884_v61  ;;  %v198_v61 = vld [vmem:[%s1821_s1 + $0x568] sm:$0xff]  ;;  %v778_v0 = vpack.c.bf16 %v189_v56, %v185_v55  ;;  %v906_v1 = vpack.c.bf16 %v191_v59, %v187_v57  ;;  %v220_v37 = vld [vmem:[%s1821_s1 + $0x618] sm:$0xff]  ;;  %v221_v43 = vld [vmem:[%s1821_s1 + $0x620] sm:$0xff] }
  0x41   :  { %v780_v2 = vpack.c.bf16 %v198_v61, %v194_v60  ;;  %v224_v38 = vld [vmem:[%s1821_s1 + $0x638] sm:$0xff]  ;;  %v219_v44 = vld [vmem:[%s1821_s1 + $0x610] sm:$0xff]  ;;  %v226_v47 = vld [vmem:[%s1821_s1 + $0x648] sm:$0xff] }
  0x42   :  { %759 = vmatpush1.bf16.msra.mxu0 %v758_v3  ;;  %v193_v3 = vld [vmem:[%s1821_s1 + $0x540] sm:$0xff]  ;;  %v920_v45 = vpack.c.bf16 %v224_v38, %v220_v37  ;;  %v230_v48 = vld [vmem:[%s1821_s1 + $0x668] sm:$0xff]  ;;  %v228_v49 = vld [vmem:[%s1821_s1 + $0x658] sm:$0xff] }
  0x43   :  { %887 = vmatpush1.bf16.msra.mxu1 %v886_v4  ;;  %761 = vmatprep.subr.bf16.mxu0 %v760_v5  ;;  %v197_v4 = vld [vmem:[%s1821_s1 + $0x560] sm:$0xff]  ;;  %v195_v5 = vld [vmem:[%s1821_s1 + $0x550] sm:$0xff]  ;;  %v232_v50 = vld [vmem:[%s1821_s1 + $0x678] sm:$0xff] }
  0x44   :  { %889 = vmatprep.subr.bf16.mxu1 %v888_v9  ;;  %v206_v9 = vld [vmem:[%s1821_s1 + $0x5a8] sm:$0xff]  ;;  %v782_v13 = vpack.c.bf16 %v197_v4, %v193_v3  ;;  %v229_v55 = vld [vmem:[%s1821_s1 + $0x660] sm:$0xff]  ;;  %v227_v56 = vld [vmem:[%s1821_s1 + $0x650] sm:$0xff]  ;;  %v924_v57 = vpack.c.bf16 %v232_v50, %v228_v49 }
  0x45   :  { %346 = vmatmul.mubr.f32.vlgmr.msra.gmra.mrb[0].mxu0 %v17_v15  ;;  %v234_v59 = vld [vmem:[%s1821_s1 + $0x688] sm:$0xff]  ;;  %v236_v61 = vld [vmem:[%s1821_s1 + $0x698] sm:$0xff]  ;;  %v237_v3 = vld [vmem:[%s1821_s1 + $0x6a0] sm:$0xff] }
  0x46   :  { %763 = vmatpush1.bf16.msra.mxu0 %v762_v16  ;;  %500 = vmatmul.mubr.f32.vlgmr.msra.gmra.mrb[0].mxu1 %v17_v15  ;;  %v21_v15 = vld [vmem:[%s1822_s0 + $0x20] sm:$0xff]  ;;  %v910_v16 = vpack.c.bf16 %v199_v7, %v195_v5  ;;  %v238_v60 = vld [vmem:[%s1821_s1 + $0x6a8] sm:$0xff]  ;;  %v240_v62 = vld [vmem:[%s1821_s1 + $0x6b8] sm:$0xff] }
  0x47   :  { %891 = vmatpush1.bf16.msra.mxu1 %v890_v17  ;;  %765 = vmatprep.subr.bf16.mxu0 %v764_v18  ;;  %v784_v17 = vpack.c.bf16 %v206_v9, %v202_v8  ;;  %v205_v18 = vld [vmem:[%s1821_s1 + $0x5a0] sm:$0xff]  ;;  %v235_v4 = vld [vmem:[%s1821_s1 + $0x690] sm:$0xff]  ;;  %v928_v5 = vpack.c.bf16 %v240_v62, %v236_v61  ;;  %v242_v7 = vld [vmem:[%s1821_s1 + $0x6c8] sm:$0xff] }
  0x48   :  { %893 = vmatprep.subr.bf16.mxu1 %v892_v22  ;;  %351 = vmatprep.mubr.f32.mxu0 %v22_v12  ;;  %v210_v22 = vld [vmem:[%s1821_s1 + $0x5c8] sm:$0xff]  ;;  %v786_v27 = vpack.c.bf16 %v205_v18, %v201_v14  ;;  %v244_v9 = vld [vmem:[%s1821_s1 + $0x6d8] sm:$0xff]  ;;  %v241_v14 = vld [vmem:[%s1821_s1 + $0x6c0] sm:$0xff] }
  0x49   :  { %505 = vmatprep.mubr.f32.mxu1 %v22_v12  ;;  %352 = vmatmul.mubr.f32.gmra.mrb[2].mxu0 %v21_v15  ;;  %v246_v8 = vld [vmem:[%s1821_s1 + $0x6e8] sm:$0xff]  ;;  %v248_v10 = vld [vmem:[%s1821_s1 + $0x6f8] sm:$0xff]  ;;  %v247_v18 = vld [vmem:[%s1821_s1 + $0x6f0] sm:$0xff] }
  0x4a   :  { %767 = vmatpush1.bf16.msra.mxu0 %v766_v28  ;;  %506 = vmatmul.mubr.f32.gmra.mrb[2].mxu1 %v21_v15  ;;  %v914_v28 = vpack.c.bf16 %v207_v20, %v203_v19  ;;  %v245_v15 = vld [vmem:[%s1821_s1 + $0x6e0] sm:$0xff]  ;;  %v250_v19 = vld [vmem:[%s1821_s1 + $0x708] sm:$0xff] }
  0x4b   :  { %895 = vmatpush1.bf16.msra.mxu1 %v894_v29  ;;  %769 = vmatprep.subr.bf16.mxu0 %v768_v30  ;;  %v788_v29 = vpack.c.bf16 %v214_v23, %v210_v22  ;;  %v209_v30 = vld [vmem:[%s1821_s1 + $0x5c0] sm:$0xff]  ;;  %v254_v20 = vld [vmem:[%s1821_s1 + $0x728] sm:$0xff]  ;;  %v256_v22 = vld [vmem:[%s1821_s1 + $0x738] sm:$0xff]  ;;  %v806_v23 = vpack.c.bf16 %v245_v15, %v241_v14 }
  0x4c   :  { %897 = vmatprep.subr.bf16.mxu1 %v896_v34  ;;  %422 = vmatprep.mubr.f32.mxu0 %v20_v24  ;;  %v215_v34 = vld [vmem:[%s1821_s1 + $0x5f0] sm:$0xff]  ;;  %v790_v39 = vpack.c.bf16 %v213_v31, %v209_v30  ;;  %v808_v25 = vpack.c.bf16 %v254_v20, %v250_v19  ;;  %v249_v26 = vld [vmem:[%s1821_s1 + $0x700] sm:$0xff]  ;;  %v258_v31 = vld [vmem:[%s1821_s1 + $0x748] sm:$0xff] }
  0x4d   :  { %576 = vmatprep.mubr.f32.mxu1 %v20_v24  ;;  %v255_v30 = vld [vmem:[%s1821_s1 + $0x730] sm:$0xff]  ;;  %v257_v38 = vld [vmem:[%s1821_s1 + $0x740] sm:$0xff] }
  0x4e   :  { %771 = vmatpush1.bf16.msra.mxu0 %v770_v40  ;;  %v918_v40 = vpack.c.bf16 %v215_v34, %v211_v32  ;;  %v262_v32 = vld [vmem:[%s1821_s1 + $0x768] sm:$0xff]  ;;  %v264_v34 = vld [vmem:[%s1821_s1 + $0x778] sm:$0xff]  ;;  %v265_v50 = vld [vmem:[%s1821_s1 + $0x780] sm:$0xff] }
  0x4f   :  { %899 = vmatpush1.bf16.msra.mxu1 %v898_v41  ;;  %773 = vmatprep.subr.bf16.mxu0 %v772_v42  ;;  %v792_v41 = vpack.c.bf16 %v222_v36, %v218_v35  ;;  %v217_v42 = vld [vmem:[%s1821_s1 + $0x600] sm:$0xff]  ;;  %v812_v37 = vpack.c.bf16 %v262_v32, %v258_v31 }
  0x50   :  { %901 = vmatprep.subr.bf16.mxu1 %v900_v46  ;;  %v223_v46 = vld [vmem:[%s1821_s1 + $0x630] sm:$0xff]  ;;  %v794_v51 = vpack.c.bf16 %v221_v43, %v217_v42  ;;  %v266_v43 = vld [vmem:[%s1821_s1 + $0x788] sm:$0xff]  ;;  %v273_v62 = vld [vmem:[%s1821_s1 + $0x7c0] sm:$0xff] }
  0x51   :  { %v263_v42 = vld [vmem:[%s1821_s1 + $0x770] sm:$0xff] }
  0x52   :  { %775 = vmatpush1.bf16.msra.mxu0 %v774_v52  ;;  %v922_v52 = vpack.c.bf16 %v223_v46, %v219_v44  ;;  %v270_v44 = vld [vmem:[%s1821_s1 + $0x7a8] sm:$0xff]  ;;  %v272_v46 = vld [vmem:[%s1821_s1 + $0x7b8] sm:$0xff] }
  0x53   :  { %903 = vmatpush1.bf16.msra.mxu1 %v902_v53  ;;  %777 = vmatprep.subr.bf16.mxu0 %v776_v54  ;;  %v796_v53 = vpack.c.bf16 %v230_v48, %v226_v47  ;;  %v225_v54 = vld [vmem:[%s1821_s1 + $0x640] sm:$0xff]  ;;  %v816_v49 = vpack.c.bf16 %v270_v44, %v266_v43 }
  0x54   :  { %905 = vmatprep.subr.bf16.mxu1 %v904_v58  ;;  %v231_v58 = vld [vmem:[%s1821_s1 + $0x670] sm:$0xff]  ;;  %v798_v63 = vpack.c.bf16 %v229_v55, %v225_v54  ;;  %v274_v55 = vld [vmem:[%s1821_s1 + $0x7c8] sm:$0xff] }
  0x55   :  { %v271_v54 = vld [vmem:[%s1821_s1 + $0x7b0] sm:$0xff] }
  0x56   :  { %779 = vmatpush1.bf16.msra.mxu0 %v778_v0  ;;  %v926_v0 = vpack.c.bf16 %v231_v58, %v227_v56  ;;  %v278_v56 = vld [vmem:[%s1821_s1 + $0x7e8] sm:$0xff]  ;;  %v280_v58 = vld [vmem:[%s1821_s1 + $0x7f8] sm:$0xff] }
  0x57   :  { %907 = vmatpush1.bf16.msra.mxu1 %v906_v1  ;;  %781 = vmatprep.subr.bf16.mxu0 %v780_v2  ;;  %v800_v1 = vpack.c.bf16 %v238_v60, %v234_v59  ;;  %v233_v2 = vld [vmem:[%s1821_s1 + $0x680] sm:$0xff]  ;;  %v820_v61 = vpack.c.bf16 %v278_v56, %v274_v55 }
  0x58   :  { %909 = vmatprep.subr.bf16.mxu1 %v908_v6  ;;  %v239_v6 = vld [vmem:[%s1821_s1 + $0x6b0] sm:$0xff]  ;;  %v802_v11 = vpack.c.bf16 %v237_v3, %v233_v2  ;;  %v630_v56 = vld [vmem:[%s1824_s2] sm:$0xff] }
  0x59   :  { %v930_v12 = vpack.c.bf16 %v239_v6, %v235_v4  ;;  %v279_v2 = vld [vmem:[%s1821_s1 + $0x7f0] sm:$0xff]  ;;  %v24_v6 = vld [vmem:[%s1822_s0 + $0x38] sm:$0xff] }
  0x5a   :  { %783 = vmatpush1.bf16.msra.mxu0 %v782_v13  ;;  %v804_v13 = vpack.c.bf16 %v246_v8, %v242_v7  ;;  %v23_v7 = vld [vmem:[%s1822_s0 + $0x30] sm:$0xff] }
  0x5b   :  { %911 = vmatpush1.bf16.msra.mxu1 %v910_v16  ;;  %785 = vmatprep.subr.bf16.mxu0 %v784_v17  ;;  %v243_v16 = vld [vmem:[%s1821_s1 + $0x6d0] sm:$0xff]  ;;  %v932_v17 = vpack.c.bf16 %v248_v10, %v244_v9 }
  0x5c   :  { %913 = vmatprep.subr.bf16.mxu1 %v912_v21  ;;  %v252_v21 = vld [vmem:[%s1821_s1 + $0x718] sm:$0xff]  ;;  %v934_v24 = vpack.c.bf16 %v247_v18, %v243_v16 }
  0x5e   :  { %787 = vmatpush1.bf16.msra.mxu0 %v786_v27  ;;  %v253_v27 = vld [vmem:[%s1821_s1 + $0x720] sm:$0xff] }
  0x5f   :  { %915 = vmatpush1.bf16.msra.mxu1 %v914_v28  ;;  %789 = vmatprep.subr.bf16.mxu0 %v788_v29  ;;  %v251_v28 = vld [vmem:[%s1821_s1 + $0x710] sm:$0xff]  ;;  %v936_v29 = vpack.c.bf16 %v256_v22, %v252_v21  ;;  %v810_v35 = vpack.c.bf16 %v253_v27, %v249_v26 }
  0x60   :  { %917 = vmatprep.subr.bf16.mxu1 %v916_v33  ;;  %v260_v33 = vld [vmem:[%s1821_s1 + $0x758] sm:$0xff]  ;;  %v938_v36 = vpack.c.bf16 %v255_v30, %v251_v28 }
  0x62   :  { %791 = vmatpush1.bf16.msra.mxu0 %v790_v39  ;;  %v261_v39 = vld [vmem:[%s1821_s1 + $0x760] sm:$0xff] }
  0x63   :  { %919 = vmatpush1.bf16.msra.mxu1 %v918_v40  ;;  %793 = vmatprep.subr.bf16.mxu0 %v792_v41  ;;  %v259_v40 = vld [vmem:[%s1821_s1 + $0x750] sm:$0xff]  ;;  %v940_v41 = vpack.c.bf16 %v264_v34, %v260_v33  ;;  %v814_v47 = vpack.c.bf16 %v261_v39, %v257_v38 }
  0x64   :  { %921 = vmatprep.subr.bf16.mxu1 %v920_v45  ;;  %v268_v45 = vld [vmem:[%s1821_s1 + $0x798] sm:$0xff]  ;;  %v942_v48 = vpack.c.bf16 %v263_v42, %v259_v40 }
  0x66   :  { %795 = vmatpush1.bf16.msra.mxu0 %v794_v51  ;;  %v269_v51 = vld [vmem:[%s1821_s1 + $0x7a0] sm:$0xff] }
  0x67   :  { %923 = vmatpush1.bf16.msra.mxu1 %v922_v52  ;;  %797 = vmatprep.subr.bf16.mxu0 %v796_v53  ;;  %v267_v52 = vld [vmem:[%s1821_s1 + $0x790] sm:$0xff]  ;;  %v944_v53 = vpack.c.bf16 %v272_v46, %v268_v45  ;;  %v818_v59 = vpack.c.bf16 %v269_v51, %v265_v50 }
  0x68   :  { %925 = vmatprep.subr.bf16.mxu1 %v924_v57  ;;  %v276_v57 = vld [vmem:[%s1821_s1 + $0x7d8] sm:$0xff]  ;;  %v946_v60 = vpack.c.bf16 %v271_v54, %v267_v52 }
  0x6a   :  { %799 = vmatpush1.bf16.msra.mxu0 %v798_v63  ;;  %v277_v63 = vld [vmem:[%s1821_s1 + $0x7e0] sm:$0xff] }
  0x6b   :  { %927 = vmatpush1.bf16.msra.mxu1 %v926_v0  ;;  %801 = vmatprep.subr.bf16.mxu0 %v800_v1  ;;  %v948_v0 = vpack.c.bf16 %v280_v58, %v276_v57  ;;  %v275_v1 = vld [vmem:[%s1821_s1 + $0x7d0] sm:$0xff]  ;;  %v822_v3 = vpack.c.bf16 %v277_v63, %v273_v62  ;;  %v657_v62 = vld [vmem:[%s1823_s3 + $0x8] sm:$0xff] }
  0x6c   :  { %929 = vmatprep.subr.bf16.mxu1 %v928_v5  ;;  %v950_v4 = vpack.c.bf16 %v279_v2, %v275_v1  ;;  %v19_v5 = vld [vmem:[%s1822_s0 + $0x10] sm:$0xff] }
  0x6e   :  { %803 = vmatpush1.bf16.msra.mxu0 %v802_v11 }
  0x6f   :  { %931 = vmatpush1.bf16.msra.mxu1 %v930_v12  ;;  %805 = vmatprep.subr.bf16.mxu0 %v804_v13 }
  0x70   :  { %933 = vmatprep.subr.bf16.mxu1 %v932_v17 }
  0x72   :  { %807 = vmatpush1.bf16.msra.mxu0 %v806_v23 }
  0x73   :  { %935 = vmatpush1.bf16.msra.mxu1 %v934_v24  ;;  %809 = vmatprep.subr.bf16.mxu0 %v808_v25 }
  0x74   :  { %937 = vmatprep.subr.bf16.mxu1 %v936_v29 }
  0x76   :  { %811 = vmatpush1.bf16.msra.mxu0 %v810_v35 }
  0x77   :  { %939 = vmatpush1.bf16.msra.mxu1 %v938_v36  ;;  %813 = vmatprep.subr.bf16.mxu0 %v812_v37 }
  0x78   :  { %941 = vmatprep.subr.bf16.mxu1 %v940_v41 }
  0x7a   :  { %815 = vmatpush1.bf16.msra.mxu0 %v814_v47 }
  0x7b   :  { %943 = vmatpush1.bf16.msra.mxu1 %v942_v48  ;;  %817 = vmatprep.subr.bf16.mxu0 %v816_v49  ;;  %v967_v48 = vmov 0   ;;  %v656_v49 = vld [vmem:[%s1823_s3] sm:$0xff] }
  0x7c   :  { %945 = vmatprep.subr.bf16.mxu1 %v944_v53  ;;  %962 = vset.pattern.permute.xlu1 %v967_v48 }
  0x7d   :  { %961 = vset.pattern.permute.xlu0 %v967_v48 }
  0x7e   :  { %819 = vmatpush1.bf16.msra.mxu0 %v818_v59  ;;  %v631_v59 = vld [vmem:[%s1824_s2 + $0x8] sm:$0xff] }
  0x7f   :  { %947 = vmatpush1.bf16.msra.mxu1 %v946_v60  ;;  %821 = vmatprep.subr.bf16.mxu0 %v820_v61 }
  0x80   :  { %949 = vmatprep.subr.bf16.mxu1 %v948_v0 }
  0x82   :  { %823 = vmatpush1.bf16.msra.mxu0 %v822_v3 }
  0x83   :  { %951 = vmatpush1.bf16.msra.mxu1 %v950_v4 }
  0x85   :  { %423 = vmatmul.mubr.f32.vlgmr.msra.gmra.mrb[0].mxu0 %v19_v5 }
  0x86   :  { %577 = vmatmul.mubr.f32.vlgmr.msra.gmra.mrb[0].mxu1 %v19_v5  ;;  %428 = vmatprep.mubr.f32.mxu0 %v24_v6 }
  0x87   :  { %582 = vmatprep.mubr.f32.mxu1 %v24_v6 }
  0x89   :  { %429 = vmatmul.mubr.f32.gmra.mrb[2].mxu0 %v23_v7 }
  0x8a   :  { %583 = vmatmul.mubr.f32.gmra.mrb[2].mxu1 %v23_v7 }
 0x158   :  { %v424_v8 = vpop.f32.mrb[0].mxu0 }
 0x159   :  { %v578_v9 = vpop.f32.mrb[0].mxu1  ;;  %v426_v10 = vpop.f32.mrb[1].mxu0 }
 0x15a   :  { %v589_v11 = vadd.f32 %v426_v10, %v424_v8  ;;  %v580_v12 = vpop.f32.mrb[1].mxu1 }
 0x15c   :  { %v430_v13 = vpop.f32.mrb[2].mxu0  ;;  %v590_v14 = vadd.f32 %v589_v11, %v578_v9 }
 0x15d   :  { %v584_v15 = vpop.f32.mrb[2].mxu1  ;;  %v432_v16 = vpop.f32.mrb[3].mxu0 }
 0x15e   :  { %v594_v17 = vadd.f32 %v432_v16, %v430_v13  ;;  %v586_v18 = vpop.f32.mrb[3].mxu1  ;;  %v591_v19 = vadd.f32 %v590_v14, %v580_v12 }
 0x160   :  { %v595_v20 = vadd.f32 %v594_v17, %v584_v15  ;;  %592 = vadd.xlane.f32.xlu0 %v591_v19 }
 0x162   :  { %v596_v21 = vadd.f32 %v595_v20, %v586_v18 }
 0x164   :  { %597 = vadd.xlane.f32.xlu0 %v596_v21 }
 0x1ed   :  { %v593_v22 = vpop.xlane.xlu0 %592 }
 0x1ee   :  { %v600_v23 = vmul.f32 0.001953125, %v593_v22 }
 0x1f0   :  { %v602_v24 = vsub.f32 %v424_v8, %v600_v23  ;;  %v603_v25 = vsub.f32 %v426_v10, %v600_v23  ;;  %v604_v26 = vsub.f32 %v578_v9, %v600_v23  ;;  %v605_v28 = vsub.f32 %v580_v12, %v600_v23 }
 0x1f1   :  { %v598_v27 = vpop.xlane.xlu0 %597 }
 0x1f2   :  { %v601_v29 = vmul.f32 0.001953125, %v598_v27  ;;  %v610_v30 = vmul.f32 %v602_v24, %v602_v24  ;;  %v611_v31 = vmul.f32 %v603_v25, %v603_v25  ;;  %v612_v32 = vmul.f32 %v604_v26, %v604_v26 }
 0x1f3   :  { %v613_v37 = vmul.f32 %v605_v28, %v605_v28 }
 0x1f4   :  { %v606_v33 = vsub.f32 %v430_v13, %v601_v29  ;;  %v607_v34 = vsub.f32 %v432_v16, %v601_v29  ;;  %v618_v35 = vadd.f32 %v611_v31, %v610_v30  ;;  %v608_v36 = vsub.f32 %v584_v15, %v601_v29 }
 0x1f5   :  { %v609_v39 = vsub.f32 %v586_v18, %v601_v29 }
 0x1f6   :  { %v619_v38 = vadd.f32 %v618_v35, %v612_v32  ;;  %v614_v40 = vmul.f32 %v606_v33, %v606_v33  ;;  %v615_v41 = vmul.f32 %v607_v34, %v607_v34  ;;  %v616_v43 = vmul.f32 %v608_v36, %v608_v36 }
 0x1f7   :  { %v617_v45 = vmul.f32 %v609_v39, %v609_v39 }
 0x1f8   :  { %v620_v42 = vadd.f32 %v619_v38, %v613_v37  ;;  %v623_v44 = vadd.f32 %v615_v41, %v614_v40 }
 0x1fa   :  { %621 = vadd.xlane.f32.xlu1 %v620_v42  ;;  %v624_v46 = vadd.f32 %v623_v44, %v616_v43 }
 0x1fc   :  { %v625_v47 = vadd.f32 %v624_v46, %v617_v45 }
 0x1fe   :  { %626 = vadd.xlane.f32.xlu1 %v625_v47 }
 0x20f   :  { %660 = vperm.xlu1 %962, %v656_v49  }
 0x287   :  { %v622_v50 = vpop.xlane.xlu1 %621 }
 0x288   :  { %v628_v51 = vmul.f32 0.001953125, %v622_v50 }
 0x28a   :  { %v632_v52 = vadd.f32 1e-05, %v628_v51 }
 0x28b   :  { %v627_v53 = vpop.xlane.xlu1 %626 }
 0x28c   :  { %963 = vrsqrt.f32 %v632_v52  ;;  %v629_v54 = vmul.f32 0.001953125, %v627_v53 }
 0x28e   :  { %v633_v55 = vadd.f32 1e-05, %v629_v54 }
 0x28f   :  { %v661_v63 = vpop.permute.xlu1 %660 }
 0x290   :  { %965 = vrsqrt.f32 %v633_v55 }
 0x296   :  { %v964_v57 = vpop.eup %963 }
 0x297   :  { %v636_v58 = vmul.f32 %v964_v57, %v630_v56 }
 0x299   :  { %640 = vperm.xlu0 %961, %v636_v58  }
 0x29a   :  { %v966_v60 = vpop.eup %965 }
 0x29b   :  { %v637_v61 = vmul.f32 %v966_v60, %v631_v59 }
 0x29d   :  { %645 = vperm.xlu1 %962, %v637_v61  }
 0x2a1   :  { %665 = vperm.xlu1 %962, %v657_v62  }
 0x318   :  { %v641_v0 = vpop.permute.xlu0 %640 }
 0x319   :  { %v648_v1 = vmul.f32 %v641_v0, %v602_v24  ;;  %v649_v2 = vmul.f32 %v641_v0, %v603_v25  ;;  %v650_v3 = vmul.f32 %v641_v0, %v604_v26  ;;  %v651_v4 = vmul.f32 %v641_v0, %v605_v28 }
 0x31b   :  { %v668_v5 = vadd.f32 %v661_v63, %v648_v1  ;;  %v669_v6 = vadd.f32 %v661_v63, %v649_v2  ;;  %v670_v7 = vadd.f32 %v661_v63, %v650_v3  ;;  %v671_v8 = vadd.f32 %v661_v63, %v651_v4 }
 0x31c   :  { %v646_v9 = vpop.permute.xlu1 %645 }
 0x31d   :  { %v676_v10 = vmax.f32 %v668_v5, 0.0  ;;  %v677_v11 = vmax.f32 %v669_v6, 0.0  ;;  %v678_v12 = vmax.f32 %v670_v7, 0.0  ;;  %v679_v13 = vmax.f32 %v671_v8, 0.0 }
 0x31e   :  { %v652_v14 = vmul.f32 %v646_v9, %v606_v33  ;;  %v653_v15 = vmul.f32 %v646_v9, %v607_v34  ;;  %v654_v16 = vmul.f32 %v646_v9, %v608_v36  ;;  %v655_v17 = vmul.f32 %v646_v9, %v609_v39 }
 0x31f   :  { %684 = vst [vmem:[%s1825_s4] sm:$0xff] %v676_v10  ;;  %685 = vst [vmem:[%s1825_s4 + $0x8] sm:$0xff] %v677_v11 }
 0x320   :  { %686 = vst [vmem:[%s1825_s4 + $0x10] sm:$0xff] %v678_v12  ;;  %687 = vst [vmem:[%s1825_s4 + $0x18] sm:$0xff] %v679_v13  ;;  %v666_v18 = vpop.permute.xlu1 %665 }
 0x321   :  { %v672_v19 = vadd.f32 %v666_v18, %v652_v14  ;;  %v673_v20 = vadd.f32 %v666_v18, %v653_v15  ;;  %v674_v21 = vadd.f32 %v666_v18, %v654_v16  ;;  %v675_v22 = vadd.f32 %v666_v18, %v655_v17 }
 0x323   :  { %v680_v23 = vmax.f32 %v672_v19, 0.0  ;;  %v681_v24 = vmax.f32 %v673_v20, 0.0  ;;  %v682_v25 = vmax.f32 %v674_v21, 0.0  ;;  %v683_v26 = vmax.f32 %v675_v22, 0.0 }
 0x325   :  { %688 = vst [vmem:[%s1825_s4 + $0x20] sm:$0xff] %v680_v23  ;;  %689 = vst [vmem:[%s1825_s4 + $0x28] sm:$0xff] %v681_v24 }
 0x326   :  { %690 = vst [vmem:[%s1825_s4 + $0x30] sm:$0xff] %v682_v25  ;;  %691 = vst [vmem:[%s1825_s4 + $0x38] sm:$0xff] %v683_v26 }

// kernel: generator_forward.8
= control target key start
LH: loop header
LB: loop body
LE: loop exit
PB: predicated region body
PF: predicated region fallthrough
CT: control target
= control target key end

     0   :  { %s3433_s1 = inlined_call_operand.vmem [shape: f32[256,2048], index: 1, kind: input, shape index: {}]   ;;  %s3434_s0 = inlined_call_operand.vmem [shape: f32[8,256], index: 0, kind: input, shape index: {}]   ;;  %s3435_s2 = inlined_call_operand.vmem [shape: f32[8,1], index: 2, kind: input, shape index: {}]   ;;  %s3436_s3 = inlined_call_operand.vmem [shape: f32[8,1], index: 3, kind: input, shape index: {}]   ;;  %s3437_s4 = inlined_call_operand.vmem [shape: f32[8,2048], index: 4, kind: output, shape index: {}]  }
   0x1   :  { %v20_v0 = vld [vmem:[%s3433_s1 + $0x8] sm:$0xff]  ;;  %v19_v2 = vld [vmem:[%s3433_s1] sm:$0xff]  ;;  %v22_v5 = vld [vmem:[%s3433_s1 + $0x18] sm:$0xff] }
   0x2   :  { %v36_v1 = vld [vmem:[%s3433_s1 + $0x88] sm:$0xff]  ;;  %v35_v4 = vld [vmem:[%s3433_s1 + $0x80] sm:$0xff]  ;;  %v38_v6 = vld [vmem:[%s3433_s1 + $0x98] sm:$0xff] }
   0x3   :  { %v1251_v3 = vpack.c.bf16 %v36_v1, %v20_v0  ;;  %v1253_v7 = vpack.c.bf16 %v35_v4, %v19_v2  ;;  %v1315_v8 = vpack.c.bf16 %v38_v6, %v22_v5  ;;  %v52_v9 = vld [vmem:[%s3433_s1 + $0x108] sm:$0xff]  ;;  %v21_v11 = vld [vmem:[%s3433_s1 + $0x10] sm:$0xff]  ;;  %v51_v14 = vld [vmem:[%s3433_s1 + $0x100] sm:$0xff] }
   0x4   :  { %v68_v10 = vld [vmem:[%s3433_s1 + $0x188] sm:$0xff]  ;;  %v37_v13 = vld [vmem:[%s3433_s1 + $0x90] sm:$0xff]  ;;  %v67_v15 = vld [vmem:[%s3433_s1 + $0x180] sm:$0xff] }
   0x5   :  { %1252 = vmatprep.subr.bf16.mxu0 %v1251_v3  ;;  %v1255_v12 = vpack.c.bf16 %v68_v10, %v52_v9  ;;  %1316 = vmatprep.subr.bf16.mxu1 %v1315_v8  ;;  %v1317_v16 = vpack.c.bf16 %v37_v13, %v21_v11  ;;  %v1257_v17 = vpack.c.bf16 %v67_v15, %v51_v14  ;;  %v54_v18 = vld [vmem:[%s3433_s1 + $0x118] sm:$0xff]  ;;  %v84_v20 = vld [vmem:[%s3433_s1 + $0x208] sm:$0xff]  ;;  %v53_v23 = vld [vmem:[%s3433_s1 + $0x110] sm:$0xff] }
   0x6   :  { %1254 = vmatpush1.bf16.msra.mxu0 %v1253_v7  ;;  %v70_v19 = vld [vmem:[%s3433_s1 + $0x198] sm:$0xff]  ;;  %v100_v22 = vld [vmem:[%s3433_s1 + $0x288] sm:$0xff]  ;;  %v69_v24 = vld [vmem:[%s3433_s1 + $0x190] sm:$0xff] }
   0x7   :  { %1256 = vmatprep.subr.bf16.mxu0 %v1255_v12  ;;  %v1319_v21 = vpack.c.bf16 %v70_v19, %v54_v18  ;;  %1318 = vmatpush1.bf16.msra.mxu1 %v1317_v16  ;;  %v1259_v25 = vpack.c.bf16 %v100_v22, %v84_v20  ;;  %v1321_v26 = vpack.c.bf16 %v69_v24, %v53_v23  ;;  %v83_v27 = vld [vmem:[%s3433_s1 + $0x200] sm:$0xff]  ;;  %v86_v29 = vld [vmem:[%s3433_s1 + $0x218] sm:$0xff]  ;;  %v116_v31 = vld [vmem:[%s3433_s1 + $0x308] sm:$0xff] }
   0x8   :  { %v99_v28 = vld [vmem:[%s3433_s1 + $0x280] sm:$0xff]  ;;  %v102_v30 = vld [vmem:[%s3433_s1 + $0x298] sm:$0xff]  ;;  %v132_v32 = vld [vmem:[%s3433_s1 + $0x388] sm:$0xff] }
   0x9   :  { %1320 = vmatprep.subr.bf16.mxu1 %v1319_v21  ;;  %v1261_v33 = vpack.c.bf16 %v99_v28, %v83_v27  ;;  %v1323_v34 = vpack.c.bf16 %v102_v30, %v86_v29  ;;  %v85_v35 = vld [vmem:[%s3433_s1 + $0x210] sm:$0xff]  ;;  %v115_v37 = vld [vmem:[%s3433_s1 + $0x300] sm:$0xff]  ;;  %v1263_v38 = vpack.c.bf16 %v132_v32, %v116_v31  ;;  %v118_v40 = vld [vmem:[%s3433_s1 + $0x318] sm:$0xff] }
   0xa   :  { %1258 = vmatpush1.bf16.msra.mxu0 %v1257_v17  ;;  %v101_v36 = vld [vmem:[%s3433_s1 + $0x290] sm:$0xff]  ;;  %v131_v39 = vld [vmem:[%s3433_s1 + $0x380] sm:$0xff]  ;;  %v134_v41 = vld [vmem:[%s3433_s1 + $0x398] sm:$0xff] }
   0xb   :  { %1260 = vmatprep.subr.bf16.mxu0 %v1259_v25  ;;  %1322 = vmatpush1.bf16.msra.mxu1 %v1321_v26  ;;  %v1325_v42 = vpack.c.bf16 %v101_v36, %v85_v35  ;;  %v148_v43 = vld [vmem:[%s3433_s1 + $0x408] sm:$0xff]  ;;  %v1327_v45 = vpack.c.bf16 %v134_v41, %v118_v40  ;;  %v117_v46 = vld [vmem:[%s3433_s1 + $0x310] sm:$0xff]  ;;  %v1265_v48 = vpack.c.bf16 %v131_v39, %v115_v37  ;;  %v150_v49 = vld [vmem:[%s3433_s1 + $0x418] sm:$0xff] }
   0xc   :  { %v164_v44 = vld [vmem:[%s3433_s1 + $0x488] sm:$0xff]  ;;  %1324 = vmatprep.subr.bf16.mxu1 %v1323_v34  ;;  %v133_v47 = vld [vmem:[%s3433_s1 + $0x390] sm:$0xff]  ;;  %v166_v50 = vld [vmem:[%s3433_s1 + $0x498] sm:$0xff] }
   0xd   :  { %v1267_v51 = vpack.c.bf16 %v164_v44, %v148_v43  ;;  %v147_v52 = vld [vmem:[%s3433_s1 + $0x400] sm:$0xff]  ;;  %v1329_v54 = vpack.c.bf16 %v133_v47, %v117_v46  ;;  %v180_v55 = vld [vmem:[%s3433_s1 + $0x508] sm:$0xff]  ;;  %v1331_v57 = vpack.c.bf16 %v166_v50, %v150_v49  ;;  %v149_v58 = vld [vmem:[%s3433_s1 + $0x410] sm:$0xff] }
   0xe   :  { %1262 = vmatpush1.bf16.msra.mxu0 %v1261_v33  ;;  %v163_v53 = vld [vmem:[%s3433_s1 + $0x480] sm:$0xff]  ;;  %v196_v56 = vld [vmem:[%s3433_s1 + $0x588] sm:$0xff]  ;;  %v165_v59 = vld [vmem:[%s3433_s1 + $0x490] sm:$0xff] }
   0xf   :  { %1264 = vmatprep.subr.bf16.mxu0 %v1263_v38  ;;  %1326 = vmatpush1.bf16.msra.mxu1 %v1325_v42  ;;  %v1269_v60 = vpack.c.bf16 %v163_v53, %v147_v52  ;;  %v182_v61 = vld [vmem:[%s3433_s1 + $0x518] sm:$0xff]  ;;  %v1271_v63 = vpack.c.bf16 %v196_v56, %v180_v55  ;;  %v179_v0 = vld [vmem:[%s3433_s1 + $0x500] sm:$0xff]  ;;  %v1333_v2 = vpack.c.bf16 %v165_v59, %v149_v58  ;;  %v212_v3 = vld [vmem:[%s3433_s1 + $0x608] sm:$0xff] }
  0x10   :  { %1328 = vmatprep.subr.bf16.mxu1 %v1327_v45  ;;  %v198_v62 = vld [vmem:[%s3433_s1 + $0x598] sm:$0xff]  ;;  %v195_v1 = vld [vmem:[%s3433_s1 + $0x580] sm:$0xff]  ;;  %v228_v4 = vld [vmem:[%s3433_s1 + $0x688] sm:$0xff] }
  0x11   :  { %v1335_v5 = vpack.c.bf16 %v198_v62, %v182_v61  ;;  %v181_v6 = vld [vmem:[%s3433_s1 + $0x510] sm:$0xff]  ;;  %v1273_v8 = vpack.c.bf16 %v195_v1, %v179_v0  ;;  %v214_v9 = vld [vmem:[%s3433_s1 + $0x618] sm:$0xff]  ;;  %v1275_v11 = vpack.c.bf16 %v228_v4, %v212_v3  ;;  %v211_v12 = vld [vmem:[%s3433_s1 + $0x600] sm:$0xff] }
  0x12   :  { %1266 = vmatpush1.bf16.msra.mxu0 %v1265_v48  ;;  %v197_v7 = vld [vmem:[%s3433_s1 + $0x590] sm:$0xff]  ;;  %v230_v10 = vld [vmem:[%s3433_s1 + $0x698] sm:$0xff]  ;;  %v227_v13 = vld [vmem:[%s3433_s1 + $0x680] sm:$0xff] }
  0x13   :  { %1268 = vmatprep.subr.bf16.mxu0 %v1267_v51  ;;  %1330 = vmatpush1.bf16.msra.mxu1 %v1329_v54  ;;  %v1337_v14 = vpack.c.bf16 %v197_v7, %v181_v6  ;;  %v244_v15 = vld [vmem:[%s3433_s1 + $0x708] sm:$0xff]  ;;  %v1339_v17 = vpack.c.bf16 %v230_v10, %v214_v9  ;;  %v213_v18 = vld [vmem:[%s3433_s1 + $0x610] sm:$0xff]  ;;  %v1277_v20 = vpack.c.bf16 %v227_v13, %v211_v12  ;;  %v246_v21 = vld [vmem:[%s3433_s1 + $0x718] sm:$0xff] }
  0x14   :  { %1332 = vmatprep.subr.bf16.mxu1 %v1331_v57  ;;  %v260_v16 = vld [vmem:[%s3433_s1 + $0x788] sm:$0xff]  ;;  %v229_v19 = vld [vmem:[%s3433_s1 + $0x690] sm:$0xff]  ;;  %v262_v22 = vld [vmem:[%s3433_s1 + $0x798] sm:$0xff] }
  0x15   :  { %v1279_v23 = vpack.c.bf16 %v260_v16, %v244_v15  ;;  %v243_v24 = vld [vmem:[%s3433_s1 + $0x700] sm:$0xff]  ;;  %v1341_v26 = vpack.c.bf16 %v229_v19, %v213_v18  ;;  %v276_v27 = vld [vmem:[%s3433_s1 + $0x808] sm:$0xff]  ;;  %v1343_v29 = vpack.c.bf16 %v262_v22, %v246_v21  ;;  %v245_v30 = vld [vmem:[%s3433_s1 + $0x710] sm:$0xff] }
  0x16   :  { %1270 = vmatpush1.bf16.msra.mxu0 %v1269_v60  ;;  %v259_v25 = vld [vmem:[%s3433_s1 + $0x780] sm:$0xff]  ;;  %v292_v28 = vld [vmem:[%s3433_s1 + $0x888] sm:$0xff]  ;;  %v261_v31 = vld [vmem:[%s3433_s1 + $0x790] sm:$0xff] }
  0x17   :  { %1272 = vmatprep.subr.bf16.mxu0 %v1271_v63  ;;  %1334 = vmatpush1.bf16.msra.mxu1 %v1333_v2  ;;  %v1281_v32 = vpack.c.bf16 %v259_v25, %v243_v24  ;;  %v278_v33 = vld [vmem:[%s3433_s1 + $0x818] sm:$0xff]  ;;  %v1283_v35 = vpack.c.bf16 %v292_v28, %v276_v27  ;;  %v275_v36 = vld [vmem:[%s3433_s1 + $0x800] sm:$0xff]  ;;  %v1345_v38 = vpack.c.bf16 %v261_v31, %v245_v30  ;;  %v308_v39 = vld [vmem:[%s3433_s1 + $0x908] sm:$0xff] }
  0x18   :  { %1336 = vmatprep.subr.bf16.mxu1 %v1335_v5  ;;  %v294_v34 = vld [vmem:[%s3433_s1 + $0x898] sm:$0xff]  ;;  %v291_v37 = vld [vmem:[%s3433_s1 + $0x880] sm:$0xff]  ;;  %v324_v40 = vld [vmem:[%s3433_s1 + $0x988] sm:$0xff] }
  0x19   :  { %v1347_v41 = vpack.c.bf16 %v294_v34, %v278_v33  ;;  %v277_v42 = vld [vmem:[%s3433_s1 + $0x810] sm:$0xff]  ;;  %v1285_v44 = vpack.c.bf16 %v291_v37, %v275_v36  ;;  %v310_v45 = vld [vmem:[%s3433_s1 + $0x918] sm:$0xff]  ;;  %v1287_v47 = vpack.c.bf16 %v324_v40, %v308_v39  ;;  %v307_v48 = vld [vmem:[%s3433_s1 + $0x900] sm:$0xff] }
  0x1a   :  { %1274 = vmatpush1.bf16.msra.mxu0 %v1273_v8  ;;  %v293_v43 = vld [vmem:[%s3433_s1 + $0x890] sm:$0xff]  ;;  %v326_v46 = vld [vmem:[%s3433_s1 + $0x998] sm:$0xff]  ;;  %v323_v49 = vld [vmem:[%s3433_s1 + $0x980] sm:$0xff] }
  0x1b   :  { %1276 = vmatprep.subr.bf16.mxu0 %v1275_v11  ;;  %1338 = vmatpush1.bf16.msra.mxu1 %v1337_v14  ;;  %v1349_v50 = vpack.c.bf16 %v293_v43, %v277_v42  ;;  %v340_v51 = vld [vmem:[%s3433_s1 + $0xa08] sm:$0xff]  ;;  %v1351_v53 = vpack.c.bf16 %v326_v46, %v310_v45  ;;  %v309_v54 = vld [vmem:[%s3433_s1 + $0x910] sm:$0xff]  ;;  %v1289_v56 = vpack.c.bf16 %v323_v49, %v307_v48  ;;  %v342_v57 = vld [vmem:[%s3433_s1 + $0xa18] sm:$0xff] }
  0x1c   :  { %1340 = vmatprep.subr.bf16.mxu1 %v1339_v17  ;;  %v356_v52 = vld [vmem:[%s3433_s1 + $0xa88] sm:$0xff]  ;;  %v325_v55 = vld [vmem:[%s3433_s1 + $0x990] sm:$0xff]  ;;  %v358_v58 = vld [vmem:[%s3433_s1 + $0xa98] sm:$0xff] }
  0x1d   :  { %v1291_v59 = vpack.c.bf16 %v356_v52, %v340_v51  ;;  %v339_v60 = vld [vmem:[%s3433_s1 + $0xa00] sm:$0xff]  ;;  %v1353_v62 = vpack.c.bf16 %v325_v55, %v309_v54  ;;  %v372_v63 = vld [vmem:[%s3433_s1 + $0xb08] sm:$0xff]  ;;  %v1355_v1 = vpack.c.bf16 %v358_v58, %v342_v57  ;;  %v341_v2 = vld [vmem:[%s3433_s1 + $0xa10] sm:$0xff] }
  0x1e   :  { %1278 = vmatpush1.bf16.msra.mxu0 %v1277_v20  ;;  %v355_v61 = vld [vmem:[%s3433_s1 + $0xa80] sm:$0xff]  ;;  %v388_v0 = vld [vmem:[%s3433_s1 + $0xb88] sm:$0xff]  ;;  %v357_v3 = vld [vmem:[%s3433_s1 + $0xa90] sm:$0xff] }
  0x1f   :  { %1280 = vmatprep.subr.bf16.mxu0 %v1279_v23  ;;  %1342 = vmatpush1.bf16.msra.mxu1 %v1341_v26  ;;  %v1293_v4 = vpack.c.bf16 %v355_v61, %v339_v60  ;;  %v374_v5 = vld [vmem:[%s3433_s1 + $0xb18] sm:$0xff]  ;;  %v1295_v7 = vpack.c.bf16 %v388_v0, %v372_v63  ;;  %v371_v8 = vld [vmem:[%s3433_s1 + $0xb00] sm:$0xff]  ;;  %v2081_v10 = vld [vmem:[%s3434_s0 + $0x8] sm:$0xff]  ;;  %v1357_v11 = vpack.c.bf16 %v357_v3, %v341_v2 }
  0x20   :  { %1344 = vmatprep.subr.bf16.mxu1 %v1343_v29  ;;  %v390_v6 = vld [vmem:[%s3433_s1 + $0xb98] sm:$0xff]  ;;  %v387_v9 = vld [vmem:[%s3433_s1 + $0xb80] sm:$0xff]  ;;  %v404_v12 = vld [vmem:[%s3433_s1 + $0xc08] sm:$0xff]  ;;  %595 = vmatprep.mubr.f32.mxu0 %v2081_v10 }
  0x21   :  { %v420_v13 = vld [vmem:[%s3433_s1 + $0xc88] sm:$0xff]  ;;  %v1359_v14 = vpack.c.bf16 %v390_v6, %v374_v5  ;;  %v373_v15 = vld [vmem:[%s3433_s1 + $0xb10] sm:$0xff]  ;;  %666 = vmatprep.mubr.f32.mxu1 %v2081_v10  ;;  %v1297_v17 = vpack.c.bf16 %v387_v9, %v371_v8  ;;  %v406_v18 = vld [vmem:[%s3433_s1 + $0xc18] sm:$0xff] }
  0x22   :  { %1282 = vmatpush1.bf16.msra.mxu0 %v1281_v32  ;;  %v389_v16 = vld [vmem:[%s3433_s1 + $0xb90] sm:$0xff]  ;;  %v422_v19 = vld [vmem:[%s3433_s1 + $0xc98] sm:$0xff]  ;;  %v1299_v20 = vpack.c.bf16 %v420_v13, %v404_v12  ;;  %v403_v21 = vld [vmem:[%s3433_s1 + $0xc00] sm:$0xff] }
  0x23   :  { %1284 = vmatprep.subr.bf16.mxu0 %v1283_v35  ;;  %1346 = vmatpush1.bf16.msra.mxu1 %v1345_v38  ;;  %v419_v22 = vld [vmem:[%s3433_s1 + $0xc80] sm:$0xff]  ;;  %v1361_v23 = vpack.c.bf16 %v389_v16, %v373_v15  ;;  %v436_v24 = vld [vmem:[%s3433_s1 + $0xd08] sm:$0xff]  ;;  %v1363_v26 = vpack.c.bf16 %v422_v19, %v406_v18  ;;  %v405_v27 = vld [vmem:[%s3433_s1 + $0xc10] sm:$0xff] }
  0x24   :  { %1348 = vmatprep.subr.bf16.mxu1 %v1347_v41  ;;  %v452_v25 = vld [vmem:[%s3433_s1 + $0xd88] sm:$0xff]  ;;  %v421_v28 = vld [vmem:[%s3433_s1 + $0xc90] sm:$0xff]  ;;  %v1301_v29 = vpack.c.bf16 %v419_v22, %v403_v21  ;;  %v438_v30 = vld [vmem:[%s3433_s1 + $0xd18] sm:$0xff] }
  0x25   :  { %v454_v31 = vld [vmem:[%s3433_s1 + $0xd98] sm:$0xff]  ;;  %v1303_v32 = vpack.c.bf16 %v452_v25, %v436_v24  ;;  %v435_v33 = vld [vmem:[%s3433_s1 + $0xd00] sm:$0xff]  ;;  %v1365_v35 = vpack.c.bf16 %v421_v28, %v405_v27  ;;  %v468_v36 = vld [vmem:[%s3433_s1 + $0xe08] sm:$0xff] }
  0x26   :  { %1286 = vmatpush1.bf16.msra.mxu0 %v1285_v44  ;;  %v451_v34 = vld [vmem:[%s3433_s1 + $0xd80] sm:$0xff]  ;;  %v484_v37 = vld [vmem:[%s3433_s1 + $0xe88] sm:$0xff]  ;;  %v1367_v38 = vpack.c.bf16 %v454_v31, %v438_v30  ;;  %v437_v39 = vld [vmem:[%s3433_s1 + $0xd10] sm:$0xff] }
  0x27   :  { %1288 = vmatprep.subr.bf16.mxu0 %v1287_v47  ;;  %1350 = vmatpush1.bf16.msra.mxu1 %v1349_v50  ;;  %v453_v40 = vld [vmem:[%s3433_s1 + $0xd90] sm:$0xff]  ;;  %v1305_v41 = vpack.c.bf16 %v451_v34, %v435_v33  ;;  %v470_v42 = vld [vmem:[%s3433_s1 + $0xe18] sm:$0xff]  ;;  %v1307_v44 = vpack.c.bf16 %v484_v37, %v468_v36  ;;  %v467_v45 = vld [vmem:[%s3433_s1 + $0xe00] sm:$0xff] }
  0x28   :  { %1352 = vmatprep.subr.bf16.mxu1 %v1351_v53  ;;  %v486_v43 = vld [vmem:[%s3433_s1 + $0xe98] sm:$0xff]  ;;  %v483_v46 = vld [vmem:[%s3433_s1 + $0xe80] sm:$0xff]  ;;  %v1369_v47 = vpack.c.bf16 %v453_v40, %v437_v39  ;;  %v500_v48 = vld [vmem:[%s3433_s1 + $0xf08] sm:$0xff] }
  0x29   :  { %v516_v49 = vld [vmem:[%s3433_s1 + $0xf88] sm:$0xff]  ;;  %v1371_v50 = vpack.c.bf16 %v486_v43, %v470_v42  ;;  %v469_v51 = vld [vmem:[%s3433_s1 + $0xe10] sm:$0xff]  ;;  %v1309_v53 = vpack.c.bf16 %v483_v46, %v467_v45  ;;  %v502_v54 = vld [vmem:[%s3433_s1 + $0xf18] sm:$0xff] }
  0x2a   :  { %1290 = vmatpush1.bf16.msra.mxu0 %v1289_v56  ;;  %v485_v52 = vld [vmem:[%s3433_s1 + $0xe90] sm:$0xff]  ;;  %v518_v55 = vld [vmem:[%s3433_s1 + $0xf98] sm:$0xff]  ;;  %v1311_v56 = vpack.c.bf16 %v516_v49, %v500_v48  ;;  %v499_v57 = vld [vmem:[%s3433_s1 + $0xf00] sm:$0xff] }
  0x2b   :  { %1292 = vmatprep.subr.bf16.mxu0 %v1291_v59  ;;  %1354 = vmatpush1.bf16.msra.mxu1 %v1353_v62  ;;  %v515_v58 = vld [vmem:[%s3433_s1 + $0xf80] sm:$0xff]  ;;  %v1373_v59 = vpack.c.bf16 %v485_v52, %v469_v51  ;;  %v24_v60 = vld [vmem:[%s3433_s1 + $0x28] sm:$0xff]  ;;  %v1375_v62 = vpack.c.bf16 %v518_v55, %v502_v54  ;;  %v501_v63 = vld [vmem:[%s3433_s1 + $0xf10] sm:$0xff] }
  0x2c   :  { %1356 = vmatprep.subr.bf16.mxu1 %v1355_v1  ;;  %v40_v61 = vld [vmem:[%s3433_s1 + $0xa8] sm:$0xff]  ;;  %v517_v0 = vld [vmem:[%s3433_s1 + $0xf90] sm:$0xff]  ;;  %v1313_v1 = vpack.c.bf16 %v515_v58, %v499_v57  ;;  %v26_v2 = vld [vmem:[%s3433_s1 + $0x38] sm:$0xff] }
  0x2d   :  { %v42_v3 = vld [vmem:[%s3433_s1 + $0xb8] sm:$0xff]  ;;  %v23_v5 = vld [vmem:[%s3433_s1 + $0x20] sm:$0xff]  ;;  %v56_v8 = vld [vmem:[%s3433_s1 + $0x128] sm:$0xff] }
  0x2e   :  { %1294 = vmatpush1.bf16.msra.mxu0 %v1293_v4  ;;  %v1379_v4 = vpack.c.bf16 %v40_v61, %v24_v60  ;;  %v39_v6 = vld [vmem:[%s3433_s1 + $0xa0] sm:$0xff]  ;;  %v72_v9 = vld [vmem:[%s3433_s1 + $0x1a8] sm:$0xff]  ;;  %v25_v12 = vld [vmem:[%s3433_s1 + $0x30] sm:$0xff] }
  0x2f   :  { %1296 = vmatprep.subr.bf16.mxu0 %v1295_v7  ;;  %1358 = vmatpush1.bf16.msra.mxu1 %v1357_v11  ;;  %v1377_v7 = vpack.c.bf16 %v517_v0, %v501_v63  ;;  %v1443_v11 = vpack.c.bf16 %v42_v3, %v26_v2  ;;  %v41_v13 = vld [vmem:[%s3433_s1 + $0xb0] sm:$0xff]  ;;  %v1381_v15 = vpack.c.bf16 %v39_v6, %v23_v5  ;;  %v58_v16 = vld [vmem:[%s3433_s1 + $0x138] sm:$0xff]  ;;  %v55_v19 = vld [vmem:[%s3433_s1 + $0x120] sm:$0xff] }
  0x30   :  { %1360 = vmatprep.subr.bf16.mxu1 %v1359_v14  ;;  %v2220_v14 = vld [vmem:[%s3434_s0] sm:$0xff]  ;;  %v1383_v18 = vpack.c.bf16 %v72_v9, %v56_v8  ;;  %v1445_v21 = vpack.c.bf16 %v41_v13, %v25_v12  ;;  %v88_v22 = vld [vmem:[%s3433_s1 + $0x228] sm:$0xff]  ;;  %v57_v25 = vld [vmem:[%s3433_s1 + $0x130] sm:$0xff] }
  0x31   :  { %v90_v28 = vld [vmem:[%s3433_s1 + $0x238] sm:$0xff]  ;;  %v87_v31 = vld [vmem:[%s3433_s1 + $0x220] sm:$0xff]  ;;  %v120_v34 = vld [vmem:[%s3433_s1 + $0x328] sm:$0xff] }
  0x32   :  { %1298 = vmatpush1.bf16.msra.mxu0 %v1297_v17  ;;  %v74_v17 = vld [vmem:[%s3433_s1 + $0x1b8] sm:$0xff]  ;;  %v89_v37 = vld [vmem:[%s3433_s1 + $0x230] sm:$0xff]  ;;  %v119_v43 = vld [vmem:[%s3433_s1 + $0x320] sm:$0xff] }
  0x33   :  { %1300 = vmatprep.subr.bf16.mxu0 %v1299_v20  ;;  %1362 = vmatpush1.bf16.msra.mxu1 %v1361_v23  ;;  %v71_v20 = vld [vmem:[%s3433_s1 + $0x1a0] sm:$0xff]  ;;  %v104_v23 = vld [vmem:[%s3433_s1 + $0x2a8] sm:$0xff]  ;;  %v1447_v24 = vpack.c.bf16 %v74_v17, %v58_v16  ;;  %v122_v40 = vld [vmem:[%s3433_s1 + $0x338] sm:$0xff] }
  0x34   :  { %1364 = vmatprep.subr.bf16.mxu1 %v1363_v26  ;;  %v73_v26 = vld [vmem:[%s3433_s1 + $0x1b0] sm:$0xff]  ;;  %v1385_v27 = vpack.c.bf16 %v71_v20, %v55_v19  ;;  %v1387_v30 = vpack.c.bf16 %v104_v23, %v88_v22  ;;  %v152_v46 = vld [vmem:[%s3433_s1 + $0x428] sm:$0xff]  ;;  %v154_v52 = vld [vmem:[%s3433_s1 + $0x438] sm:$0xff] }
  0x35   :  { %v1449_v33 = vpack.c.bf16 %v73_v26, %v57_v25  ;;  %v121_v49 = vld [vmem:[%s3433_s1 + $0x330] sm:$0xff]  ;;  %v151_v55 = vld [vmem:[%s3433_s1 + $0x420] sm:$0xff]  ;;  %v184_v58 = vld [vmem:[%s3433_s1 + $0x528] sm:$0xff] }
  0x36   :  { %1302 = vmatpush1.bf16.msra.mxu0 %v1301_v29  ;;  %v106_v29 = vld [vmem:[%s3433_s1 + $0x2b8] sm:$0xff]  ;;  %v153_v61 = vld [vmem:[%s3433_s1 + $0x430] sm:$0xff]  ;;  %v183_v3 = vld [vmem:[%s3433_s1 + $0x520] sm:$0xff] }
  0x37   :  { %1304 = vmatprep.subr.bf16.mxu0 %v1303_v32  ;;  %1366 = vmatpush1.bf16.msra.mxu1 %v1365_v35  ;;  %v103_v32 = vld [vmem:[%s3433_s1 + $0x2a0] sm:$0xff]  ;;  %v136_v35 = vld [vmem:[%s3433_s1 + $0x3a8] sm:$0xff]  ;;  %v1451_v36 = vpack.c.bf16 %v106_v29, %v90_v28  ;;  %v186_v0 = vld [vmem:[%s3433_s1 + $0x538] sm:$0xff] }
  0x38   :  { %1368 = vmatprep.subr.bf16.mxu1 %v1367_v38  ;;  %v105_v38 = vld [vmem:[%s3433_s1 + $0x2b0] sm:$0xff]  ;;  %v1389_v39 = vpack.c.bf16 %v103_v32, %v87_v31  ;;  %v1391_v42 = vpack.c.bf16 %v136_v35, %v120_v34  ;;  %v216_v6 = vld [vmem:[%s3433_s1 + $0x628] sm:$0xff]  ;;  %v218_v13 = vld [vmem:[%s3433_s1 + $0x638] sm:$0xff] }
  0x39   :  { %v1453_v45 = vpack.c.bf16 %v105_v38, %v89_v37  ;;  %v185_v9 = vld [vmem:[%s3433_s1 + $0x530] sm:$0xff]  ;;  %v215_v17 = vld [vmem:[%s3433_s1 + $0x620] sm:$0xff]  ;;  %v248_v20 = vld [vmem:[%s3433_s1 + $0x728] sm:$0xff] }
  0x3a   :  { %1306 = vmatpush1.bf16.msra.mxu0 %v1305_v41  ;;  %v138_v41 = vld [vmem:[%s3433_s1 + $0x3b8] sm:$0xff]  ;;  %v217_v23 = vld [vmem:[%s3433_s1 + $0x630] sm:$0xff]  ;;  %v247_v29 = vld [vmem:[%s3433_s1 + $0x720] sm:$0xff] }
  0x3b   :  { %1308 = vmatprep.subr.bf16.mxu0 %v1307_v44  ;;  %1370 = vmatpush1.bf16.msra.mxu1 %v1369_v47  ;;  %v135_v44 = vld [vmem:[%s3433_s1 + $0x3a0] sm:$0xff]  ;;  %v168_v47 = vld [vmem:[%s3433_s1 + $0x4a8] sm:$0xff]  ;;  %v1455_v48 = vpack.c.bf16 %v138_v41, %v122_v40  ;;  %v250_v26 = vld [vmem:[%s3433_s1 + $0x738] sm:$0xff] }
  0x3c   :  { %1372 = vmatprep.subr.bf16.mxu1 %v1371_v50  ;;  %v137_v50 = vld [vmem:[%s3433_s1 + $0x3b0] sm:$0xff]  ;;  %v1393_v51 = vpack.c.bf16 %v135_v44, %v119_v43  ;;  %v1395_v54 = vpack.c.bf16 %v168_v47, %v152_v46  ;;  %v280_v32 = vld [vmem:[%s3433_s1 + $0x828] sm:$0xff]  ;;  %v282_v38 = vld [vmem:[%s3433_s1 + $0x838] sm:$0xff] }
  0x3d   :  { %v1457_v57 = vpack.c.bf16 %v137_v50, %v121_v49  ;;  %v249_v35 = vld [vmem:[%s3433_s1 + $0x730] sm:$0xff]  ;;  %v279_v41 = vld [vmem:[%s3433_s1 + $0x820] sm:$0xff]  ;;  %v312_v44 = vld [vmem:[%s3433_s1 + $0x928] sm:$0xff] }
  0x3e   :  { %1310 = vmatpush1.bf16.msra.mxu0 %v1309_v53  ;;  %v170_v53 = vld [vmem:[%s3433_s1 + $0x4b8] sm:$0xff]  ;;  %v281_v47 = vld [vmem:[%s3433_s1 + $0x830] sm:$0xff] }
  0x3f   :  { %1312 = vmatprep.subr.bf16.mxu0 %v1311_v56  ;;  %1374 = vmatpush1.bf16.msra.mxu1 %v1373_v59  ;;  %v167_v56 = vld [vmem:[%s3433_s1 + $0x4a0] sm:$0xff]  ;;  %v200_v59 = vld [vmem:[%s3433_s1 + $0x5a8] sm:$0xff]  ;;  %v1459_v60 = vpack.c.bf16 %v170_v53, %v154_v52  ;;  %v314_v50 = vld [vmem:[%s3433_s1 + $0x938] sm:$0xff] }
  0x40   :  { %1376 = vmatprep.subr.bf16.mxu1 %v1375_v62  ;;  %v169_v62 = vld [vmem:[%s3433_s1 + $0x4b0] sm:$0xff]  ;;  %v1397_v63 = vpack.c.bf16 %v167_v56, %v151_v55  ;;  %v1399_v2 = vpack.c.bf16 %v200_v59, %v184_v58  ;;  %v311_v53 = vld [vmem:[%s3433_s1 + $0x920] sm:$0xff]  ;;  %v344_v56 = vld [vmem:[%s3433_s1 + $0xa28] sm:$0xff] }
  0x41   :  { %v1461_v5 = vpack.c.bf16 %v169_v62, %v153_v61  ;;  %v313_v59 = vld [vmem:[%s3433_s1 + $0x930] sm:$0xff]  ;;  %v346_v62 = vld [vmem:[%s3433_s1 + $0xa38] sm:$0xff] }
  0x42   :  { %1314 = vmatpush1.bf16.msra.mxu0 %v1313_v1  ;;  %v202_v1 = vld [vmem:[%s3433_s1 + $0x5b8] sm:$0xff] }
  0x43   :  { %1380 = vmatprep.subr.bf16.mxu0 %v1379_v4  ;;  %1378 = vmatpush1.bf16.msra.mxu1 %v1377_v7  ;;  %v199_v4 = vld [vmem:[%s3433_s1 + $0x5a0] sm:$0xff]  ;;  %v232_v7 = vld [vmem:[%s3433_s1 + $0x6a8] sm:$0xff]  ;;  %v1463_v8 = vpack.c.bf16 %v202_v1, %v186_v0 }
  0x44   :  { %1444 = vmatprep.subr.bf16.mxu1 %v1443_v11  ;;  %v201_v11 = vld [vmem:[%s3433_s1 + $0x5b0] sm:$0xff]  ;;  %v1401_v12 = vpack.c.bf16 %v199_v4, %v183_v3  ;;  %v1403_v16 = vpack.c.bf16 %v232_v7, %v216_v6  ;;  %v343_v1 = vld [vmem:[%s3433_s1 + $0xa20] sm:$0xff]  ;;  %v376_v4 = vld [vmem:[%s3433_s1 + $0xb28] sm:$0xff] }
  0x45   :  { %596 = vmatmul.mubr.f32.vlgmr.msra.gmra.mrb[0].mxu0 %v2220_v14  ;;  %v1465_v19 = vpack.c.bf16 %v201_v11, %v185_v9  ;;  %v345_v7 = vld [vmem:[%s3433_s1 + $0xa30] sm:$0xff]  ;;  %v378_v11 = vld [vmem:[%s3433_s1 + $0xb38] sm:$0xff] }
  0x46   :  { %1382 = vmatpush1.bf16.msra.mxu0 %v1381_v15  ;;  %737 = vmatprep.mubr.f32.mxu0 %v2081_v10  ;;  %v234_v15 = vld [vmem:[%s3433_s1 + $0x6b8] sm:$0xff] }
  0x47   :  { %667 = vmatmul.mubr.f32.vlgmr.msra.gmra.mrb[0].mxu1 %v2220_v14  ;;  %1384 = vmatprep.subr.bf16.mxu0 %v1383_v18  ;;  %v231_v18 = vld [vmem:[%s3433_s1 + $0x6a0] sm:$0xff]  ;;  %v1467_v22 = vpack.c.bf16 %v234_v15, %v218_v13 }
  0x48   :  { %1446 = vmatpush1.bf16.msra.mxu1 %v1445_v21  ;;  %808 = vmatprep.mubr.f32.mxu1 %v2081_v10  ;;  %v264_v21 = vld [vmem:[%s3433_s1 + $0x7a8] sm:$0xff]  ;;  %v1405_v25 = vpack.c.bf16 %v231_v18, %v215_v17  ;;  %v375_v15 = vld [vmem:[%s3433_s1 + $0xb20] sm:$0xff] }
  0x49   :  { %1448 = vmatprep.subr.bf16.mxu1 %v1447_v24  ;;  %v233_v24 = vld [vmem:[%s3433_s1 + $0x6b0] sm:$0xff]  ;;  %v1407_v28 = vpack.c.bf16 %v264_v21, %v248_v20  ;;  %v408_v18 = vld [vmem:[%s3433_s1 + $0xc28] sm:$0xff] }
  0x4a   :  { %1386 = vmatpush1.bf16.msra.mxu0 %v1385_v27  ;;  %v266_v27 = vld [vmem:[%s3433_s1 + $0x7b8] sm:$0xff]  ;;  %v1469_v31 = vpack.c.bf16 %v233_v24, %v217_v23  ;;  %v377_v21 = vld [vmem:[%s3433_s1 + $0xb30] sm:$0xff] }
  0x4b   :  { %1388 = vmatprep.subr.bf16.mxu0 %v1387_v30  ;;  %v263_v30 = vld [vmem:[%s3433_s1 + $0x7a0] sm:$0xff]  ;;  %v1471_v34 = vpack.c.bf16 %v266_v27, %v250_v26  ;;  %v410_v24 = vld [vmem:[%s3433_s1 + $0xc38] sm:$0xff] }
  0x4c   :  { %1450 = vmatpush1.bf16.msra.mxu1 %v1449_v33  ;;  %v296_v33 = vld [vmem:[%s3433_s1 + $0x8a8] sm:$0xff]  ;;  %v1409_v37 = vpack.c.bf16 %v263_v30, %v247_v29  ;;  %v407_v27 = vld [vmem:[%s3433_s1 + $0xc20] sm:$0xff] }
  0x4d   :  { %1452 = vmatprep.subr.bf16.mxu1 %v1451_v36  ;;  %v265_v36 = vld [vmem:[%s3433_s1 + $0x7b0] sm:$0xff]  ;;  %v1411_v40 = vpack.c.bf16 %v296_v33, %v280_v32  ;;  %v440_v30 = vld [vmem:[%s3433_s1 + $0xd28] sm:$0xff] }
  0x4e   :  { %1390 = vmatpush1.bf16.msra.mxu0 %v1389_v39  ;;  %v298_v39 = vld [vmem:[%s3433_s1 + $0x8b8] sm:$0xff]  ;;  %v1473_v43 = vpack.c.bf16 %v265_v36, %v249_v35  ;;  %v409_v33 = vld [vmem:[%s3433_s1 + $0xc30] sm:$0xff] }
  0x4f   :  { %1392 = vmatprep.subr.bf16.mxu0 %v1391_v42  ;;  %v295_v42 = vld [vmem:[%s3433_s1 + $0x8a0] sm:$0xff]  ;;  %v1475_v46 = vpack.c.bf16 %v298_v39, %v282_v38  ;;  %v442_v36 = vld [vmem:[%s3433_s1 + $0xd38] sm:$0xff] }
  0x50   :  { %1454 = vmatpush1.bf16.msra.mxu1 %v1453_v45  ;;  %v328_v45 = vld [vmem:[%s3433_s1 + $0x9a8] sm:$0xff]  ;;  %v1413_v49 = vpack.c.bf16 %v295_v42, %v279_v41  ;;  %v439_v39 = vld [vmem:[%s3433_s1 + $0xd20] sm:$0xff] }
  0x51   :  { %1456 = vmatprep.subr.bf16.mxu1 %v1455_v48  ;;  %v297_v48 = vld [vmem:[%s3433_s1 + $0x8b0] sm:$0xff]  ;;  %v1415_v52 = vpack.c.bf16 %v328_v45, %v312_v44  ;;  %v472_v42 = vld [vmem:[%s3433_s1 + $0xe28] sm:$0xff] }
  0x52   :  { %1394 = vmatpush1.bf16.msra.mxu0 %v1393_v51  ;;  %v330_v51 = vld [vmem:[%s3433_s1 + $0x9b8] sm:$0xff]  ;;  %v1477_v55 = vpack.c.bf16 %v297_v48, %v281_v47  ;;  %v441_v45 = vld [vmem:[%s3433_s1 + $0xd30] sm:$0xff] }
  0x53   :  { %1396 = vmatprep.subr.bf16.mxu0 %v1395_v54  ;;  %v327_v54 = vld [vmem:[%s3433_s1 + $0x9a0] sm:$0xff]  ;;  %v1479_v58 = vpack.c.bf16 %v330_v51, %v314_v50  ;;  %v474_v48 = vld [vmem:[%s3433_s1 + $0xe38] sm:$0xff] }
  0x54   :  { %1458 = vmatpush1.bf16.msra.mxu1 %v1457_v57  ;;  %v360_v57 = vld [vmem:[%s3433_s1 + $0xaa8] sm:$0xff]  ;;  %v1417_v61 = vpack.c.bf16 %v327_v54, %v311_v53  ;;  %v471_v51 = vld [vmem:[%s3433_s1 + $0xe20] sm:$0xff] }
  0x55   :  { %1460 = vmatprep.subr.bf16.mxu1 %v1459_v60  ;;  %v329_v60 = vld [vmem:[%s3433_s1 + $0x9b0] sm:$0xff]  ;;  %v1419_v0 = vpack.c.bf16 %v360_v57, %v344_v56  ;;  %v504_v54 = vld [vmem:[%s3433_s1 + $0xf28] sm:$0xff] }
  0x56   :  { %1398 = vmatpush1.bf16.msra.mxu0 %v1397_v63  ;;  %v362_v63 = vld [vmem:[%s3433_s1 + $0xab8] sm:$0xff]  ;;  %v1481_v3 = vpack.c.bf16 %v329_v60, %v313_v59  ;;  %v473_v57 = vld [vmem:[%s3433_s1 + $0xe30] sm:$0xff] }
  0x57   :  { %1400 = vmatprep.subr.bf16.mxu0 %v1399_v2  ;;  %v359_v2 = vld [vmem:[%s3433_s1 + $0xaa0] sm:$0xff]  ;;  %v1483_v6 = vpack.c.bf16 %v362_v63, %v346_v62  ;;  %v506_v60 = vld [vmem:[%s3433_s1 + $0xf38] sm:$0xff] }
  0x58   :  { %1462 = vmatpush1.bf16.msra.mxu1 %v1461_v5  ;;  %v392_v5 = vld [vmem:[%s3433_s1 + $0xba8] sm:$0xff]  ;;  %v1421_v9 = vpack.c.bf16 %v359_v2, %v343_v1  ;;  %v503_v63 = vld [vmem:[%s3433_s1 + $0xf20] sm:$0xff] }
  0x59   :  { %1464 = vmatprep.subr.bf16.mxu1 %v1463_v8  ;;  %v361_v8 = vld [vmem:[%s3433_s1 + $0xab0] sm:$0xff]  ;;  %v1423_v13 = vpack.c.bf16 %v392_v5, %v376_v4  ;;  %v28_v2 = vld [vmem:[%s3433_s1 + $0x48] sm:$0xff] }
  0x5a   :  { %1402 = vmatpush1.bf16.msra.mxu0 %v1401_v12  ;;  %v394_v12 = vld [vmem:[%s3433_s1 + $0xbb8] sm:$0xff]  ;;  %v1485_v17 = vpack.c.bf16 %v361_v8, %v345_v7  ;;  %v505_v5 = vld [vmem:[%s3433_s1 + $0xf30] sm:$0xff] }
  0x5b   :  { %1404 = vmatprep.subr.bf16.mxu0 %v1403_v16  ;;  %v391_v16 = vld [vmem:[%s3433_s1 + $0xba0] sm:$0xff]  ;;  %v1487_v20 = vpack.c.bf16 %v394_v12, %v378_v11  ;;  %v30_v8 = vld [vmem:[%s3433_s1 + $0x58] sm:$0xff] }
  0x5c   :  { %1466 = vmatpush1.bf16.msra.mxu1 %v1465_v19  ;;  %v424_v19 = vld [vmem:[%s3433_s1 + $0xca8] sm:$0xff]  ;;  %v1425_v23 = vpack.c.bf16 %v391_v16, %v375_v15  ;;  %v27_v12 = vld [vmem:[%s3433_s1 + $0x40] sm:$0xff] }
  0x5d   :  { %1468 = vmatprep.subr.bf16.mxu1 %v1467_v22  ;;  %v393_v22 = vld [vmem:[%s3433_s1 + $0xbb0] sm:$0xff]  ;;  %v1427_v26 = vpack.c.bf16 %v424_v19, %v408_v18  ;;  %v60_v16 = vld [vmem:[%s3433_s1 + $0x148] sm:$0xff] }
  0x5e   :  { %1406 = vmatpush1.bf16.msra.mxu0 %v1405_v25  ;;  %v426_v25 = vld [vmem:[%s3433_s1 + $0xcb8] sm:$0xff]  ;;  %v1489_v29 = vpack.c.bf16 %v393_v22, %v377_v21  ;;  %v29_v19 = vld [vmem:[%s3433_s1 + $0x50] sm:$0xff] }
  0x5f   :  { %1408 = vmatprep.subr.bf16.mxu0 %v1407_v28  ;;  %v423_v28 = vld [vmem:[%s3433_s1 + $0xca0] sm:$0xff]  ;;  %v1491_v32 = vpack.c.bf16 %v426_v25, %v410_v24  ;;  %v62_v22 = vld [vmem:[%s3433_s1 + $0x158] sm:$0xff] }
  0x60   :  { %1470 = vmatpush1.bf16.msra.mxu1 %v1469_v31  ;;  %v456_v31 = vld [vmem:[%s3433_s1 + $0xda8] sm:$0xff]  ;;  %v1429_v35 = vpack.c.bf16 %v423_v28, %v407_v27  ;;  %v59_v25 = vld [vmem:[%s3433_s1 + $0x140] sm:$0xff] }
  0x61   :  { %1472 = vmatprep.subr.bf16.mxu1 %v1471_v34  ;;  %v425_v34 = vld [vmem:[%s3433_s1 + $0xcb0] sm:$0xff]  ;;  %v1431_v38 = vpack.c.bf16 %v456_v31, %v440_v30  ;;  %v92_v28 = vld [vmem:[%s3433_s1 + $0x248] sm:$0xff] }
  0x62   :  { %1410 = vmatpush1.bf16.msra.mxu0 %v1409_v37  ;;  %v458_v37 = vld [vmem:[%s3433_s1 + $0xdb8] sm:$0xff]  ;;  %v1493_v41 = vpack.c.bf16 %v425_v34, %v409_v33  ;;  %v61_v31 = vld [vmem:[%s3433_s1 + $0x150] sm:$0xff] }
  0x63   :  { %1412 = vmatprep.subr.bf16.mxu0 %v1411_v40  ;;  %v455_v40 = vld [vmem:[%s3433_s1 + $0xda0] sm:$0xff]  ;;  %v1495_v44 = vpack.c.bf16 %v458_v37, %v442_v36  ;;  %v94_v34 = vld [vmem:[%s3433_s1 + $0x258] sm:$0xff] }
  0x64   :  { %1474 = vmatpush1.bf16.msra.mxu1 %v1473_v43  ;;  %v488_v43 = vld [vmem:[%s3433_s1 + $0xea8] sm:$0xff]  ;;  %v1433_v47 = vpack.c.bf16 %v455_v40, %v439_v39  ;;  %v91_v37 = vld [vmem:[%s3433_s1 + $0x240] sm:$0xff] }
  0x65   :  { %1476 = vmatprep.subr.bf16.mxu1 %v1475_v46  ;;  %v457_v46 = vld [vmem:[%s3433_s1 + $0xdb0] sm:$0xff]  ;;  %v1435_v50 = vpack.c.bf16 %v488_v43, %v472_v42  ;;  %v124_v40 = vld [vmem:[%s3433_s1 + $0x348] sm:$0xff] }
  0x66   :  { %1414 = vmatpush1.bf16.msra.mxu0 %v1413_v49  ;;  %v490_v49 = vld [vmem:[%s3433_s1 + $0xeb8] sm:$0xff]  ;;  %v1497_v53 = vpack.c.bf16 %v457_v46, %v441_v45  ;;  %v93_v42 = vld [vmem:[%s3433_s1 + $0x250] sm:$0xff] }
  0x67   :  { %1416 = vmatprep.subr.bf16.mxu0 %v1415_v52  ;;  %v487_v52 = vld [vmem:[%s3433_s1 + $0xea0] sm:$0xff]  ;;  %v1499_v56 = vpack.c.bf16 %v490_v49, %v474_v48  ;;  %v109_v43 = vld [vmem:[%s3433_s1 + $0x2d0] sm:$0xff]  ;;  %v126_v45 = vld [vmem:[%s3433_s1 + $0x358] sm:$0xff] }
  0x68   :  { %1478 = vmatpush1.bf16.msra.mxu1 %v1477_v55  ;;  %v520_v55 = vld [vmem:[%s3433_s1 + $0xfa8] sm:$0xff]  ;;  %v1437_v59 = vpack.c.bf16 %v487_v52, %v471_v51  ;;  %v139_v48 = vld [vmem:[%s3433_s1 + $0x3c0] sm:$0xff]  ;;  %v1581_v49 = vpack.c.bf16 %v109_v43, %v93_v42  ;;  %v302_v42 = vld [vmem:[%s3433_s1 + $0x8d8] sm:$0xff] }
  0x69   :  { %1480 = vmatprep.subr.bf16.mxu1 %v1479_v58  ;;  %v489_v58 = vld [vmem:[%s3433_s1 + $0xeb0] sm:$0xff]  ;;  %v1439_v62 = vpack.c.bf16 %v520_v55, %v504_v54  ;;  %v172_v51 = vld [vmem:[%s3433_s1 + $0x4c8] sm:$0xff] }
  0x6a   :  { %1418 = vmatpush1.bf16.msra.mxu0 %v1417_v61  ;;  %v522_v61 = vld [vmem:[%s3433_s1 + $0xfb8] sm:$0xff]  ;;  %v1501_v1 = vpack.c.bf16 %v489_v58, %v473_v57  ;;  %v141_v54 = vld [vmem:[%s3433_s1 + $0x3d0] sm:$0xff] }
  0x6b   :  { %1420 = vmatprep.subr.bf16.mxu0 %v1419_v0  ;;  %v519_v0 = vld [vmem:[%s3433_s1 + $0xfa0] sm:$0xff]  ;;  %v1503_v4 = vpack.c.bf16 %v522_v61, %v506_v60  ;;  %v174_v57 = vld [vmem:[%s3433_s1 + $0x4d8] sm:$0xff] }
  0x6c   :  { %1482 = vmatpush1.bf16.msra.mxu1 %v1481_v3  ;;  %v44_v3 = vld [vmem:[%s3433_s1 + $0xc8] sm:$0xff]  ;;  %v1441_v7 = vpack.c.bf16 %v519_v0, %v503_v63  ;;  %v171_v60 = vld [vmem:[%s3433_s1 + $0x4c0] sm:$0xff] }
  0x6d   :  { %1484 = vmatprep.subr.bf16.mxu1 %v1483_v6  ;;  %v521_v6 = vld [vmem:[%s3433_s1 + $0xfb0] sm:$0xff]  ;;  %v1507_v11 = vpack.c.bf16 %v44_v3, %v28_v2  ;;  %v204_v63 = vld [vmem:[%s3433_s1 + $0x5c8] sm:$0xff] }
  0x6e   :  { %1422 = vmatpush1.bf16.msra.mxu0 %v1421_v9  ;;  %v46_v9 = vld [vmem:[%s3433_s1 + $0xd8] sm:$0xff]  ;;  %v1505_v15 = vpack.c.bf16 %v521_v6, %v505_v5  ;;  %v173_v2 = vld [vmem:[%s3433_s1 + $0x4d0] sm:$0xff] }
  0x6f   :  { %1424 = vmatprep.subr.bf16.mxu0 %v1423_v13  ;;  %v43_v13 = vld [vmem:[%s3433_s1 + $0xc0] sm:$0xff]  ;;  %v1571_v18 = vpack.c.bf16 %v46_v9, %v30_v8  ;;  %v206_v5 = vld [vmem:[%s3433_s1 + $0x5d8] sm:$0xff] }
  0x70   :  { %1486 = vmatpush1.bf16.msra.mxu1 %v1485_v17  ;;  %v76_v17 = vld [vmem:[%s3433_s1 + $0x1c8] sm:$0xff]  ;;  %v1509_v21 = vpack.c.bf16 %v43_v13, %v27_v12  ;;  %v203_v8 = vld [vmem:[%s3433_s1 + $0x5c0] sm:$0xff] }
  0x71   :  { %1488 = vmatprep.subr.bf16.mxu1 %v1487_v20  ;;  %v45_v20 = vld [vmem:[%s3433_s1 + $0xd0] sm:$0xff]  ;;  %v1511_v24 = vpack.c.bf16 %v76_v17, %v60_v16  ;;  %v236_v12 = vld [vmem:[%s3433_s1 + $0x6c8] sm:$0xff] }
  0x72   :  { %1426 = vmatpush1.bf16.msra.mxu0 %v1425_v23  ;;  %v78_v23 = vld [vmem:[%s3433_s1 + $0x1d8] sm:$0xff]  ;;  %v1573_v27 = vpack.c.bf16 %v45_v20, %v29_v19  ;;  %v205_v16 = vld [vmem:[%s3433_s1 + $0x5d0] sm:$0xff] }
  0x73   :  { %1428 = vmatprep.subr.bf16.mxu0 %v1427_v26  ;;  %v75_v26 = vld [vmem:[%s3433_s1 + $0x1c0] sm:$0xff]  ;;  %v1575_v30 = vpack.c.bf16 %v78_v23, %v62_v22  ;;  %v238_v19 = vld [vmem:[%s3433_s1 + $0x6d8] sm:$0xff] }
  0x74   :  { %1490 = vmatpush1.bf16.msra.mxu1 %v1489_v29  ;;  %v108_v29 = vld [vmem:[%s3433_s1 + $0x2c8] sm:$0xff]  ;;  %v1513_v33 = vpack.c.bf16 %v75_v26, %v59_v25  ;;  %v235_v22 = vld [vmem:[%s3433_s1 + $0x6c0] sm:$0xff] }
  0x75   :  { %1492 = vmatprep.subr.bf16.mxu1 %v1491_v32  ;;  %v77_v32 = vld [vmem:[%s3433_s1 + $0x1d0] sm:$0xff]  ;;  %v1515_v36 = vpack.c.bf16 %v108_v29, %v92_v28  ;;  %v268_v25 = vld [vmem:[%s3433_s1 + $0x7c8] sm:$0xff] }
  0x76   :  { %1430 = vmatpush1.bf16.msra.mxu0 %v1429_v35  ;;  %v110_v35 = vld [vmem:[%s3433_s1 + $0x2d8] sm:$0xff]  ;;  %v1577_v39 = vpack.c.bf16 %v77_v32, %v61_v31  ;;  %v237_v28 = vld [vmem:[%s3433_s1 + $0x6d0] sm:$0xff] }
  0x77   :  { %1432 = vmatprep.subr.bf16.mxu0 %v1431_v38  ;;  %v107_v38 = vld [vmem:[%s3433_s1 + $0x2c0] sm:$0xff]  ;;  %v270_v31 = vld [vmem:[%s3433_s1 + $0x7d8] sm:$0xff] }
  0x78   :  { %1494 = vmatpush1.bf16.msra.mxu1 %v1493_v41  ;;  %v1579_v41 = vpack.c.bf16 %v110_v35, %v94_v34  ;;  %v267_v34 = vld [vmem:[%s3433_s1 + $0x7c0] sm:$0xff] }
  0x79   :  { %1496 = vmatprep.subr.bf16.mxu1 %v1495_v44  ;;  %v1517_v44 = vpack.c.bf16 %v107_v38, %v91_v37  ;;  %v300_v37 = vld [vmem:[%s3433_s1 + $0x8c8] sm:$0xff] }
  0x7a   :  { %1434 = vmatpush1.bf16.msra.mxu0 %v1433_v47  ;;  %v123_v47 = vld [vmem:[%s3433_s1 + $0x340] sm:$0xff] }
  0x7b   :  { %1436 = vmatprep.subr.bf16.mxu0 %v1435_v50  ;;  %v156_v50 = vld [vmem:[%s3433_s1 + $0x448] sm:$0xff]  ;;  %v1521_v55 = vpack.c.bf16 %v139_v48, %v123_v47 }
  0x7c   :  { %1498 = vmatpush1.bf16.msra.mxu1 %v1497_v53  ;;  %v125_v53 = vld [vmem:[%s3433_s1 + $0x350] sm:$0xff]  ;;  %v1523_v58 = vpack.c.bf16 %v172_v51, %v156_v50  ;;  %v332_v47 = vld [vmem:[%s3433_s1 + $0x9c8] sm:$0xff] }
  0x7d   :  { %1500 = vmatprep.subr.bf16.mxu1 %v1499_v56  ;;  %v158_v56 = vld [vmem:[%s3433_s1 + $0x458] sm:$0xff]  ;;  %v1585_v61 = vpack.c.bf16 %v141_v54, %v125_v53  ;;  %v301_v50 = vld [vmem:[%s3433_s1 + $0x8d0] sm:$0xff] }
  0x7e   :  { %1438 = vmatpush1.bf16.msra.mxu0 %v1437_v59  ;;  %v155_v59 = vld [vmem:[%s3433_s1 + $0x440] sm:$0xff]  ;;  %v1587_v0 = vpack.c.bf16 %v174_v57, %v158_v56  ;;  %v334_v53 = vld [vmem:[%s3433_s1 + $0x9d8] sm:$0xff] }
  0x7f   :  { %1440 = vmatprep.subr.bf16.mxu0 %v1439_v62  ;;  %v188_v62 = vld [vmem:[%s3433_s1 + $0x548] sm:$0xff]  ;;  %v1525_v3 = vpack.c.bf16 %v171_v60, %v155_v59  ;;  %v331_v56 = vld [vmem:[%s3433_s1 + $0x9c0] sm:$0xff] }
  0x80   :  { %1502 = vmatpush1.bf16.msra.mxu1 %v1501_v1  ;;  %v157_v1 = vld [vmem:[%s3433_s1 + $0x450] sm:$0xff]  ;;  %v1527_v6 = vpack.c.bf16 %v204_v63, %v188_v62  ;;  %v364_v59 = vld [vmem:[%s3433_s1 + $0xac8] sm:$0xff] }
  0x81   :  { %1504 = vmatprep.subr.bf16.mxu1 %v1503_v4  ;;  %v190_v4 = vld [vmem:[%s3433_s1 + $0x558] sm:$0xff]  ;;  %v1589_v9 = vpack.c.bf16 %v173_v2, %v157_v1  ;;  %v333_v62 = vld [vmem:[%s3433_s1 + $0x9d0] sm:$0xff] }
  0x82   :  { %1442 = vmatpush1.bf16.msra.mxu0 %v1441_v7  ;;  %v187_v7 = vld [vmem:[%s3433_s1 + $0x540] sm:$0xff]  ;;  %v1591_v13 = vpack.c.bf16 %v206_v5, %v190_v4  ;;  %v366_v1 = vld [vmem:[%s3433_s1 + $0xad8] sm:$0xff] }
  0x83   :  { %1508 = vmatprep.subr.bf16.mxu0 %v1507_v11  ;;  %v220_v11 = vld [vmem:[%s3433_s1 + $0x648] sm:$0xff]  ;;  %v1529_v17 = vpack.c.bf16 %v203_v8, %v187_v7  ;;  %v363_v4 = vld [vmem:[%s3433_s1 + $0xac0] sm:$0xff] }
  0x84   :  { %1506 = vmatpush1.bf16.msra.mxu1 %v1505_v15  ;;  %v189_v15 = vld [vmem:[%s3433_s1 + $0x550] sm:$0xff]  ;;  %v1531_v20 = vpack.c.bf16 %v236_v12, %v220_v11  ;;  %v396_v7 = vld [vmem:[%s3433_s1 + $0xbc8] sm:$0xff] }
  0x85   :  { %738 = vmatmul.mubr.f32.vlgmr.msra.gmra.mrb[2].mxu0 %v2220_v14  ;;  %1572 = vmatprep.subr.bf16.mxu1 %v1571_v18  ;;  %v222_v18 = vld [vmem:[%s3433_s1 + $0x658] sm:$0xff]  ;;  %v1593_v23 = vpack.c.bf16 %v205_v16, %v189_v15  ;;  %v365_v11 = vld [vmem:[%s3433_s1 + $0xad0] sm:$0xff] }
  0x86   :  { %1510 = vmatpush1.bf16.msra.mxu0 %v1509_v21  ;;  %879 = vmatprep.mubr.f32.mxu0 %v2081_v10  ;;  %v219_v21 = vld [vmem:[%s3433_s1 + $0x640] sm:$0xff]  ;;  %v1595_v26 = vpack.c.bf16 %v238_v19, %v222_v18  ;;  %v398_v15 = vld [vmem:[%s3433_s1 + $0xbd8] sm:$0xff] }
  0x87   :  { %809 = vmatmul.mubr.f32.vlgmr.msra.gmra.mrb[2].mxu1 %v2220_v14  ;;  %1512 = vmatprep.subr.bf16.mxu0 %v1511_v24  ;;  %v140_v14 = vld [vmem:[%s3433_s1 + $0x3c8] sm:$0xff]  ;;  %v1533_v29 = vpack.c.bf16 %v235_v22, %v219_v21  ;;  %v395_v18 = vld [vmem:[%s3433_s1 + $0xbc0] sm:$0xff] }
  0x88   :  { %1574 = vmatpush1.bf16.msra.mxu1 %v1573_v27  ;;  %950 = vmatprep.mubr.f32.mxu1 %v2081_v10  ;;  %v142_v10 = vld [vmem:[%s3433_s1 + $0x3d8] sm:$0xff]  ;;  %v1519_v46 = vpack.c.bf16 %v140_v14, %v124_v40  ;;  %v252_v24 = vld [vmem:[%s3433_s1 + $0x748] sm:$0xff]  ;;  %v221_v27 = vld [vmem:[%s3433_s1 + $0x650] sm:$0xff] }
  0x89   :  { %1576 = vmatprep.subr.bf16.mxu1 %v1575_v30  ;;  %v1583_v52 = vpack.c.bf16 %v142_v10, %v126_v45  ;;  %v254_v30 = vld [vmem:[%s3433_s1 + $0x758] sm:$0xff]  ;;  %v1535_v32 = vpack.c.bf16 %v268_v25, %v252_v24  ;;  %v1597_v35 = vpack.c.bf16 %v237_v28, %v221_v27  ;;  %v269_v40 = vld [vmem:[%s3433_s1 + $0x7d0] sm:$0xff]  ;;  %v299_v45 = vld [vmem:[%s3433_s1 + $0x8c0] sm:$0xff] }
  0x8a   :  { %1514 = vmatpush1.bf16.msra.mxu0 %v1513_v33  ;;  %v251_v33 = vld [vmem:[%s3433_s1 + $0x740] sm:$0xff]  ;;  %v1599_v38 = vpack.c.bf16 %v270_v31, %v254_v30  ;;  %v428_v21 = vld [vmem:[%s3433_s1 + $0xcc8] sm:$0xff]  ;;  %v397_v24 = vld [vmem:[%s3433_s1 + $0xbd0] sm:$0xff] }
  0x8b   :  { %1516 = vmatprep.subr.bf16.mxu0 %v1515_v36  ;;  %v284_v36 = vld [vmem:[%s3433_s1 + $0x848] sm:$0xff]  ;;  %v1537_v14 = vpack.c.bf16 %v267_v34, %v251_v33  ;;  %v430_v27 = vld [vmem:[%s3433_s1 + $0xcd8] sm:$0xff]  ;;  %v427_v30 = vld [vmem:[%s3433_s1 + $0xcc0] sm:$0xff] }
  0x8c   :  { %1578 = vmatpush1.bf16.msra.mxu1 %v1577_v39  ;;  %v253_v39 = vld [vmem:[%s3433_s1 + $0x750] sm:$0xff]  ;;  %v1539_v43 = vpack.c.bf16 %v300_v37, %v284_v36  ;;  %v460_v33 = vld [vmem:[%s3433_s1 + $0xdc8] sm:$0xff] }
  0x8d   :  { %1580 = vmatprep.subr.bf16.mxu1 %v1579_v41  ;;  %v286_v41 = vld [vmem:[%s3433_s1 + $0x858] sm:$0xff]  ;;  %v1601_v10 = vpack.c.bf16 %v269_v40, %v253_v39  ;;  %v429_v36 = vld [vmem:[%s3433_s1 + $0xcd0] sm:$0xff] }
  0x8e   :  { %1518 = vmatpush1.bf16.msra.mxu0 %v1517_v44  ;;  %v283_v44 = vld [vmem:[%s3433_s1 + $0x840] sm:$0xff]  ;;  %v1603_v48 = vpack.c.bf16 %v302_v42, %v286_v41  ;;  %v462_v39 = vld [vmem:[%s3433_s1 + $0xdd8] sm:$0xff] }
  0x8f   :  { %1520 = vmatprep.subr.bf16.mxu0 %v1519_v46  ;;  %v316_v46 = vld [vmem:[%s3433_s1 + $0x948] sm:$0xff]  ;;  %v1541_v51 = vpack.c.bf16 %v299_v45, %v283_v44  ;;  %v459_v41 = vld [vmem:[%s3433_s1 + $0xdc0] sm:$0xff] }
  0x90   :  { %1582 = vmatpush1.bf16.msra.mxu1 %v1581_v49  ;;  %v285_v49 = vld [vmem:[%s3433_s1 + $0x850] sm:$0xff]  ;;  %v1543_v54 = vpack.c.bf16 %v332_v47, %v316_v46  ;;  %v492_v44 = vld [vmem:[%s3433_s1 + $0xec8] sm:$0xff] }
  0x91   :  { %1584 = vmatprep.subr.bf16.mxu1 %v1583_v52  ;;  %v318_v52 = vld [vmem:[%s3433_s1 + $0x958] sm:$0xff]  ;;  %v1605_v57 = vpack.c.bf16 %v301_v50, %v285_v49  ;;  %v461_v46 = vld [vmem:[%s3433_s1 + $0xdd0] sm:$0xff] }
  0x92   :  { %1522 = vmatpush1.bf16.msra.mxu0 %v1521_v55  ;;  %v315_v55 = vld [vmem:[%s3433_s1 + $0x940] sm:$0xff]  ;;  %v1607_v60 = vpack.c.bf16 %v334_v53, %v318_v52  ;;  %v494_v49 = vld [vmem:[%s3433_s1 + $0xed8] sm:$0xff] }
  0x93   :  { %1524 = vmatprep.subr.bf16.mxu0 %v1523_v58  ;;  %v348_v58 = vld [vmem:[%s3433_s1 + $0xa48] sm:$0xff]  ;;  %v1545_v63 = vpack.c.bf16 %v331_v56, %v315_v55  ;;  %v491_v52 = vld [vmem:[%s3433_s1 + $0xec0] sm:$0xff] }
  0x94   :  { %1586 = vmatpush1.bf16.msra.mxu1 %v1585_v61  ;;  %v317_v61 = vld [vmem:[%s3433_s1 + $0x950] sm:$0xff]  ;;  %v1547_v2 = vpack.c.bf16 %v364_v59, %v348_v58  ;;  %v524_v55 = vld [vmem:[%s3433_s1 + $0xfc8] sm:$0xff] }
  0x95   :  { %1588 = vmatprep.subr.bf16.mxu1 %v1587_v0  ;;  %v350_v0 = vld [vmem:[%s3433_s1 + $0xa58] sm:$0xff]  ;;  %v1609_v5 = vpack.c.bf16 %v333_v62, %v317_v61  ;;  %v493_v58 = vld [vmem:[%s3433_s1 + $0xed0] sm:$0xff] }
  0x96   :  { %1526 = vmatpush1.bf16.msra.mxu0 %v1525_v3  ;;  %v347_v3 = vld [vmem:[%s3433_s1 + $0xa40] sm:$0xff]  ;;  %v1611_v8 = vpack.c.bf16 %v366_v1, %v350_v0  ;;  %v526_v61 = vld [vmem:[%s3433_s1 + $0xfd8] sm:$0xff] }
  0x97   :  { %1528 = vmatprep.subr.bf16.mxu0 %v1527_v6  ;;  %v380_v6 = vld [vmem:[%s3433_s1 + $0xb48] sm:$0xff]  ;;  %v1549_v12 = vpack.c.bf16 %v363_v4, %v347_v3  ;;  %v523_v0 = vld [vmem:[%s3433_s1 + $0xfc0] sm:$0xff] }
  0x98   :  { %1590 = vmatpush1.bf16.msra.mxu1 %v1589_v9  ;;  %v349_v9 = vld [vmem:[%s3433_s1 + $0xa50] sm:$0xff]  ;;  %v1551_v16 = vpack.c.bf16 %v396_v7, %v380_v6  ;;  %v48_v3 = vld [vmem:[%s3433_s1 + $0xe8] sm:$0xff] }
  0x99   :  { %1592 = vmatprep.subr.bf16.mxu1 %v1591_v13  ;;  %v382_v13 = vld [vmem:[%s3433_s1 + $0xb58] sm:$0xff]  ;;  %v1613_v19 = vpack.c.bf16 %v365_v11, %v349_v9  ;;  %v525_v6 = vld [vmem:[%s3433_s1 + $0xfd0] sm:$0xff] }
  0x9a   :  { %1530 = vmatpush1.bf16.msra.mxu0 %v1529_v17  ;;  %v379_v17 = vld [vmem:[%s3433_s1 + $0xb40] sm:$0xff]  ;;  %v1615_v22 = vpack.c.bf16 %v398_v15, %v382_v13  ;;  %v50_v9 = vld [vmem:[%s3433_s1 + $0xf8] sm:$0xff] }
  0x9b   :  { %1532 = vmatprep.subr.bf16.mxu0 %v1531_v20  ;;  %v412_v20 = vld [vmem:[%s3433_s1 + $0xc48] sm:$0xff]  ;;  %v1553_v25 = vpack.c.bf16 %v395_v18, %v379_v17  ;;  %v47_v13 = vld [vmem:[%s3433_s1 + $0xe0] sm:$0xff] }
  0x9c   :  { %1594 = vmatpush1.bf16.msra.mxu1 %v1593_v23  ;;  %v381_v23 = vld [vmem:[%s3433_s1 + $0xb50] sm:$0xff]  ;;  %v1555_v28 = vpack.c.bf16 %v428_v21, %v412_v20  ;;  %v80_v17 = vld [vmem:[%s3433_s1 + $0x1e8] sm:$0xff] }
  0x9d   :  { %1596 = vmatprep.subr.bf16.mxu1 %v1595_v26  ;;  %v414_v26 = vld [vmem:[%s3433_s1 + $0xc58] sm:$0xff]  ;;  %v1617_v31 = vpack.c.bf16 %v397_v24, %v381_v23  ;;  %v49_v20 = vld [vmem:[%s3433_s1 + $0xf0] sm:$0xff] }
  0x9e   :  { %1534 = vmatpush1.bf16.msra.mxu0 %v1533_v29  ;;  %v411_v29 = vld [vmem:[%s3433_s1 + $0xc40] sm:$0xff]  ;;  %v1619_v34 = vpack.c.bf16 %v430_v27, %v414_v26  ;;  %v82_v23 = vld [vmem:[%s3433_s1 + $0x1f8] sm:$0xff] }
  0x9f   :  { %1536 = vmatprep.subr.bf16.mxu0 %v1535_v32  ;;  %v444_v32 = vld [vmem:[%s3433_s1 + $0xd48] sm:$0xff]  ;;  %v1557_v37 = vpack.c.bf16 %v427_v30, %v411_v29  ;;  %v79_v26 = vld [vmem:[%s3433_s1 + $0x1e0] sm:$0xff] }
  0xa0   :  { %1598 = vmatpush1.bf16.msra.mxu1 %v1597_v35  ;;  %v413_v35 = vld [vmem:[%s3433_s1 + $0xc50] sm:$0xff]  ;;  %v1559_v40 = vpack.c.bf16 %v460_v33, %v444_v32  ;;  %v112_v29 = vld [vmem:[%s3433_s1 + $0x2e8] sm:$0xff]  ;;  %v3019_v30 = vld [vmem:[%s3434_s0] sm:$0xff] }
  0xa1   :  { %1600 = vmatprep.subr.bf16.mxu1 %v1599_v38  ;;  %v446_v38 = vld [vmem:[%s3433_s1 + $0xd58] sm:$0xff]  ;;  %v1621_v42 = vpack.c.bf16 %v429_v36, %v413_v35  ;;  %v65_v32 = vld [vmem:[%s3433_s1 + $0x170] sm:$0xff] }
  0xa2   :  { %1538 = vmatpush1.bf16.msra.mxu0 %v1537_v14  ;;  %v443_v14 = vld [vmem:[%s3433_s1 + $0xd40] sm:$0xff]  ;;  %v1623_v45 = vpack.c.bf16 %v462_v39, %v446_v38  ;;  %v81_v33 = vld [vmem:[%s3433_s1 + $0x1f0] sm:$0xff]  ;;  %v98_v35 = vld [vmem:[%s3433_s1 + $0x278] sm:$0xff] }
  0xa3   :  { %1540 = vmatprep.subr.bf16.mxu0 %v1539_v43  ;;  %v476_v43 = vld [vmem:[%s3433_s1 + $0xe48] sm:$0xff]  ;;  %v1561_v47 = vpack.c.bf16 %v459_v41, %v443_v14  ;;  %v114_v36 = vld [vmem:[%s3433_s1 + $0x2f8] sm:$0xff]  ;;  %v95_v39 = vld [vmem:[%s3433_s1 + $0x260] sm:$0xff]  ;;  %v1705_v14 = vpack.c.bf16 %v81_v33, %v65_v32 }
  0xa4   :  { %1602 = vmatpush1.bf16.msra.mxu1 %v1601_v10  ;;  %v445_v10 = vld [vmem:[%s3433_s1 + $0xd50] sm:$0xff]  ;;  %v1563_v50 = vpack.c.bf16 %v492_v44, %v476_v43  ;;  %v128_v41 = vld [vmem:[%s3433_s1 + $0x368] sm:$0xff]  ;;  %v1707_v43 = vpack.c.bf16 %v114_v36, %v98_v35  ;;  %v258_v33 = vld [vmem:[%s3433_s1 + $0x778] sm:$0xff] }
  0xa5   :  { %1604 = vmatprep.subr.bf16.mxu1 %v1603_v48  ;;  %v478_v48 = vld [vmem:[%s3433_s1 + $0xe58] sm:$0xff]  ;;  %v1625_v53 = vpack.c.bf16 %v461_v46, %v445_v10  ;;  %v97_v44 = vld [vmem:[%s3433_s1 + $0x270] sm:$0xff]  ;;  %v255_v36 = vld [vmem:[%s3433_s1 + $0x760] sm:$0xff] }
  0xa6   :  { %1542 = vmatpush1.bf16.msra.mxu0 %v1541_v51  ;;  %v475_v51 = vld [vmem:[%s3433_s1 + $0xe40] sm:$0xff]  ;;  %v1627_v56 = vpack.c.bf16 %v494_v49, %v478_v48  ;;  %v130_v46 = vld [vmem:[%s3433_s1 + $0x378] sm:$0xff] }
  0xa7   :  { %1544 = vmatprep.subr.bf16.mxu0 %v1543_v54  ;;  %v508_v54 = vld [vmem:[%s3433_s1 + $0xf48] sm:$0xff]  ;;  %v1565_v59 = vpack.c.bf16 %v491_v52, %v475_v51  ;;  %v127_v49 = vld [vmem:[%s3433_s1 + $0x360] sm:$0xff] }
  0xa8   :  { %1606 = vmatpush1.bf16.msra.mxu1 %v1605_v57  ;;  %v477_v57 = vld [vmem:[%s3433_s1 + $0xe50] sm:$0xff]  ;;  %v1567_v62 = vpack.c.bf16 %v524_v55, %v508_v54  ;;  %v160_v52 = vld [vmem:[%s3433_s1 + $0x468] sm:$0xff] }
  0xa9   :  { %1608 = vmatprep.subr.bf16.mxu1 %v1607_v60  ;;  %v510_v60 = vld [vmem:[%s3433_s1 + $0xf58] sm:$0xff]  ;;  %v1629_v1 = vpack.c.bf16 %v493_v58, %v477_v57  ;;  %v129_v55 = vld [vmem:[%s3433_s1 + $0x370] sm:$0xff] }
  0xaa   :  { %1546 = vmatpush1.bf16.msra.mxu0 %v1545_v63  ;;  %v507_v63 = vld [vmem:[%s3433_s1 + $0xf40] sm:$0xff]  ;;  %v1631_v4 = vpack.c.bf16 %v526_v61, %v510_v60  ;;  %v162_v58 = vld [vmem:[%s3433_s1 + $0x478] sm:$0xff] }
  0xab   :  { %1548 = vmatprep.subr.bf16.mxu0 %v1547_v2  ;;  %v32_v2 = vld [vmem:[%s3433_s1 + $0x68] sm:$0xff]  ;;  %v1569_v7 = vpack.c.bf16 %v523_v0, %v507_v63  ;;  %v159_v61 = vld [vmem:[%s3433_s1 + $0x460] sm:$0xff] }
  0xac   :  { %1610 = vmatpush1.bf16.msra.mxu1 %v1609_v5  ;;  %v509_v5 = vld [vmem:[%s3433_s1 + $0xf50] sm:$0xff]  ;;  %v1635_v11 = vpack.c.bf16 %v48_v3, %v32_v2  ;;  %v192_v0 = vld [vmem:[%s3433_s1 + $0x568] sm:$0xff] }
  0xad   :  { %1612 = vmatprep.subr.bf16.mxu1 %v1611_v8  ;;  %v34_v8 = vld [vmem:[%s3433_s1 + $0x78] sm:$0xff]  ;;  %v1633_v15 = vpack.c.bf16 %v525_v6, %v509_v5  ;;  %v161_v3 = vld [vmem:[%s3433_s1 + $0x470] sm:$0xff] }
  0xae   :  { %1550 = vmatpush1.bf16.msra.mxu0 %v1549_v12  ;;  %v31_v12 = vld [vmem:[%s3433_s1 + $0x60] sm:$0xff]  ;;  %v1699_v18 = vpack.c.bf16 %v50_v9, %v34_v8  ;;  %v194_v6 = vld [vmem:[%s3433_s1 + $0x578] sm:$0xff] }
  0xaf   :  { %1552 = vmatprep.subr.bf16.mxu0 %v1551_v16  ;;  %v64_v16 = vld [vmem:[%s3433_s1 + $0x168] sm:$0xff]  ;;  %v1637_v21 = vpack.c.bf16 %v47_v13, %v31_v12  ;;  %v191_v9 = vld [vmem:[%s3433_s1 + $0x560] sm:$0xff] }
  0xb0   :  { %1614 = vmatpush1.bf16.msra.mxu1 %v1613_v19  ;;  %v33_v19 = vld [vmem:[%s3433_s1 + $0x70] sm:$0xff]  ;;  %v1639_v24 = vpack.c.bf16 %v80_v17, %v64_v16  ;;  %v224_v13 = vld [vmem:[%s3433_s1 + $0x668] sm:$0xff] }
  0xb1   :  { %1616 = vmatprep.subr.bf16.mxu1 %v1615_v22  ;;  %v66_v22 = vld [vmem:[%s3433_s1 + $0x178] sm:$0xff]  ;;  %v1701_v27 = vpack.c.bf16 %v49_v20, %v33_v19  ;;  %v193_v17 = vld [vmem:[%s3433_s1 + $0x570] sm:$0xff] }
  0xb2   :  { %1554 = vmatpush1.bf16.msra.mxu0 %v1553_v25  ;;  %v63_v25 = vld [vmem:[%s3433_s1 + $0x160] sm:$0xff]  ;;  %v226_v20 = vld [vmem:[%s3433_s1 + $0x678] sm:$0xff] }
  0xb3   :  { %1556 = vmatprep.subr.bf16.mxu0 %v1555_v28  ;;  %v96_v28 = vld [vmem:[%s3433_s1 + $0x268] sm:$0xff] }
  0xb4   :  { %1618 = vmatpush1.bf16.msra.mxu1 %v1617_v31  ;;  %v1703_v31 = vpack.c.bf16 %v82_v23, %v66_v22  ;;  %v1643_v38 = vpack.c.bf16 %v112_v29, %v96_v28  ;;  %v223_v23 = vld [vmem:[%s3433_s1 + $0x660] sm:$0xff]  ;;  %v225_v29 = vld [vmem:[%s3433_s1 + $0x670] sm:$0xff] }
  0xb5   :  { %1620 = vmatprep.subr.bf16.mxu1 %v1619_v34  ;;  %v1641_v34 = vpack.c.bf16 %v79_v26, %v63_v25  ;;  %v256_v26 = vld [vmem:[%s3433_s1 + $0x768] sm:$0xff] }
  0xb6   :  { %1558 = vmatpush1.bf16.msra.mxu0 %v1557_v37  ;;  %v1769_v37 = vld [vmem:[%s3434_s0 + $0x8] sm:$0xff] }
  0xb7   :  { %1560 = vmatprep.subr.bf16.mxu0 %v1559_v40  ;;  %v111_v40 = vld [vmem:[%s3433_s1 + $0x2e0] sm:$0xff] }
  0xb8   :  { %1622 = vmatpush1.bf16.msra.mxu1 %v1621_v42  ;;  %v144_v42 = vld [vmem:[%s3433_s1 + $0x3e8] sm:$0xff]  ;;  %v1645_v10 = vpack.c.bf16 %v111_v40, %v95_v39 }
  0xb9   :  { %1624 = vmatprep.subr.bf16.mxu1 %v1623_v45  ;;  %v113_v45 = vld [vmem:[%s3433_s1 + $0x2f0] sm:$0xff]  ;;  %v1647_v48 = vpack.c.bf16 %v144_v42, %v128_v41  ;;  %v288_v39 = vld [vmem:[%s3433_s1 + $0x868] sm:$0xff] }
  0xba   :  { %1562 = vmatpush1.bf16.msra.mxu0 %v1561_v47  ;;  %v146_v47 = vld [vmem:[%s3433_s1 + $0x3f8] sm:$0xff]  ;;  %v1709_v51 = vpack.c.bf16 %v113_v45, %v97_v44  ;;  %v304_v40 = vld [vmem:[%s3433_s1 + $0x8e8] sm:$0xff]  ;;  %v257_v41 = vld [vmem:[%s3433_s1 + $0x770] sm:$0xff] }
  0xbb   :  { %1564 = vmatprep.subr.bf16.mxu0 %v1563_v50  ;;  %v143_v50 = vld [vmem:[%s3433_s1 + $0x3e0] sm:$0xff]  ;;  %v1711_v54 = vpack.c.bf16 %v146_v47, %v130_v46  ;;  %v273_v42 = vld [vmem:[%s3433_s1 + $0x7f0] sm:$0xff]  ;;  %v290_v44 = vld [vmem:[%s3433_s1 + $0x878] sm:$0xff] }
  0xbc   :  { %1626 = vmatpush1.bf16.msra.mxu1 %v1625_v53  ;;  %v176_v53 = vld [vmem:[%s3433_s1 + $0x4e8] sm:$0xff]  ;;  %v1649_v57 = vpack.c.bf16 %v143_v50, %v127_v49  ;;  %v306_v45 = vld [vmem:[%s3433_s1 + $0x8f8] sm:$0xff]  ;;  %v287_v46 = vld [vmem:[%s3433_s1 + $0x860] sm:$0xff] }
  0xbd   :  { %1628 = vmatprep.subr.bf16.mxu1 %v1627_v56  ;;  %v145_v56 = vld [vmem:[%s3433_s1 + $0x3f0] sm:$0xff]  ;;  %v1651_v60 = vpack.c.bf16 %v176_v53, %v160_v52  ;;  %v303_v47 = vld [vmem:[%s3433_s1 + $0x8e0] sm:$0xff]  ;;  %v320_v49 = vld [vmem:[%s3433_s1 + $0x968] sm:$0xff] }
  0xbe   :  { %1566 = vmatpush1.bf16.msra.mxu0 %v1565_v59  ;;  %v178_v59 = vld [vmem:[%s3433_s1 + $0x4f8] sm:$0xff]  ;;  %v1713_v63 = vpack.c.bf16 %v145_v56, %v129_v55  ;;  %v336_v50 = vld [vmem:[%s3433_s1 + $0x9e8] sm:$0xff]  ;;  %v289_v52 = vld [vmem:[%s3433_s1 + $0x870] sm:$0xff] }
  0xbf   :  { %1568 = vmatprep.subr.bf16.mxu0 %v1567_v62  ;;  %v175_v62 = vld [vmem:[%s3433_s1 + $0x4e0] sm:$0xff]  ;;  %v1715_v2 = vpack.c.bf16 %v178_v59, %v162_v58  ;;  %v305_v53 = vld [vmem:[%s3433_s1 + $0x8f0] sm:$0xff]  ;;  %v322_v55 = vld [vmem:[%s3433_s1 + $0x978] sm:$0xff] }
  0xc0   :  { %1630 = vmatpush1.bf16.msra.mxu1 %v1629_v1  ;;  %v208_v1 = vld [vmem:[%s3433_s1 + $0x5e8] sm:$0xff]  ;;  %v1653_v5 = vpack.c.bf16 %v175_v62, %v159_v61  ;;  %v338_v56 = vld [vmem:[%s3433_s1 + $0x9f8] sm:$0xff]  ;;  %v319_v58 = vld [vmem:[%s3433_s1 + $0x960] sm:$0xff] }
  0xc1   :  { %1632 = vmatprep.subr.bf16.mxu1 %v1631_v4  ;;  %v177_v4 = vld [vmem:[%s3433_s1 + $0x4f0] sm:$0xff]  ;;  %v1655_v8 = vpack.c.bf16 %v208_v1, %v192_v0  ;;  %v335_v59 = vld [vmem:[%s3433_s1 + $0x9e0] sm:$0xff]  ;;  %v352_v61 = vld [vmem:[%s3433_s1 + $0xa68] sm:$0xff] }
  0xc2   :  { %1570 = vmatpush1.bf16.msra.mxu0 %v1569_v7  ;;  %v210_v7 = vld [vmem:[%s3433_s1 + $0x5f8] sm:$0xff]  ;;  %v1717_v12 = vpack.c.bf16 %v177_v4, %v161_v3  ;;  %v368_v62 = vld [vmem:[%s3433_s1 + $0xae8] sm:$0xff]  ;;  %v321_v0 = vld [vmem:[%s3433_s1 + $0x970] sm:$0xff] }
  0xc3   :  { %1636 = vmatprep.subr.bf16.mxu0 %v1635_v11  ;;  %v207_v11 = vld [vmem:[%s3433_s1 + $0x5e0] sm:$0xff]  ;;  %v1719_v16 = vpack.c.bf16 %v210_v7, %v194_v6  ;;  %v337_v1 = vld [vmem:[%s3433_s1 + $0x9f0] sm:$0xff]  ;;  %v354_v3 = vld [vmem:[%s3433_s1 + $0xa78] sm:$0xff] }
  0xc4   :  { %1634 = vmatpush1.bf16.msra.mxu1 %v1633_v15  ;;  %v240_v15 = vld [vmem:[%s3433_s1 + $0x6e8] sm:$0xff]  ;;  %v1657_v19 = vpack.c.bf16 %v207_v11, %v191_v9  ;;  %v370_v4 = vld [vmem:[%s3433_s1 + $0xaf8] sm:$0xff]  ;;  %v351_v6 = vld [vmem:[%s3433_s1 + $0xa60] sm:$0xff] }
  0xc5   :  { %880 = vmatmul.mubr.f32.vlgmr.msra.gmra.mrb[4].mxu0 %v3019_v30  ;;  %1700 = vmatprep.subr.bf16.mxu1 %v1699_v18  ;;  %v209_v18 = vld [vmem:[%s3433_s1 + $0x5f0] sm:$0xff]  ;;  %v1659_v22 = vpack.c.bf16 %v240_v15, %v224_v13  ;;  %v367_v7 = vld [vmem:[%s3433_s1 + $0xae0] sm:$0xff]  ;;  %v384_v9 = vld [vmem:[%s3433_s1 + $0xb68] sm:$0xff] }
  0xc6   :  { %1638 = vmatpush1.bf16.msra.mxu0 %v1637_v21  ;;  %1021 = vmatprep.mubr.f32.mxu0 %v1769_v37  ;;  %v242_v21 = vld [vmem:[%s3433_s1 + $0x6f8] sm:$0xff]  ;;  %v1721_v25 = vpack.c.bf16 %v209_v18, %v193_v17  ;;  %v400_v11 = vld [vmem:[%s3433_s1 + $0xbe8] sm:$0xff]  ;;  %v353_v13 = vld [vmem:[%s3433_s1 + $0xa70] sm:$0xff] }
  0xc7   :  { %951 = vmatmul.mubr.f32.vlgmr.msra.gmra.mrb[4].mxu1 %v3019_v30  ;;  %1640 = vmatprep.subr.bf16.mxu0 %v1639_v24  ;;  %v239_v24 = vld [vmem:[%s3433_s1 + $0x6e0] sm:$0xff]  ;;  %v1723_v28 = vpack.c.bf16 %v242_v21, %v226_v20  ;;  %v369_v15 = vld [vmem:[%s3433_s1 + $0xaf0] sm:$0xff]  ;;  %v386_v17 = vld [vmem:[%s3433_s1 + $0xb78] sm:$0xff] }
  0xc8   :  { %1702 = vmatpush1.bf16.msra.mxu1 %v1701_v27  ;;  %1092 = vmatprep.mubr.f32.mxu1 %v1769_v37  ;;  %v272_v27 = vld [vmem:[%s3433_s1 + $0x7e8] sm:$0xff]  ;;  %v1661_v32 = vpack.c.bf16 %v239_v24, %v223_v23  ;;  %v271_v37 = vld [vmem:[%s3433_s1 + $0x7e0] sm:$0xff]  ;;  %v402_v18 = vld [vmem:[%s3433_s1 + $0xbf8] sm:$0xff] }
  0xc9   :  { %1704 = vmatprep.subr.bf16.mxu1 %v1703_v31  ;;  %v241_v31 = vld [vmem:[%s3433_s1 + $0x6f0] sm:$0xff]  ;;  %v1663_v35 = vpack.c.bf16 %v272_v27, %v256_v26  ;;  %v383_v20 = vld [vmem:[%s3433_s1 + $0xb60] sm:$0xff]  ;;  %v416_v23 = vld [vmem:[%s3433_s1 + $0xc68] sm:$0xff] }
  0xca   :  { %1642 = vmatpush1.bf16.msra.mxu0 %v1641_v34  ;;  %v274_v34 = vld [vmem:[%s3433_s1 + $0x7f8] sm:$0xff]  ;;  %v399_v21 = vld [vmem:[%s3433_s1 + $0xbe0] sm:$0xff]  ;;  %v432_v24 = vld [vmem:[%s3433_s1 + $0xce8] sm:$0xff] }
  0xcb   :  { %1644 = vmatprep.subr.bf16.mxu0 %v1643_v38  ;;  %v1725_v38 = vpack.c.bf16 %v241_v31, %v225_v29  ;;  %v385_v26 = vld [vmem:[%s3433_s1 + $0xb70] sm:$0xff]  ;;  %v418_v29 = vld [vmem:[%s3433_s1 + $0xc78] sm:$0xff] }
  0xcc   :  { %1706 = vmatpush1.bf16.msra.mxu1 %v1705_v14  ;;  %v1727_v14 = vpack.c.bf16 %v274_v34, %v258_v33  ;;  %v401_v27 = vld [vmem:[%s3433_s1 + $0xbf0] sm:$0xff]  ;;  %v434_v31 = vld [vmem:[%s3433_s1 + $0xcf8] sm:$0xff]  ;;  %v415_v33 = vld [vmem:[%s3433_s1 + $0xc60] sm:$0xff] }
  0xcd   :  { %1708 = vmatprep.subr.bf16.mxu1 %v1707_v43  ;;  %v1665_v43 = vpack.c.bf16 %v271_v37, %v255_v36  ;;  %v431_v34 = vld [vmem:[%s3433_s1 + $0xce0] sm:$0xff]  ;;  %v448_v36 = vld [vmem:[%s3433_s1 + $0xd68] sm:$0xff] }
  0xce   :  { %1646 = vmatpush1.bf16.msra.mxu0 %v1645_v10  ;;  %v1667_v10 = vpack.c.bf16 %v304_v40, %v288_v39  ;;  %v464_v37 = vld [vmem:[%s3433_s1 + $0xde8] sm:$0xff]  ;;  %v417_v39 = vld [vmem:[%s3433_s1 + $0xc70] sm:$0xff] }
  0xcf   :  { %1648 = vmatprep.subr.bf16.mxu0 %v1647_v48  ;;  %v1729_v48 = vpack.c.bf16 %v273_v42, %v257_v41  ;;  %v433_v40 = vld [vmem:[%s3433_s1 + $0xcf0] sm:$0xff]  ;;  %v450_v41 = vld [vmem:[%s3433_s1 + $0xd78] sm:$0xff] }
  0xd0   :  { %1710 = vmatpush1.bf16.msra.mxu1 %v1709_v51  ;;  %v1731_v51 = vpack.c.bf16 %v306_v45, %v290_v44  ;;  %v466_v42 = vld [vmem:[%s3433_s1 + $0xdf8] sm:$0xff]  ;;  %v447_v44 = vld [vmem:[%s3433_s1 + $0xd60] sm:$0xff] }
  0xd1   :  { %1712 = vmatprep.subr.bf16.mxu1 %v1711_v54  ;;  %v1669_v54 = vpack.c.bf16 %v303_v47, %v287_v46  ;;  %v463_v45 = vld [vmem:[%s3433_s1 + $0xde0] sm:$0xff]  ;;  %v480_v46 = vld [vmem:[%s3433_s1 + $0xe68] sm:$0xff] }
  0xd2   :  { %1650 = vmatpush1.bf16.msra.mxu0 %v1649_v57  ;;  %v1671_v57 = vpack.c.bf16 %v336_v50, %v320_v49  ;;  %v496_v47 = vld [vmem:[%s3433_s1 + $0xee8] sm:$0xff]  ;;  %v449_v49 = vld [vmem:[%s3433_s1 + $0xd70] sm:$0xff] }
  0xd3   :  { %1652 = vmatprep.subr.bf16.mxu0 %v1651_v60  ;;  %v1733_v60 = vpack.c.bf16 %v305_v53, %v289_v52  ;;  %v465_v50 = vld [vmem:[%s3433_s1 + $0xdf0] sm:$0xff]  ;;  %v482_v52 = vld [vmem:[%s3433_s1 + $0xe78] sm:$0xff] }
  0xd4   :  { %1714 = vmatpush1.bf16.msra.mxu1 %v1713_v63  ;;  %v1735_v63 = vpack.c.bf16 %v338_v56, %v322_v55  ;;  %v498_v53 = vld [vmem:[%s3433_s1 + $0xef8] sm:$0xff]  ;;  %v479_v55 = vld [vmem:[%s3433_s1 + $0xe60] sm:$0xff] }
  0xd5   :  { %1716 = vmatprep.subr.bf16.mxu1 %v1715_v2  ;;  %v1673_v2 = vpack.c.bf16 %v335_v59, %v319_v58  ;;  %v495_v56 = vld [vmem:[%s3433_s1 + $0xee0] sm:$0xff]  ;;  %v512_v58 = vld [vmem:[%s3433_s1 + $0xf68] sm:$0xff] }
  0xd6   :  { %1654 = vmatpush1.bf16.msra.mxu0 %v1653_v5  ;;  %v1675_v5 = vpack.c.bf16 %v368_v62, %v352_v61  ;;  %v528_v59 = vld [vmem:[%s3433_s1 + $0xfe8] sm:$0xff]  ;;  %v481_v61 = vld [vmem:[%s3433_s1 + $0xe70] sm:$0xff] }
  0xd7   :  { %1656 = vmatprep.subr.bf16.mxu0 %v1655_v8  ;;  %v1737_v8 = vpack.c.bf16 %v337_v1, %v321_v0  ;;  %v497_v62 = vld [vmem:[%s3433_s1 + $0xef0] sm:$0xff]  ;;  %v514_v0 = vld [vmem:[%s3433_s1 + $0xf78] sm:$0xff] }
  0xd8   :  { %1718 = vmatpush1.bf16.msra.mxu1 %v1717_v12  ;;  %v1739_v12 = vpack.c.bf16 %v370_v4, %v354_v3  ;;  %v530_v1 = vld [vmem:[%s3433_s1 + $0xff8] sm:$0xff]  ;;  %v511_v3 = vld [vmem:[%s3433_s1 + $0xf60] sm:$0xff] }
  0xd9   :  { %1720 = vmatprep.subr.bf16.mxu1 %v1719_v16  ;;  %v1677_v16 = vpack.c.bf16 %v367_v7, %v351_v6  ;;  %v527_v4 = vld [vmem:[%s3433_s1 + $0xfe0] sm:$0xff]  ;;  %v1759_v6 = vpack.c.bf16 %v530_v1, %v514_v0  ;;  %v513_v7 = vld [vmem:[%s3433_s1 + $0xf70] sm:$0xff] }
  0xda   :  { %1658 = vmatpush1.bf16.msra.mxu0 %v1657_v19  ;;  %v1679_v19 = vpack.c.bf16 %v400_v11, %v384_v9  ;;  %v1697_v9 = vpack.c.bf16 %v527_v4, %v511_v3 }
  0xdb   :  { %1660 = vmatprep.subr.bf16.mxu0 %v1659_v22  ;;  %v1741_v22 = vpack.c.bf16 %v369_v15, %v353_v13 }
  0xdc   :  { %1722 = vmatpush1.bf16.msra.mxu1 %v1721_v25  ;;  %v1743_v25 = vpack.c.bf16 %v402_v18, %v386_v17 }
  0xdd   :  { %1724 = vmatprep.subr.bf16.mxu1 %v1723_v28  ;;  %v1681_v28 = vpack.c.bf16 %v399_v21, %v383_v20 }
  0xde   :  { %1662 = vmatpush1.bf16.msra.mxu0 %v1661_v32  ;;  %v1683_v32 = vpack.c.bf16 %v432_v24, %v416_v23 }
  0xdf   :  { %1664 = vmatprep.subr.bf16.mxu0 %v1663_v35  ;;  %v1745_v35 = vpack.c.bf16 %v401_v27, %v385_v26 }
  0xe0   :  { %1726 = vmatpush1.bf16.msra.mxu1 %v1725_v38  ;;  %v1747_v38 = vpack.c.bf16 %v434_v31, %v418_v29 }
  0xe1   :  { %1728 = vmatprep.subr.bf16.mxu1 %v1727_v14  ;;  %v1685_v14 = vpack.c.bf16 %v431_v34, %v415_v33 }
  0xe2   :  { %1666 = vmatpush1.bf16.msra.mxu0 %v1665_v43  ;;  %v1687_v43 = vpack.c.bf16 %v464_v37, %v448_v36 }
  0xe3   :  { %1668 = vmatprep.subr.bf16.mxu0 %v1667_v10  ;;  %v1749_v10 = vpack.c.bf16 %v433_v40, %v417_v39 }
  0xe4   :  { %1730 = vmatpush1.bf16.msra.mxu1 %v1729_v48  ;;  %v1751_v48 = vpack.c.bf16 %v466_v42, %v450_v41 }
  0xe5   :  { %1732 = vmatprep.subr.bf16.mxu1 %v1731_v51  ;;  %v1689_v51 = vpack.c.bf16 %v463_v45, %v447_v44 }
  0xe6   :  { %1670 = vmatpush1.bf16.msra.mxu0 %v1669_v54  ;;  %v1691_v54 = vpack.c.bf16 %v496_v47, %v480_v46 }
  0xe7   :  { %1672 = vmatprep.subr.bf16.mxu0 %v1671_v57  ;;  %v1753_v57 = vpack.c.bf16 %v465_v50, %v449_v49 }
  0xe8   :  { %1734 = vmatpush1.bf16.msra.mxu1 %v1733_v60  ;;  %v1755_v60 = vpack.c.bf16 %v498_v53, %v482_v52 }
  0xe9   :  { %1736 = vmatprep.subr.bf16.mxu1 %v1735_v63  ;;  %v1693_v63 = vpack.c.bf16 %v495_v56, %v479_v55 }
  0xea   :  { %1674 = vmatpush1.bf16.msra.mxu0 %v1673_v2  ;;  %v1695_v2 = vpack.c.bf16 %v528_v59, %v512_v58 }
  0xeb   :  { %1676 = vmatprep.subr.bf16.mxu0 %v1675_v5  ;;  %v1757_v5 = vpack.c.bf16 %v497_v62, %v481_v61 }
  0xec   :  { %1738 = vmatpush1.bf16.msra.mxu1 %v1737_v8  ;;  %v529_v8 = vld [vmem:[%s3433_s1 + $0xff0] sm:$0xff] }
  0xed   :  { %1740 = vmatprep.subr.bf16.mxu1 %v1739_v12  ;;  %v1761_v11 = vpack.c.bf16 %v529_v8, %v513_v7 }
  0xee   :  { %1678 = vmatpush1.bf16.msra.mxu0 %v1677_v16 }
  0xef   :  { %1680 = vmatprep.subr.bf16.mxu0 %v1679_v19 }
  0xf0   :  { %1742 = vmatpush1.bf16.msra.mxu1 %v1741_v22 }
  0xf1   :  { %1744 = vmatprep.subr.bf16.mxu1 %v1743_v25 }
  0xf2   :  { %1682 = vmatpush1.bf16.msra.mxu0 %v1681_v28 }
  0xf3   :  { %1684 = vmatprep.subr.bf16.mxu0 %v1683_v32 }
  0xf4   :  { %1746 = vmatpush1.bf16.msra.mxu1 %v1745_v35 }
  0xf5   :  { %1748 = vmatprep.subr.bf16.mxu1 %v1747_v38 }
  0xf6   :  { %1686 = vmatpush1.bf16.msra.mxu0 %v1685_v14 }
  0xf7   :  { %1688 = vmatprep.subr.bf16.mxu0 %v1687_v43 }
  0xf8   :  { %1750 = vmatpush1.bf16.msra.mxu1 %v1749_v10 }
  0xf9   :  { %1752 = vmatprep.subr.bf16.mxu1 %v1751_v48 }
  0xfa   :  { %1690 = vmatpush1.bf16.msra.mxu0 %v1689_v51 }
  0xfb   :  { %1692 = vmatprep.subr.bf16.mxu0 %v1691_v54 }
  0xfc   :  { %1754 = vmatpush1.bf16.msra.mxu1 %v1753_v57 }
  0xfd   :  { %1756 = vmatprep.subr.bf16.mxu1 %v1755_v60 }
  0xfe   :  { %1694 = vmatpush1.bf16.msra.mxu0 %v1693_v63 }
  0xff   :  { %1696 = vmatprep.subr.bf16.mxu0 %v1695_v2 }
 0x100   :  { %1758 = vmatpush1.bf16.msra.mxu1 %v1757_v5 }
 0x101   :  { %1760 = vmatprep.subr.bf16.mxu1 %v1759_v6 }
 0x102   :  { %1698 = vmatpush1.bf16.msra.mxu0 %v1697_v9 }
 0x104   :  { %1762 = vmatpush1.bf16.msra.mxu1 %v1761_v11 }
 0x105   :  { %1022 = vmatmul.mubr.f32.vlgmr.msra.gmra.mrb[6].mxu0 %v3019_v30 }
 0x107   :  { %1093 = vmatmul.mubr.f32.vlgmr.msra.gmra.mrb[6].mxu1 %v3019_v30 }
 0x118   :  { %v597_v12 = vpop.f32.mrb[0].mxu0 }
 0x119   :  { %v599_v13 = vpop.f32.mrb[1].mxu0 }
 0x11a   :  { %v1099_v15 = vadd.f32 %v599_v13, %v597_v12  ;;  %v668_v16 = vpop.f32.mrb[0].mxu1 }
 0x11b   :  { %v670_v17 = vpop.f32.mrb[1].mxu1 }
 0x11c   :  { %v1100_v18 = vadd.f32 %v1099_v15, %v668_v16 }
 0x11e   :  { %v1101_v19 = vadd.f32 %v1100_v18, %v670_v17 }
 0x158   :  { %v739_v20 = vpop.f32.mrb[2].mxu0 }
 0x159   :  { %v1102_v21 = vadd.f32 %v1101_v19, %v739_v20  ;;  %v741_v22 = vpop.f32.mrb[3].mxu0 }
 0x15a   :  { %v810_v23 = vpop.f32.mrb[2].mxu1 }
 0x15b   :  { %v1103_v24 = vadd.f32 %v1102_v21, %v741_v22  ;;  %v812_v25 = vpop.f32.mrb[3].mxu1 }
 0x15d   :  { %v1104_v26 = vadd.f32 %v1103_v24, %v810_v23 }
 0x15f   :  { %v1105_v27 = vadd.f32 %v1104_v26, %v812_v25 }
 0x198   :  { %v881_v28 = vpop.f32.mrb[4].mxu0 }
 0x199   :  { %v1106_v29 = vadd.f32 %v1105_v27, %v881_v28  ;;  %v883_v31 = vpop.f32.mrb[5].mxu0 }
 0x19a   :  { %v952_v32 = vpop.f32.mrb[4].mxu1 }
 0x19b   :  { %v1107_v30 = vadd.f32 %v1106_v29, %v883_v31  ;;  %v954_v33 = vpop.f32.mrb[5].mxu1  ;;  %v1770_v29 = vmov 0  }
 0x19c   :  { %1764 = vset.pattern.permute.xlu1 %v1770_v29  ;;  %1765 = vset.pattern.permute.xlu0 %v1770_v29 }
 0x19d   :  { %v1108_v34 = vadd.f32 %v1107_v30, %v952_v32 }
 0x19f   :  { %v1109_v35 = vadd.f32 %v1108_v34, %v954_v33 }
 0x1d8   :  { %v1023_v36 = vpop.f32.mrb[6].mxu0 }
 0x1d9   :  { %v1110_v37 = vadd.f32 %v1109_v35, %v1023_v36  ;;  %v1025_v38 = vpop.f32.mrb[7].mxu0 }
 0x1da   :  { %v1094_v39 = vpop.f32.mrb[6].mxu1 }
 0x1db   :  { %v1111_v40 = vadd.f32 %v1110_v37, %v1025_v38  ;;  %v1096_v14 = vpop.f32.mrb[7].mxu1 }
 0x1dd   :  { %v1112_v41 = vadd.f32 %v1111_v40, %v1094_v39 }
 0x1df   :  { %v1113_v42 = vadd.f32 %v1112_v41, %v1096_v14 }
 0x1e1   :  { %1114 = vadd.xlane.f32.xlu0 %v1113_v42 }
 0x26e   :  { %v1115_v43 = vpop.xlane.xlu0 %1114 }
 0x26f   :  { %v1117_v44 = vmul.f32 0.00048828125, %v1115_v43 }
 0x271   :  { %v3364_v45 = vsub.f32 %v597_v12, %v1117_v44  ;;  %v3366_v10 = vsub.f32 %v599_v13, %v1117_v44  ;;  %v3368_v46 = vsub.f32 %v668_v16, %v1117_v44  ;;  %v1121_v49 = vsub.f32 %v670_v17, %v1117_v44 }
 0x272   :  { %v1122_v50 = vsub.f32 %v739_v20, %v1117_v44  ;;  %v1123_v53 = vsub.f32 %v741_v22, %v1117_v44  ;;  %v1124_v56 = vsub.f32 %v810_v23, %v1117_v44  ;;  %v1125_v59 = vsub.f32 %v812_v25, %v1117_v44 }
 0x273   :  { %v1134_v47 = vmul.f32 %v3364_v45, %v3364_v45  ;;  %v1135_v48 = vmul.f32 %v3366_v10, %v3366_v10  ;;  %v1136_v51 = vmul.f32 %v3368_v46, %v3368_v46  ;;  %v1137_v54 = vmul.f32 %v1121_v49, %v1121_v49 }
 0x274   :  { %v1138_v57 = vmul.f32 %v1122_v50, %v1122_v50  ;;  %v1139_v60 = vmul.f32 %v1123_v53, %v1123_v53  ;;  %v1126_v62 = vsub.f32 %v881_v28, %v1117_v44  ;;  %v1140_v63 = vmul.f32 %v1124_v56, %v1124_v56 }
 0x275   :  { %v1150_v52 = vadd.f32 %v1135_v48, %v1134_v47  ;;  %v1127_v1 = vsub.f32 %v883_v31, %v1117_v44  ;;  %v1141_v2 = vmul.f32 %v1125_v59, %v1125_v59  ;;  %v1128_v4 = vsub.f32 %v952_v32, %v1117_v44 }
 0x276   :  { %v1142_v5 = vmul.f32 %v1126_v62, %v1126_v62  ;;  %v1129_v7 = vsub.f32 %v954_v33, %v1117_v44  ;;  %v1130_v11 = vsub.f32 %v1023_v36, %v1117_v44  ;;  %v1131_v15 = vsub.f32 %v1025_v38, %v1117_v44  ;;  %v1168_v33 = vld [vmem:[%s3435_s2] sm:$0xff] }
 0x277   :  { %v1151_v55 = vadd.f32 %v1150_v52, %v1136_v51  ;;  %v1143_v8 = vmul.f32 %v1127_v1, %v1127_v1  ;;  %v1144_v12 = vmul.f32 %v1128_v4, %v1128_v4  ;;  %v1132_v18 = vsub.f32 %v1094_v39, %v1117_v44  ;;  %v1193_v36 = vld [vmem:[%s3436_s3] sm:$0xff] }
 0x278   :  { %v1145_v16 = vmul.f32 %v1129_v7, %v1129_v7  ;;  %v1146_v19 = vmul.f32 %v1130_v11, %v1130_v11  ;;  %v1133_v21 = vsub.f32 %v1096_v14, %v1117_v44  ;;  %v1147_v22 = vmul.f32 %v1131_v15, %v1131_v15 }
 0x279   :  { %v1152_v58 = vadd.f32 %v1151_v55, %v1137_v54  ;;  %v1148_v24 = vmul.f32 %v1132_v18, %v1132_v18 }
 0x27a   :  { %v1149_v26 = vmul.f32 %v1133_v21, %v1133_v21 }
 0x27b   :  { %v1153_v61 = vadd.f32 %v1152_v58, %v1138_v57 }
 0x27d   :  { %v1154_v0 = vadd.f32 %v1153_v61, %v1139_v60 }
 0x27f   :  { %v1155_v3 = vadd.f32 %v1154_v0, %v1140_v63 }
 0x281   :  { %v1156_v6 = vadd.f32 %v1155_v3, %v1141_v2 }
 0x283   :  { %v1157_v9 = vadd.f32 %v1156_v6, %v1142_v5 }
 0x285   :  { %v1158_v13 = vadd.f32 %v1157_v9, %v1143_v8 }
 0x287   :  { %v1159_v17 = vadd.f32 %v1158_v13, %v1144_v12 }
 0x289   :  { %v1160_v20 = vadd.f32 %v1159_v17, %v1145_v16 }
 0x28b   :  { %v1161_v23 = vadd.f32 %v1160_v20, %v1146_v19 }
 0x28d   :  { %v1162_v25 = vadd.f32 %v1161_v23, %v1147_v22 }
 0x28f   :  { %v1163_v27 = vadd.f32 %v1162_v25, %v1148_v24 }
 0x291   :  { %v1164_v28 = vadd.f32 %v1163_v27, %v1149_v26 }
 0x293   :  { %1165 = vadd.xlane.f32.xlu0 %v1164_v28 }
 0x320   :  { %v1166_v31 = vpop.xlane.xlu0 %1165 }
 0x321   :  { %v1167_v32 = vmul.f32 0.00048828125, %v1166_v31 }
 0x323   :  { %v1169_v30 = vadd.f32 1e-05, %v1167_v32 }
 0x325   :  { %1766 = vrsqrt.f32 %v1169_v30 }
 0x32f   :  { %v1767_v34 = vpop.eup %1766 }
 0x330   :  { %v1171_v35 = vmul.f32 %v1767_v34, %v1168_v33 }
 0x332   :  { %1174 = vperm.xlu1 %1764, %v1171_v35  }
 0x336   :  { %1196 = vperm.xlu1 %1764, %v1193_v36  }
 0x3b1   :  { %v1175_v37 = vpop.permute.xlu1 %1174 }
 0x3b2   :  { %v1177_v38 = vmul.f32 %v1175_v37, %v3364_v45  ;;  %v1178_v39 = vmul.f32 %v1175_v37, %v3366_v10  ;;  %v1179_v40 = vmul.f32 %v1175_v37, %v3368_v46  ;;  %v1180_v14 = vmul.f32 %v1175_v37, %v1121_v49 }
 0x3b3   :  { %v1181_v41 = vmul.f32 %v1175_v37, %v1122_v50  ;;  %v1182_v42 = vmul.f32 %v1175_v37, %v1123_v53  ;;  %v1183_v43 = vmul.f32 %v1175_v37, %v1124_v56  ;;  %v1184_v44 = vmul.f32 %v1175_v37, %v1125_v59 }
 0x3b4   :  { %v1185_v47 = vmul.f32 %v1175_v37, %v1126_v62  ;;  %v1186_v48 = vmul.f32 %v1175_v37, %v1127_v1  ;;  %v1187_v51 = vmul.f32 %v1175_v37, %v1128_v4  ;;  %v1188_v52 = vmul.f32 %v1175_v37, %v1129_v7 }
 0x3b5   :  { %v1189_v54 = vmul.f32 %v1175_v37, %v1130_v11  ;;  %v1190_v55 = vmul.f32 %v1175_v37, %v1131_v15  ;;  %v1191_v57 = vmul.f32 %v1175_v37, %v1132_v18  ;;  %v1192_v58 = vmul.f32 %v1175_v37, %v1133_v21  ;;  %v1197_v60 = vpop.permute.xlu1 %1196 }
 0x3b6   :  { %v1199_v61 = vadd.f32 %v1197_v60, %v1177_v38  ;;  %v1200_v45 = vadd.f32 %v1197_v60, %v1178_v39  ;;  %v1201_v63 = vadd.f32 %v1197_v60, %v1179_v40  ;;  %v1202_v10 = vadd.f32 %v1197_v60, %v1180_v14 }
 0x3b7   :  { %v1203_v0 = vadd.f32 %v1197_v60, %v1181_v41  ;;  %v1204_v46 = vadd.f32 %v1197_v60, %v1182_v42  ;;  %v1205_v49 = vadd.f32 %v1197_v60, %v1183_v43  ;;  %v1206_v50 = vadd.f32 %v1197_v60, %v1184_v44 }
 0x3b8   :  { %v1207_v53 = vadd.f32 %v1197_v60, %v1185_v47  ;;  %v1208_v56 = vadd.f32 %v1197_v60, %v1186_v48  ;;  %v1209_v59 = vadd.f32 %v1197_v60, %v1187_v51  ;;  %v1210_v62 = vadd.f32 %v1197_v60, %v1188_v52 }
 0x3b9   :  { %v1211_v1 = vadd.f32 %v1197_v60, %v1189_v54  ;;  %v1212_v2 = vadd.f32 %v1197_v60, %v1190_v55  ;;  %v1213_v3 = vadd.f32 %v1197_v60, %v1191_v57  ;;  %v1214_v4 = vadd.f32 %v1197_v60, %v1192_v58 }
 0x3ba   :  { %v1215_v5 = vmax.f32 %v1199_v61, 0.0  ;;  %v1216_v6 = vmax.f32 %v1200_v45, 0.0  ;;  %v1217_v7 = vmax.f32 %v1201_v63, 0.0  ;;  %v1218_v8 = vmax.f32 %v1202_v10, 0.0 }
 0x3bb   :  { %v1219_v9 = vmax.f32 %v1203_v0, 0.0  ;;  %v1220_v11 = vmax.f32 %v1204_v46, 0.0  ;;  %v1221_v12 = vmax.f32 %v1205_v49, 0.0  ;;  %v1222_v13 = vmax.f32 %v1206_v50, 0.0 }
 0x3bc   :  { %v1223_v15 = vmax.f32 %v1207_v53, 0.0  ;;  %v1224_v16 = vmax.f32 %v1208_v56, 0.0  ;;  %v1225_v17 = vmax.f32 %v1209_v59, 0.0  ;;  %v1226_v18 = vmax.f32 %v1210_v62, 0.0  ;;  %1231 = vst [vmem:[%s3437_s4] sm:$0xff] %v1215_v5  ;;  %1232 = vst [vmem:[%s3437_s4 + $0x8] sm:$0xff] %v1216_v6 }
 0x3bd   :  { %1233 = vst [vmem:[%s3437_s4 + $0x10] sm:$0xff] %v1217_v7  ;;  %1234 = vst [vmem:[%s3437_s4 + $0x18] sm:$0xff] %v1218_v8  ;;  %v1227_v19 = vmax.f32 %v1211_v1, 0.0  ;;  %v1228_v20 = vmax.f32 %v1212_v2, 0.0  ;;  %v1229_v21 = vmax.f32 %v1213_v3, 0.0  ;;  %v1230_v22 = vmax.f32 %v1214_v4, 0.0 }
 0x3be   :  { %1235 = vst [vmem:[%s3437_s4 + $0x20] sm:$0xff] %v1219_v9  ;;  %1236 = vst [vmem:[%s3437_s4 + $0x28] sm:$0xff] %v1220_v11 }
 0x3bf   :  { %1237 = vst [vmem:[%s3437_s4 + $0x30] sm:$0xff] %v1221_v12  ;;  %1238 = vst [vmem:[%s3437_s4 + $0x38] sm:$0xff] %v1222_v13 }
 0x3c0   :  { %1239 = vst [vmem:[%s3437_s4 + $0x40] sm:$0xff] %v1223_v15  ;;  %1240 = vst [vmem:[%s3437_s4 + $0x48] sm:$0xff] %v1224_v16 }
 0x3c1   :  { %1241 = vst [vmem:[%s3437_s4 + $0x50] sm:$0xff] %v1225_v17  ;;  %1242 = vst [vmem:[%s3437_s4 + $0x58] sm:$0xff] %v1226_v18 }
 0x3c2   :  { %1243 = vst [vmem:[%s3437_s4 + $0x60] sm:$0xff] %v1227_v19  ;;  %1244 = vst [vmem:[%s3437_s4 + $0x68] sm:$0xff] %v1228_v20 }
 0x3c3   :  { %1245 = vst [vmem:[%s3437_s4 + $0x70] sm:$0xff] %v1229_v21  ;;  %1246 = vst [vmem:[%s3437_s4 + $0x78] sm:$0xff] %v1230_v22 }

// kernel: generator_forward.9
= control target key start
LH: loop header
LB: loop body
LE: loop exit
PB: predicated region body
PF: predicated region fallthrough
CT: control target
= control target key end

     0   :  { %s1986_s9 = smov 0   ;;  %s1988_s10 = smov 0   ;;  %s2843_s0 = inlined_call_operand.vmem [shape: f32[3,128], index: 0, kind: input, shape index: {}]   ;;  %s2844_s1 = inlined_call_operand.vmem [shape: f32[128,8192], index: 1, kind: input, shape index: {}]   ;;  %s2845_s2 = inlined_call_operand.vmem [shape: f32[3,8192], index: 2, kind: output, shape index: {}]  }
   0x1   :  { %s1990_s11 = smov 0  }
   0x2 LB: > { %s1619_s12 = sadd.s32 4294967295, %s1968_s11   ;;  %s2003_s13 = sadd.s32 1, %s1968_s11   ;;  %s1968_s11 = sphi %s1990_s11, %s2848_s11   ;;  %s1964_s10 = sphi %s1988_s10, %s2847_s10   ;;  %s1960_s9 = sphi %s1986_s9, %s2846_s9  }
   0x3   : > { %s37_s14 = ssub.s32 %s1968_s11, %s2003_s13  ;;  %s40_s15 = sadd.s32 1, %s1964_s10 }
   0x4   : > { %p38_p0 = scmp.eq.s32.totalorder %s37_s14, 0  ;;  %p47_p1 = scmp.ne.s32.totalorder %s1964_s10, %s1960_s9 }
   0x5   : > { %p48_p2 = scmp.eq.s32.totalorder %s1968_s11, 0  ;;  %p1622_p4 = scmp.ge.s32.totalorder %s1968_s11, 4 }
   0x6   : > { %s2012_s16 = scalar_select %p38_p0, %s1964_s10, %s40_s15  }
   0x7   : > { %p49_p3 = por %p48_p2, %p47_p1  ;;  %102 = sbr.rel (%p1622_p4) target bundleno = 146 (0x92), region = 20 }
   0xe   : > { %105 = sbr.rel (!%p49_p3) target bundleno = 146 (0x92), region = 24  ;;  %s107_s17 = sand.u32 (%p49_p3), 1, %s1964_s10  }
   0xf   : > { %s1632_s18 = sshll.u32 (%p49_p3), %s1968_s11, 7  ;;  %s1623_s19 = sshll.u32 (%p49_p3), %s107_s17, 11 }
  0x10   : > { %s2020_s22 = scalar_lea.vmem (%p49_p3), %s2844_s1, %s1632_s18  ;;  %s2025_s23 = scalar_lea.vmem (%p49_p3), [#allocation2], %s1623_s19 }
  0x11   : > { %v125_v0 = vld [vmem:[%s2020_s22] sm:$0xff] (%p49_p3)  ;;  %v127_v1 = vld [vmem:[%s2020_s22 + $0x8] sm:$0xff] (%p49_p3)  ;;  %v129_v2 = vld [vmem:[%s2020_s22 + $0x10] sm:$0xff] (%p49_p3) }
  0x12   : > { %126 = vst [vmem:[%s2025_s23] sm:$0xff] (%p49_p3), %v125_v0  ;;  %128 = vst [vmem:[%s2025_s23 + $0x8] sm:$0xff] (%p49_p3), %v127_v1  ;;  %v131_v3 = vld [vmem:[%s2020_s22 + $0x18] sm:$0xff] (%p49_p3)  ;;  %v133_v4 = vld [vmem:[%s2020_s22 + $0x20] sm:$0xff] (%p49_p3) }
  0x13   : > { %130 = vst [vmem:[%s2025_s23 + $0x10] sm:$0xff] (%p49_p3), %v129_v2  ;;  %v135_v5 = vld [vmem:[%s2020_s22 + $0x28] sm:$0xff] (%p49_p3)  ;;  %132 = vst [vmem:[%s2025_s23 + $0x18] sm:$0xff] (%p49_p3), %v131_v3  ;;  %v137_v6 = vld [vmem:[%s2020_s22 + $0x30] sm:$0xff] (%p49_p3) }
  0x14   : > { %134 = vst [vmem:[%s2025_s23 + $0x20] sm:$0xff] (%p49_p3), %v133_v4  ;;  %136 = vst [vmem:[%s2025_s23 + $0x28] sm:$0xff] (%p49_p3), %v135_v5  ;;  %v139_v7 = vld [vmem:[%s2020_s22 + $0x38] sm:$0xff] (%p49_p3)  ;;  %v141_v8 = vld [vmem:[%s2020_s22 + $0x40] sm:$0xff] (%p49_p3) }
  0x15   : > { %138 = vst [vmem:[%s2025_s23 + $0x30] sm:$0xff] %v137_v6  ;;  %140 = vst [vmem:[%s2025_s23 + $0x38] sm:$0xff] %v139_v7  ;;  %v143_v9 = vld [vmem:[%s2020_s22 + $0x48] sm:$0xff]  ;;  %v145_v10 = vld [vmem:[%s2020_s22 + $0x50] sm:$0xff] }
  0x16   : > { %142 = vst [vmem:[%s2025_s23 + $0x40] sm:$0xff] %v141_v8  ;;  %v147_v11 = vld [vmem:[%s2020_s22 + $0x58] sm:$0xff]  ;;  %144 = vst [vmem:[%s2025_s23 + $0x48] sm:$0xff] %v143_v9  ;;  %v149_v12 = vld [vmem:[%s2020_s22 + $0x60] sm:$0xff] }
  0x17   : > { %146 = vst [vmem:[%s2025_s23 + $0x50] sm:$0xff] %v145_v10  ;;  %148 = vst [vmem:[%s2025_s23 + $0x58] sm:$0xff] %v147_v11  ;;  %v151_v13 = vld [vmem:[%s2020_s22 + $0x68] sm:$0xff]  ;;  %v153_v14 = vld [vmem:[%s2020_s22 + $0x70] sm:$0xff] }
  0x18   : > { %150 = vst [vmem:[%s2025_s23 + $0x60] sm:$0xff] %v149_v12  ;;  %152 = vst [vmem:[%s2025_s23 + $0x68] sm:$0xff] %v151_v13  ;;  %v155_v15 = vld [vmem:[%s2020_s22 + $0x78] sm:$0xff]  ;;  %v157_v16 = vld [vmem:[%s2020_s22 + $0x200] sm:$0xff] }
  0x19   : > { %154 = vst [vmem:[%s2025_s23 + $0x70] sm:$0xff] %v153_v14  ;;  %v159_v17 = vld [vmem:[%s2020_s22 + $0x208] sm:$0xff]  ;;  %156 = vst [vmem:[%s2025_s23 + $0x78] sm:$0xff] %v155_v15  ;;  %v161_v18 = vld [vmem:[%s2020_s22 + $0x210] sm:$0xff] }
  0x1a   : > { %158 = vst [vmem:[%s2025_s23 + $0x80] sm:$0xff] %v157_v16  ;;  %160 = vst [vmem:[%s2025_s23 + $0x88] sm:$0xff] %v159_v17  ;;  %v163_v19 = vld [vmem:[%s2020_s22 + $0x218] sm:$0xff]  ;;  %v165_v20 = vld [vmem:[%s2020_s22 + $0x220] sm:$0xff] }
  0x1b   : > { %162 = vst [vmem:[%s2025_s23 + $0x90] sm:$0xff] %v161_v18  ;;  %164 = vst [vmem:[%s2025_s23 + $0x98] sm:$0xff] %v163_v19  ;;  %v167_v21 = vld [vmem:[%s2020_s22 + $0x228] sm:$0xff]  ;;  %v169_v22 = vld [vmem:[%s2020_s22 + $0x230] sm:$0xff] }
  0x1c   : > { %166 = vst [vmem:[%s2025_s23 + $0xa0] sm:$0xff] %v165_v20  ;;  %v171_v23 = vld [vmem:[%s2020_s22 + $0x238] sm:$0xff]  ;;  %168 = vst [vmem:[%s2025_s23 + $0xa8] sm:$0xff] %v167_v21  ;;  %v173_v24 = vld [vmem:[%s2020_s22 + $0x240] sm:$0xff] }
  0x1d   : > { %170 = vst [vmem:[%s2025_s23 + $0xb0] sm:$0xff] %v169_v22  ;;  %172 = vst [vmem:[%s2025_s23 + $0xb8] sm:$0xff] %v171_v23  ;;  %v175_v25 = vld [vmem:[%s2020_s22 + $0x248] sm:$0xff]  ;;  %v177_v26 = vld [vmem:[%s2020_s22 + $0x250] sm:$0xff] }
  0x1e   : > { %174 = vst [vmem:[%s2025_s23 + $0xc0] sm:$0xff] %v173_v24  ;;  %176 = vst [vmem:[%s2025_s23 + $0xc8] sm:$0xff] %v175_v25  ;;  %v179_v27 = vld [vmem:[%s2020_s22 + $0x258] sm:$0xff]  ;;  %v181_v28 = vld [vmem:[%s2020_s22 + $0x260] sm:$0xff] }
  0x1f   : > { %178 = vst [vmem:[%s2025_s23 + $0xd0] sm:$0xff] %v177_v26  ;;  %v183_v29 = vld [vmem:[%s2020_s22 + $0x268] sm:$0xff]  ;;  %180 = vst [vmem:[%s2025_s23 + $0xd8] sm:$0xff] %v179_v27  ;;  %v185_v30 = vld [vmem:[%s2020_s22 + $0x270] sm:$0xff] }
  0x20   : > { %182 = vst [vmem:[%s2025_s23 + $0xe0] sm:$0xff] %v181_v28  ;;  %184 = vst [vmem:[%s2025_s23 + $0xe8] sm:$0xff] %v183_v29  ;;  %v187_v31 = vld [vmem:[%s2020_s22 + $0x278] sm:$0xff]  ;;  %v189_v32 = vld [vmem:[%s2020_s22 + $0x400] sm:$0xff] }
  0x21   : > { %186 = vst [vmem:[%s2025_s23 + $0xf0] sm:$0xff] %v185_v30  ;;  %188 = vst [vmem:[%s2025_s23 + $0xf8] sm:$0xff] %v187_v31  ;;  %v191_v33 = vld [vmem:[%s2020_s22 + $0x408] sm:$0xff]  ;;  %v193_v34 = vld [vmem:[%s2020_s22 + $0x410] sm:$0xff] }
  0x22   : > { %190 = vst [vmem:[%s2025_s23 + $0x100] sm:$0xff] %v189_v32  ;;  %v195_v35 = vld [vmem:[%s2020_s22 + $0x418] sm:$0xff]  ;;  %192 = vst [vmem:[%s2025_s23 + $0x108] sm:$0xff] %v191_v33  ;;  %v197_v36 = vld [vmem:[%s2020_s22 + $0x420] sm:$0xff] }
  0x23   : > { %194 = vst [vmem:[%s2025_s23 + $0x110] sm:$0xff] %v193_v34  ;;  %196 = vst [vmem:[%s2025_s23 + $0x118] sm:$0xff] %v195_v35  ;;  %v199_v37 = vld [vmem:[%s2020_s22 + $0x428] sm:$0xff]  ;;  %v201_v38 = vld [vmem:[%s2020_s22 + $0x430] sm:$0xff] }
  0x24   : > { %198 = vst [vmem:[%s2025_s23 + $0x120] sm:$0xff] %v197_v36  ;;  %200 = vst [vmem:[%s2025_s23 + $0x128] sm:$0xff] %v199_v37  ;;  %v203_v39 = vld [vmem:[%s2020_s22 + $0x438] sm:$0xff]  ;;  %v205_v40 = vld [vmem:[%s2020_s22 + $0x440] sm:$0xff] }
  0x25   : > { %202 = vst [vmem:[%s2025_s23 + $0x130] sm:$0xff] %v201_v38  ;;  %v207_v41 = vld [vmem:[%s2020_s22 + $0x448] sm:$0xff]  ;;  %204 = vst [vmem:[%s2025_s23 + $0x138] sm:$0xff] %v203_v39  ;;  %v209_v42 = vld [vmem:[%s2020_s22 + $0x450] sm:$0xff] }
  0x26   : > { %206 = vst [vmem:[%s2025_s23 + $0x140] sm:$0xff] %v205_v40  ;;  %208 = vst [vmem:[%s2025_s23 + $0x148] sm:$0xff] %v207_v41  ;;  %v211_v43 = vld [vmem:[%s2020_s22 + $0x458] sm:$0xff]  ;;  %v213_v44 = vld [vmem:[%s2020_s22 + $0x460] sm:$0xff] }
  0x27   : > { %210 = vst [vmem:[%s2025_s23 + $0x150] sm:$0xff] %v209_v42  ;;  %212 = vst [vmem:[%s2025_s23 + $0x158] sm:$0xff] %v211_v43  ;;  %v215_v45 = vld [vmem:[%s2020_s22 + $0x468] sm:$0xff]  ;;  %v217_v46 = vld [vmem:[%s2020_s22 + $0x470] sm:$0xff] }
  0x28   : > { %214 = vst [vmem:[%s2025_s23 + $0x160] sm:$0xff] %v213_v44  ;;  %v219_v47 = vld [vmem:[%s2020_s22 + $0x478] sm:$0xff]  ;;  %216 = vst [vmem:[%s2025_s23 + $0x168] sm:$0xff] %v215_v45  ;;  %v221_v48 = vld [vmem:[%s2020_s22 + $0x600] sm:$0xff] }
  0x29   : > { %218 = vst [vmem:[%s2025_s23 + $0x170] sm:$0xff] %v217_v46  ;;  %220 = vst [vmem:[%s2025_s23 + $0x178] sm:$0xff] %v219_v47  ;;  %v223_v49 = vld [vmem:[%s2020_s22 + $0x608] sm:$0xff]  ;;  %v225_v50 = vld [vmem:[%s2020_s22 + $0x610] sm:$0xff] }
  0x2a   : > { %222 = vst [vmem:[%s2025_s23 + $0x180] sm:$0xff] %v221_v48  ;;  %224 = vst [vmem:[%s2025_s23 + $0x188] sm:$0xff] %v223_v49  ;;  %v227_v51 = vld [vmem:[%s2020_s22 + $0x618] sm:$0xff]  ;;  %v229_v52 = vld [vmem:[%s2020_s22 + $0x620] sm:$0xff] }
  0x2b   : > { %226 = vst [vmem:[%s2025_s23 + $0x190] sm:$0xff] %v225_v50  ;;  %v231_v53 = vld [vmem:[%s2020_s22 + $0x628] sm:$0xff]  ;;  %228 = vst [vmem:[%s2025_s23 + $0x198] sm:$0xff] %v227_v51  ;;  %v233_v54 = vld [vmem:[%s2020_s22 + $0x630] sm:$0xff] }
  0x2c   : > { %230 = vst [vmem:[%s2025_s23 + $0x1a0] sm:$0xff] %v229_v52  ;;  %232 = vst [vmem:[%s2025_s23 + $0x1a8] sm:$0xff] %v231_v53  ;;  %v235_v55 = vld [vmem:[%s2020_s22 + $0x638] sm:$0xff]  ;;  %v237_v56 = vld [vmem:[%s2020_s22 + $0x640] sm:$0xff] }
  0x2d   : > { %234 = vst [vmem:[%s2025_s23 + $0x1b0] sm:$0xff] %v233_v54  ;;  %236 = vst [vmem:[%s2025_s23 + $0x1b8] sm:$0xff] %v235_v55  ;;  %v239_v57 = vld [vmem:[%s2020_s22 + $0x648] sm:$0xff]  ;;  %v241_v58 = vld [vmem:[%s2020_s22 + $0x650] sm:$0xff] }
  0x2e   : > { %238 = vst [vmem:[%s2025_s23 + $0x1c0] sm:$0xff] %v237_v56  ;;  %v243_v59 = vld [vmem:[%s2020_s22 + $0x658] sm:$0xff]  ;;  %240 = vst [vmem:[%s2025_s23 + $0x1c8] sm:$0xff] %v239_v57  ;;  %v245_v60 = vld [vmem:[%s2020_s22 + $0x660] sm:$0xff] }
  0x2f   : > { %242 = vst [vmem:[%s2025_s23 + $0x1d0] sm:$0xff] %v241_v58  ;;  %244 = vst [vmem:[%s2025_s23 + $0x1d8] sm:$0xff] %v243_v59  ;;  %v247_v61 = vld [vmem:[%s2020_s22 + $0x668] sm:$0xff]  ;;  %v249_v62 = vld [vmem:[%s2020_s22 + $0x670] sm:$0xff] }
  0x30   : > { %246 = vst [vmem:[%s2025_s23 + $0x1e0] sm:$0xff] %v245_v60  ;;  %248 = vst [vmem:[%s2025_s23 + $0x1e8] sm:$0xff] %v247_v61  ;;  %v251_v63 = vld [vmem:[%s2020_s22 + $0x678] sm:$0xff]  ;;  %v253_v0 = vld [vmem:[%s2020_s22 + $0x800] sm:$0xff] }
  0x31   : > { %250 = vst [vmem:[%s2025_s23 + $0x1f0] sm:$0xff] %v249_v62  ;;  %v255_v1 = vld [vmem:[%s2020_s22 + $0x808] sm:$0xff]  ;;  %252 = vst [vmem:[%s2025_s23 + $0x1f8] sm:$0xff] %v251_v63  ;;  %v257_v2 = vld [vmem:[%s2020_s22 + $0x810] sm:$0xff] }
  0x32   : > { %254 = vst [vmem:[%s2025_s23 + $0x200] sm:$0xff] %v253_v0  ;;  %256 = vst [vmem:[%s2025_s23 + $0x208] sm:$0xff] %v255_v1  ;;  %v259_v3 = vld [vmem:[%s2020_s22 + $0x818] sm:$0xff]  ;;  %v261_v4 = vld [vmem:[%s2020_s22 + $0x820] sm:$0xff] }
  0x33   : > { %258 = vst [vmem:[%s2025_s23 + $0x210] sm:$0xff] %v257_v2  ;;  %260 = vst [vmem:[%s2025_s23 + $0x218] sm:$0xff] %v259_v3  ;;  %v263_v5 = vld [vmem:[%s2020_s22 + $0x828] sm:$0xff]  ;;  %v265_v6 = vld [vmem:[%s2020_s22 + $0x830] sm:$0xff] }
  0x34   : > { %262 = vst [vmem:[%s2025_s23 + $0x220] sm:$0xff] %v261_v4  ;;  %v267_v7 = vld [vmem:[%s2020_s22 + $0x838] sm:$0xff]  ;;  %264 = vst [vmem:[%s2025_s23 + $0x228] sm:$0xff] %v263_v5  ;;  %v269_v8 = vld [vmem:[%s2020_s22 + $0x840] sm:$0xff] }
  0x35   : > { %266 = vst [vmem:[%s2025_s23 + $0x230] sm:$0xff] %v265_v6  ;;  %268 = vst [vmem:[%s2025_s23 + $0x238] sm:$0xff] %v267_v7  ;;  %v271_v9 = vld [vmem:[%s2020_s22 + $0x848] sm:$0xff]  ;;  %v273_v10 = vld [vmem:[%s2020_s22 + $0x850] sm:$0xff] }
  0x36   : > { %270 = vst [vmem:[%s2025_s23 + $0x240] sm:$0xff] %v269_v8  ;;  %272 = vst [vmem:[%s2025_s23 + $0x248] sm:$0xff] %v271_v9  ;;  %v275_v11 = vld [vmem:[%s2020_s22 + $0x858] sm:$0xff]  ;;  %v277_v12 = vld [vmem:[%s2020_s22 + $0x860] sm:$0xff] }
  0x37   : > { %274 = vst [vmem:[%s2025_s23 + $0x250] sm:$0xff] %v273_v10  ;;  %v279_v13 = vld [vmem:[%s2020_s22 + $0x868] sm:$0xff]  ;;  %276 = vst [vmem:[%s2025_s23 + $0x258] sm:$0xff] %v275_v11  ;;  %v281_v14 = vld [vmem:[%s2020_s22 + $0x870] sm:$0xff] }
  0x38   : > { %278 = vst [vmem:[%s2025_s23 + $0x260] sm:$0xff] %v277_v12  ;;  %280 = vst [vmem:[%s2025_s23 + $0x268] sm:$0xff] %v279_v13  ;;  %v283_v15 = vld [vmem:[%s2020_s22 + $0x878] sm:$0xff]  ;;  %v285_v16 = vld [vmem:[%s2020_s22 + $0xa00] sm:$0xff] }
  0x39   : > { %282 = vst [vmem:[%s2025_s23 + $0x270] sm:$0xff] %v281_v14  ;;  %284 = vst [vmem:[%s2025_s23 + $0x278] sm:$0xff] %v283_v15  ;;  %v287_v17 = vld [vmem:[%s2020_s22 + $0xa08] sm:$0xff]  ;;  %v289_v18 = vld [vmem:[%s2020_s22 + $0xa10] sm:$0xff] }
  0x3a   : > { %286 = vst [vmem:[%s2025_s23 + $0x280] sm:$0xff] %v285_v16  ;;  %v291_v19 = vld [vmem:[%s2020_s22 + $0xa18] sm:$0xff]  ;;  %288 = vst [vmem:[%s2025_s23 + $0x288] sm:$0xff] %v287_v17  ;;  %v293_v20 = vld [vmem:[%s2020_s22 + $0xa20] sm:$0xff] }
  0x3b   : > { %290 = vst [vmem:[%s2025_s23 + $0x290] sm:$0xff] %v289_v18  ;;  %292 = vst [vmem:[%s2025_s23 + $0x298] sm:$0xff] %v291_v19  ;;  %v295_v21 = vld [vmem:[%s2020_s22 + $0xa28] sm:$0xff]  ;;  %v297_v22 = vld [vmem:[%s2020_s22 + $0xa30] sm:$0xff] }
  0x3c   : > { %294 = vst [vmem:[%s2025_s23 + $0x2a0] sm:$0xff] %v293_v20  ;;  %296 = vst [vmem:[%s2025_s23 + $0x2a8] sm:$0xff] %v295_v21  ;;  %v299_v23 = vld [vmem:[%s2020_s22 + $0xa38] sm:$0xff]  ;;  %v301_v24 = vld [vmem:[%s2020_s22 + $0xa40] sm:$0xff] }
  0x3d   : > { %298 = vst [vmem:[%s2025_s23 + $0x2b0] sm:$0xff] %v297_v22  ;;  %v303_v25 = vld [vmem:[%s2020_s22 + $0xa48] sm:$0xff]  ;;  %300 = vst [vmem:[%s2025_s23 + $0x2b8] sm:$0xff] %v299_v23  ;;  %v305_v26 = vld [vmem:[%s2020_s22 + $0xa50] sm:$0xff] }
  0x3e   : > { %302 = vst [vmem:[%s2025_s23 + $0x2c0] sm:$0xff] %v301_v24  ;;  %304 = vst [vmem:[%s2025_s23 + $0x2c8] sm:$0xff] %v303_v25  ;;  %v307_v27 = vld [vmem:[%s2020_s22 + $0xa58] sm:$0xff]  ;;  %v309_v28 = vld [vmem:[%s2020_s22 + $0xa60] sm:$0xff] }
  0x3f   : > { %306 = vst [vmem:[%s2025_s23 + $0x2d0] sm:$0xff] %v305_v26  ;;  %308 = vst [vmem:[%s2025_s23 + $0x2d8] sm:$0xff] %v307_v27  ;;  %v311_v29 = vld [vmem:[%s2020_s22 + $0xa68] sm:$0xff]  ;;  %v313_v30 = vld [vmem:[%s2020_s22 + $0xa70] sm:$0xff] }
  0x40   : > { %310 = vst [vmem:[%s2025_s23 + $0x2e0] sm:$0xff] %v309_v28  ;;  %v315_v31 = vld [vmem:[%s2020_s22 + $0xa78] sm:$0xff]  ;;  %312 = vst [vmem:[%s2025_s23 + $0x2e8] sm:$0xff] %v311_v29  ;;  %v317_v32 = vld [vmem:[%s2020_s22 + $0xc00] sm:$0xff] }
  0x41   : > { %314 = vst [vmem:[%s2025_s23 + $0x2f0] sm:$0xff] %v313_v30  ;;  %316 = vst [vmem:[%s2025_s23 + $0x2f8] sm:$0xff] %v315_v31  ;;  %v319_v33 = vld [vmem:[%s2020_s22 + $0xc08] sm:$0xff]  ;;  %v321_v34 = vld [vmem:[%s2020_s22 + $0xc10] sm:$0xff] }
  0x42   : > { %318 = vst [vmem:[%s2025_s23 + $0x300] sm:$0xff] %v317_v32  ;;  %320 = vst [vmem:[%s2025_s23 + $0x308] sm:$0xff] %v319_v33  ;;  %v323_v35 = vld [vmem:[%s2020_s22 + $0xc18] sm:$0xff]  ;;  %v325_v36 = vld [vmem:[%s2020_s22 + $0xc20] sm:$0xff] }
  0x43   : > { %322 = vst [vmem:[%s2025_s23 + $0x310] sm:$0xff] %v321_v34  ;;  %v327_v37 = vld [vmem:[%s2020_s22 + $0xc28] sm:$0xff]  ;;  %324 = vst [vmem:[%s2025_s23 + $0x318] sm:$0xff] %v323_v35  ;;  %v329_v38 = vld [vmem:[%s2020_s22 + $0xc30] sm:$0xff] }
  0x44   : > { %326 = vst [vmem:[%s2025_s23 + $0x320] sm:$0xff] %v325_v36  ;;  %328 = vst [vmem:[%s2025_s23 + $0x328] sm:$0xff] %v327_v37  ;;  %v331_v39 = vld [vmem:[%s2020_s22 + $0xc38] sm:$0xff]  ;;  %v333_v40 = vld [vmem:[%s2020_s22 + $0xc40] sm:$0xff] }
  0x45   : > { %330 = vst [vmem:[%s2025_s23 + $0x330] sm:$0xff] %v329_v38  ;;  %332 = vst [vmem:[%s2025_s23 + $0x338] sm:$0xff] %v331_v39  ;;  %v335_v41 = vld [vmem:[%s2020_s22 + $0xc48] sm:$0xff]  ;;  %v337_v42 = vld [vmem:[%s2020_s22 + $0xc50] sm:$0xff] }
  0x46   : > { %334 = vst [vmem:[%s2025_s23 + $0x340] sm:$0xff] %v333_v40  ;;  %v339_v43 = vld [vmem:[%s2020_s22 + $0xc58] sm:$0xff]  ;;  %336 = vst [vmem:[%s2025_s23 + $0x348] sm:$0xff] %v335_v41  ;;  %v341_v44 = vld [vmem:[%s2020_s22 + $0xc60] sm:$0xff] }
  0x47   : > { %338 = vst [vmem:[%s2025_s23 + $0x350] sm:$0xff] %v337_v42  ;;  %340 = vst [vmem:[%s2025_s23 + $0x358] sm:$0xff] %v339_v43  ;;  %v343_v45 = vld [vmem:[%s2020_s22 + $0xc68] sm:$0xff]  ;;  %v345_v46 = vld [vmem:[%s2020_s22 + $0xc70] sm:$0xff] }
  0x48   : > { %342 = vst [vmem:[%s2025_s23 + $0x360] sm:$0xff] %v341_v44  ;;  %344 = vst [vmem:[%s2025_s23 + $0x368] sm:$0xff] %v343_v45  ;;  %v347_v47 = vld [vmem:[%s2020_s22 + $0xc78] sm:$0xff]  ;;  %v349_v48 = vld [vmem:[%s2020_s22 + $0xe00] sm:$0xff] }
  0x49   : > { %346 = vst [vmem:[%s2025_s23 + $0x370] sm:$0xff] %v345_v46  ;;  %v351_v49 = vld [vmem:[%s2020_s22 + $0xe08] sm:$0xff]  ;;  %348 = vst [vmem:[%s2025_s23 + $0x378] sm:$0xff] %v347_v47  ;;  %v353_v50 = vld [vmem:[%s2020_s22 + $0xe10] sm:$0xff] }
  0x4a   : > { %350 = vst [vmem:[%s2025_s23 + $0x380] sm:$0xff] %v349_v48  ;;  %352 = vst [vmem:[%s2025_s23 + $0x388] sm:$0xff] %v351_v49  ;;  %v355_v51 = vld [vmem:[%s2020_s22 + $0xe18] sm:$0xff]  ;;  %v357_v52 = vld [vmem:[%s2020_s22 + $0xe20] sm:$0xff] }
  0x4b   : > { %354 = vst [vmem:[%s2025_s23 + $0x390] sm:$0xff] %v353_v50  ;;  %356 = vst [vmem:[%s2025_s23 + $0x398] sm:$0xff] %v355_v51  ;;  %v359_v53 = vld [vmem:[%s2020_s22 + $0xe28] sm:$0xff]  ;;  %v361_v54 = vld [vmem:[%s2020_s22 + $0xe30] sm:$0xff] }
  0x4c   : > { %358 = vst [vmem:[%s2025_s23 + $0x3a0] sm:$0xff] %v357_v52  ;;  %v363_v55 = vld [vmem:[%s2020_s22 + $0xe38] sm:$0xff]  ;;  %360 = vst [vmem:[%s2025_s23 + $0x3a8] sm:$0xff] %v359_v53  ;;  %v365_v56 = vld [vmem:[%s2020_s22 + $0xe40] sm:$0xff] }
  0x4d   : > { %362 = vst [vmem:[%s2025_s23 + $0x3b0] sm:$0xff] %v361_v54  ;;  %364 = vst [vmem:[%s2025_s23 + $0x3b8] sm:$0xff] %v363_v55  ;;  %v367_v57 = vld [vmem:[%s2020_s22 + $0xe48] sm:$0xff]  ;;  %v369_v58 = vld [vmem:[%s2020_s22 + $0xe50] sm:$0xff] }
  0x4e   : > { %366 = vst [vmem:[%s2025_s23 + $0x3c0] sm:$0xff] %v365_v56  ;;  %368 = vst [vmem:[%s2025_s23 + $0x3c8] sm:$0xff] %v367_v57  ;;  %v371_v59 = vld [vmem:[%s2020_s22 + $0xe58] sm:$0xff]  ;;  %v373_v60 = vld [vmem:[%s2020_s22 + $0xe60] sm:$0xff] }
  0x4f   : > { %370 = vst [vmem:[%s2025_s23 + $0x3d0] sm:$0xff] %v369_v58  ;;  %v375_v61 = vld [vmem:[%s2020_s22 + $0xe68] sm:$0xff]  ;;  %372 = vst [vmem:[%s2025_s23 + $0x3d8] sm:$0xff] %v371_v59  ;;  %v377_v62 = vld [vmem:[%s2020_s22 + $0xe70] sm:$0xff] }
  0x50   : > { %374 = vst [vmem:[%s2025_s23 + $0x3e0] sm:$0xff] %v373_v60  ;;  %376 = vst [vmem:[%s2025_s23 + $0x3e8] sm:$0xff] %v375_v61  ;;  %v379_v63 = vld [vmem:[%s2020_s22 + $0xe78] sm:$0xff]  ;;  %v381_v0 = vld [vmem:[%s2020_s22 + $0x1000] sm:$0xff] }
  0x51   : > { %378 = vst [vmem:[%s2025_s23 + $0x3f0] sm:$0xff] %v377_v62  ;;  %380 = vst [vmem:[%s2025_s23 + $0x3f8] sm:$0xff] %v379_v63  ;;  %v383_v1 = vld [vmem:[%s2020_s22 + $0x1008] sm:$0xff]  ;;  %v385_v2 = vld [vmem:[%s2020_s22 + $0x1010] sm:$0xff] }
  0x52   : > { %382 = vst [vmem:[%s2025_s23 + $0x400] sm:$0xff] %v381_v0  ;;  %v387_v3 = vld [vmem:[%s2020_s22 + $0x1018] sm:$0xff]  ;;  %384 = vst [vmem:[%s2025_s23 + $0x408] sm:$0xff] %v383_v1  ;;  %v389_v4 = vld [vmem:[%s2020_s22 + $0x1020] sm:$0xff] }
  0x53   : > { %386 = vst [vmem:[%s2025_s23 + $0x410] sm:$0xff] %v385_v2  ;;  %388 = vst [vmem:[%s2025_s23 + $0x418] sm:$0xff] %v387_v3  ;;  %v391_v5 = vld [vmem:[%s2020_s22 + $0x1028] sm:$0xff]  ;;  %v393_v6 = vld [vmem:[%s2020_s22 + $0x1030] sm:$0xff] }
  0x54   : > { %390 = vst [vmem:[%s2025_s23 + $0x420] sm:$0xff] %v389_v4  ;;  %392 = vst [vmem:[%s2025_s23 + $0x428] sm:$0xff] %v391_v5  ;;  %v395_v7 = vld [vmem:[%s2020_s22 + $0x1038] sm:$0xff]  ;;  %v397_v8 = vld [vmem:[%s2020_s22 + $0x1040] sm:$0xff] }
  0x55   : > { %394 = vst [vmem:[%s2025_s23 + $0x430] sm:$0xff] %v393_v6  ;;  %v399_v9 = vld [vmem:[%s2020_s22 + $0x1048] sm:$0xff]  ;;  %396 = vst [vmem:[%s2025_s23 + $0x438] sm:$0xff] %v395_v7  ;;  %v401_v10 = vld [vmem:[%s2020_s22 + $0x1050] sm:$0xff] }
  0x56   : > { %398 = vst [vmem:[%s2025_s23 + $0x440] sm:$0xff] %v397_v8  ;;  %400 = vst [vmem:[%s2025_s23 + $0x448] sm:$0xff] %v399_v9  ;;  %v403_v11 = vld [vmem:[%s2020_s22 + $0x1058] sm:$0xff]  ;;  %v405_v12 = vld [vmem:[%s2020_s22 + $0x1060] sm:$0xff] }
  0x57   : > { %402 = vst [vmem:[%s2025_s23 + $0x450] sm:$0xff] %v401_v10  ;;  %404 = vst [vmem:[%s2025_s23 + $0x458] sm:$0xff] %v403_v11  ;;  %v407_v13 = vld [vmem:[%s2020_s22 + $0x1068] sm:$0xff]  ;;  %v409_v14 = vld [vmem:[%s2020_s22 + $0x1070] sm:$0xff] }
  0x58   : > { %406 = vst [vmem:[%s2025_s23 + $0x460] sm:$0xff] %v405_v12  ;;  %v411_v15 = vld [vmem:[%s2020_s22 + $0x1078] sm:$0xff]  ;;  %408 = vst [vmem:[%s2025_s23 + $0x468] sm:$0xff] %v407_v13  ;;  %v413_v16 = vld [vmem:[%s2020_s22 + $0x1200] sm:$0xff] }
  0x59   : > { %410 = vst [vmem:[%s2025_s23 + $0x470] sm:$0xff] %v409_v14  ;;  %412 = vst [vmem:[%s2025_s23 + $0x478] sm:$0xff] %v411_v15  ;;  %v415_v17 = vld [vmem:[%s2020_s22 + $0x1208] sm:$0xff]  ;;  %v417_v18 = vld [vmem:[%s2020_s22 + $0x1210] sm:$0xff] }
  0x5a   : > { %414 = vst [vmem:[%s2025_s23 + $0x480] sm:$0xff] %v413_v16  ;;  %416 = vst [vmem:[%s2025_s23 + $0x488] sm:$0xff] %v415_v17  ;;  %v419_v19 = vld [vmem:[%s2020_s22 + $0x1218] sm:$0xff]  ;;  %v421_v20 = vld [vmem:[%s2020_s22 + $0x1220] sm:$0xff] }
  0x5b   : > { %418 = vst [vmem:[%s2025_s23 + $0x490] sm:$0xff] %v417_v18  ;;  %v423_v21 = vld [vmem:[%s2020_s22 + $0x1228] sm:$0xff]  ;;  %420 = vst [vmem:[%s2025_s23 + $0x498] sm:$0xff] %v419_v19  ;;  %v425_v22 = vld [vmem:[%s2020_s22 + $0x1230] sm:$0xff] }
  0x5c   : > { %422 = vst [vmem:[%s2025_s23 + $0x4a0] sm:$0xff] %v421_v20  ;;  %424 = vst [vmem:[%s2025_s23 + $0x4a8] sm:$0xff] %v423_v21  ;;  %v427_v23 = vld [vmem:[%s2020_s22 + $0x1238] sm:$0xff]  ;;  %v429_v24 = vld [vmem:[%s2020_s22 + $0x1240] sm:$0xff] }
  0x5d   : > { %426 = vst [vmem:[%s2025_s23 + $0x4b0] sm:$0xff] %v425_v22  ;;  %428 = vst [vmem:[%s2025_s23 + $0x4b8] sm:$0xff] %v427_v23  ;;  %v431_v25 = vld [vmem:[%s2020_s22 + $0x1248] sm:$0xff]  ;;  %v433_v26 = vld [vmem:[%s2020_s22 + $0x1250] sm:$0xff] }
  0x5e   : > { %430 = vst [vmem:[%s2025_s23 + $0x4c0] sm:$0xff] %v429_v24  ;;  %v435_v27 = vld [vmem:[%s2020_s22 + $0x1258] sm:$0xff]  ;;  %432 = vst [vmem:[%s2025_s23 + $0x4c8] sm:$0xff] %v431_v25  ;;  %v437_v28 = vld [vmem:[%s2020_s22 + $0x1260] sm:$0xff] }
  0x5f   : > { %434 = vst [vmem:[%s2025_s23 + $0x4d0] sm:$0xff] %v433_v26  ;;  %436 = vst [vmem:[%s2025_s23 + $0x4d8] sm:$0xff] %v435_v27  ;;  %v439_v29 = vld [vmem:[%s2020_s22 + $0x1268] sm:$0xff]  ;;  %v441_v30 = vld [vmem:[%s2020_s22 + $0x1270] sm:$0xff] }
  0x60   : > { %438 = vst [vmem:[%s2025_s23 + $0x4e0] sm:$0xff] %v437_v28  ;;  %440 = vst [vmem:[%s2025_s23 + $0x4e8] sm:$0xff] %v439_v29  ;;  %v443_v31 = vld [vmem:[%s2020_s22 + $0x1278] sm:$0xff]  ;;  %v445_v32 = vld [vmem:[%s2020_s22 + $0x1400] sm:$0xff] }
  0x61   : > { %442 = vst [vmem:[%s2025_s23 + $0x4f0] sm:$0xff] %v441_v30  ;;  %v447_v33 = vld [vmem:[%s2020_s22 + $0x1408] sm:$0xff]  ;;  %444 = vst [vmem:[%s2025_s23 + $0x4f8] sm:$0xff] %v443_v31  ;;  %v449_v34 = vld [vmem:[%s2020_s22 + $0x1410] sm:$0xff] }
  0x62   : > { %446 = vst [vmem:[%s2025_s23 + $0x500] sm:$0xff] %v445_v32  ;;  %448 = vst [vmem:[%s2025_s23 + $0x508] sm:$0xff] %v447_v33  ;;  %v451_v35 = vld [vmem:[%s2020_s22 + $0x1418] sm:$0xff]  ;;  %v453_v36 = vld [vmem:[%s2020_s22 + $0x1420] sm:$0xff] }
  0x63   : > { %450 = vst [vmem:[%s2025_s23 + $0x510] sm:$0xff] %v449_v34  ;;  %452 = vst [vmem:[%s2025_s23 + $0x518] sm:$0xff] %v451_v35  ;;  %v455_v37 = vld [vmem:[%s2020_s22 + $0x1428] sm:$0xff]  ;;  %v457_v38 = vld [vmem:[%s2020_s22 + $0x1430] sm:$0xff] }
  0x64   : > { %454 = vst [vmem:[%s2025_s23 + $0x520] sm:$0xff] %v453_v36  ;;  %v459_v39 = vld [vmem:[%s2020_s22 + $0x1438] sm:$0xff]  ;;  %456 = vst [vmem:[%s2025_s23 + $0x528] sm:$0xff] %v455_v37  ;;  %v461_v40 = vld [vmem:[%s2020_s22 + $0x1440] sm:$0xff] }
  0x65   : > { %458 = vst [vmem:[%s2025_s23 + $0x530] sm:$0xff] %v457_v38  ;;  %460 = vst [vmem:[%s2025_s23 + $0x538] sm:$0xff] %v459_v39  ;;  %v463_v41 = vld [vmem:[%s2020_s22 + $0x1448] sm:$0xff]  ;;  %v465_v42 = vld [vmem:[%s2020_s22 + $0x1450] sm:$0xff] }
  0x66   : > { %462 = vst [vmem:[%s2025_s23 + $0x540] sm:$0xff] %v461_v40  ;;  %464 = vst [vmem:[%s2025_s23 + $0x548] sm:$0xff] %v463_v41  ;;  %v467_v43 = vld [vmem:[%s2020_s22 + $0x1458] sm:$0xff]  ;;  %v469_v44 = vld [vmem:[%s2020_s22 + $0x1460] sm:$0xff] }
  0x67   : > { %466 = vst [vmem:[%s2025_s23 + $0x550] sm:$0xff] %v465_v42  ;;  %v471_v45 = vld [vmem:[%s2020_s22 + $0x1468] sm:$0xff]  ;;  %468 = vst [vmem:[%s2025_s23 + $0x558] sm:$0xff] %v467_v43  ;;  %v473_v46 = vld [vmem:[%s2020_s22 + $0x1470] sm:$0xff] }
  0x68   : > { %470 = vst [vmem:[%s2025_s23 + $0x560] sm:$0xff] %v469_v44  ;;  %472 = vst [vmem:[%s2025_s23 + $0x568] sm:$0xff] %v471_v45  ;;  %v475_v47 = vld [vmem:[%s2020_s22 + $0x1478] sm:$0xff]  ;;  %v477_v48 = vld [vmem:[%s2020_s22 + $0x1600] sm:$0xff] }
  0x69   : > { %474 = vst [vmem:[%s2025_s23 + $0x570] sm:$0xff] %v473_v46  ;;  %476 = vst [vmem:[%s2025_s23 + $0x578] sm:$0xff] %v475_v47  ;;  %v479_v49 = vld [vmem:[%s2020_s22 + $0x1608] sm:$0xff]  ;;  %v481_v50 = vld [vmem:[%s2020_s22 + $0x1610] sm:$0xff] }
  0x6a   : > { %478 = vst [vmem:[%s2025_s23 + $0x580] sm:$0xff] %v477_v48  ;;  %v483_v51 = vld [vmem:[%s2020_s22 + $0x1618] sm:$0xff]  ;;  %480 = vst [vmem:[%s2025_s23 + $0x588] sm:$0xff] %v479_v49  ;;  %v485_v52 = vld [vmem:[%s2020_s22 + $0x1620] sm:$0xff] }
  0x6b   : > { %482 = vst [vmem:[%s2025_s23 + $0x590] sm:$0xff] %v481_v50  ;;  %484 = vst [vmem:[%s2025_s23 + $0x598] sm:$0xff] %v483_v51  ;;  %v487_v53 = vld [vmem:[%s2020_s22 + $0x1628] sm:$0xff]  ;;  %v489_v54 = vld [vmem:[%s2020_s22 + $0x1630] sm:$0xff] }
  0x6c   : > { %486 = vst [vmem:[%s2025_s23 + $0x5a0] sm:$0xff] %v485_v52  ;;  %488 = vst [vmem:[%s2025_s23 + $0x5a8] sm:$0xff] %v487_v53  ;;  %v491_v55 = vld [vmem:[%s2020_s22 + $0x1638] sm:$0xff]  ;;  %v493_v56 = vld [vmem:[%s2020_s22 + $0x1640] sm:$0xff] }
  0x6d   : > { %490 = vst [vmem:[%s2025_s23 + $0x5b0] sm:$0xff] %v489_v54  ;;  %v495_v57 = vld [vmem:[%s2020_s22 + $0x1648] sm:$0xff]  ;;  %492 = vst [vmem:[%s2025_s23 + $0x5b8] sm:$0xff] %v491_v55  ;;  %v497_v58 = vld [vmem:[%s2020_s22 + $0x1650] sm:$0xff] }
  0x6e   : > { %494 = vst [vmem:[%s2025_s23 + $0x5c0] sm:$0xff] %v493_v56  ;;  %496 = vst [vmem:[%s2025_s23 + $0x5c8] sm:$0xff] %v495_v57  ;;  %v499_v59 = vld [vmem:[%s2020_s22 + $0x1658] sm:$0xff]  ;;  %v501_v60 = vld [vmem:[%s2020_s22 + $0x1660] sm:$0xff] }
  0x6f   : > { %498 = vst [vmem:[%s2025_s23 + $0x5d0] sm:$0xff] %v497_v58  ;;  %500 = vst [vmem:[%s2025_s23 + $0x5d8] sm:$0xff] %v499_v59  ;;  %v503_v61 = vld [vmem:[%s2020_s22 + $0x1668] sm:$0xff]  ;;  %v505_v62 = vld [vmem:[%s2020_s22 + $0x1670] sm:$0xff] }
  0x70   : > { %502 = vst [vmem:[%s2025_s23 + $0x5e0] sm:$0xff] %v501_v60  ;;  %v507_v63 = vld [vmem:[%s2020_s22 + $0x1678] sm:$0xff]  ;;  %504 = vst [vmem:[%s2025_s23 + $0x5e8] sm:$0xff] %v503_v61  ;;  %v509_v0 = vld [vmem:[%s2020_s22 + $0x1800] sm:$0xff] }
  0x71   : > { %506 = vst [vmem:[%s2025_s23 + $0x5f0] sm:$0xff] %v505_v62  ;;  %508 = vst [vmem:[%s2025_s23 + $0x5f8] sm:$0xff] %v507_v63  ;;  %v511_v1 = vld [vmem:[%s2020_s22 + $0x1808] sm:$0xff]  ;;  %v513_v2 = vld [vmem:[%s2020_s22 + $0x1810] sm:$0xff] }
  0x72   : > { %510 = vst [vmem:[%s2025_s23 + $0x600] sm:$0xff] %v509_v0  ;;  %512 = vst [vmem:[%s2025_s23 + $0x608] sm:$0xff] %v511_v1  ;;  %v515_v3 = vld [vmem:[%s2020_s22 + $0x1818] sm:$0xff]  ;;  %v517_v4 = vld [vmem:[%s2020_s22 + $0x1820] sm:$0xff] }
  0x73   : > { %514 = vst [vmem:[%s2025_s23 + $0x610] sm:$0xff] %v513_v2  ;;  %v519_v5 = vld [vmem:[%s2020_s22 + $0x1828] sm:$0xff]  ;;  %516 = vst [vmem:[%s2025_s23 + $0x618] sm:$0xff] %v515_v3  ;;  %v521_v6 = vld [vmem:[%s2020_s22 + $0x1830] sm:$0xff] }
  0x74   : > { %518 = vst [vmem:[%s2025_s23 + $0x620] sm:$0xff] %v517_v4  ;;  %520 = vst [vmem:[%s2025_s23 + $0x628] sm:$0xff] %v519_v5  ;;  %v523_v7 = vld [vmem:[%s2020_s22 + $0x1838] sm:$0xff]  ;;  %v525_v8 = vld [vmem:[%s2020_s22 + $0x1840] sm:$0xff] }
  0x75   : > { %522 = vst [vmem:[%s2025_s23 + $0x630] sm:$0xff] %v521_v6  ;;  %524 = vst [vmem:[%s2025_s23 + $0x638] sm:$0xff] %v523_v7  ;;  %v527_v9 = vld [vmem:[%s2020_s22 + $0x1848] sm:$0xff]  ;;  %v529_v10 = vld [vmem:[%s2020_s22 + $0x1850] sm:$0xff] }
  0x76   : > { %526 = vst [vmem:[%s2025_s23 + $0x640] sm:$0xff] %v525_v8  ;;  %v531_v11 = vld [vmem:[%s2020_s22 + $0x1858] sm:$0xff]  ;;  %528 = vst [vmem:[%s2025_s23 + $0x648] sm:$0xff] %v527_v9  ;;  %v533_v12 = vld [vmem:[%s2020_s22 + $0x1860] sm:$0xff] }
  0x77   : > { %530 = vst [vmem:[%s2025_s23 + $0x650] sm:$0xff] %v529_v10  ;;  %532 = vst [vmem:[%s2025_s23 + $0x658] sm:$0xff] %v531_v11  ;;  %v535_v13 = vld [vmem:[%s2020_s22 + $0x1868] sm:$0xff]  ;;  %v537_v14 = vld [vmem:[%s2020_s22 + $0x1870] sm:$0xff] }
  0x78   : > { %534 = vst [vmem:[%s2025_s23 + $0x660] sm:$0xff] %v533_v12  ;;  %536 = vst [vmem:[%s2025_s23 + $0x668] sm:$0xff] %v535_v13  ;;  %v539_v15 = vld [vmem:[%s2020_s22 + $0x1878] sm:$0xff]  ;;  %v541_v16 = vld [vmem:[%s2020_s22 + $0x1a00] sm:$0xff] }
  0x79   : > { %538 = vst [vmem:[%s2025_s23 + $0x670] sm:$0xff] %v537_v14  ;;  %v543_v17 = vld [vmem:[%s2020_s22 + $0x1a08] sm:$0xff]  ;;  %540 = vst [vmem:[%s2025_s23 + $0x678] sm:$0xff] %v539_v15  ;;  %v545_v18 = vld [vmem:[%s2020_s22 + $0x1a10] sm:$0xff] }
  0x7a   : > { %542 = vst [vmem:[%s2025_s23 + $0x680] sm:$0xff] %v541_v16  ;;  %544 = vst [vmem:[%s2025_s23 + $0x688] sm:$0xff] %v543_v17  ;;  %v547_v19 = vld [vmem:[%s2020_s22 + $0x1a18] sm:$0xff]  ;;  %v549_v20 = vld [vmem:[%s2020_s22 + $0x1a20] sm:$0xff] }
  0x7b   : > { %546 = vst [vmem:[%s2025_s23 + $0x690] sm:$0xff] %v545_v18  ;;  %548 = vst [vmem:[%s2025_s23 + $0x698] sm:$0xff] %v547_v19  ;;  %v551_v21 = vld [vmem:[%s2020_s22 + $0x1a28] sm:$0xff]  ;;  %v553_v22 = vld [vmem:[%s2020_s22 + $0x1a30] sm:$0xff] }
  0x7c   : > { %550 = vst [vmem:[%s2025_s23 + $0x6a0] sm:$0xff] %v549_v20  ;;  %v555_v23 = vld [vmem:[%s2020_s22 + $0x1a38] sm:$0xff]  ;;  %552 = vst [vmem:[%s2025_s23 + $0x6a8] sm:$0xff] %v551_v21  ;;  %v557_v24 = vld [vmem:[%s2020_s22 + $0x1a40] sm:$0xff] }
  0x7d   : > { %554 = vst [vmem:[%s2025_s23 + $0x6b0] sm:$0xff] %v553_v22  ;;  %556 = vst [vmem:[%s2025_s23 + $0x6b8] sm:$0xff] %v555_v23  ;;  %v559_v25 = vld [vmem:[%s2020_s22 + $0x1a48] sm:$0xff]  ;;  %v561_v26 = vld [vmem:[%s2020_s22 + $0x1a50] sm:$0xff] }
  0x7e   : > { %558 = vst [vmem:[%s2025_s23 + $0x6c0] sm:$0xff] %v557_v24  ;;  %560 = vst [vmem:[%s2025_s23 + $0x6c8] sm:$0xff] %v559_v25  ;;  %v563_v27 = vld [vmem:[%s2020_s22 + $0x1a58] sm:$0xff]  ;;  %v565_v28 = vld [vmem:[%s2020_s22 + $0x1a60] sm:$0xff] }
  0x7f   : > { %562 = vst [vmem:[%s2025_s23 + $0x6d0] sm:$0xff] %v561_v26  ;;  %v567_v29 = vld [vmem:[%s2020_s22 + $0x1a68] sm:$0xff]  ;;  %564 = vst [vmem:[%s2025_s23 + $0x6d8] sm:$0xff] %v563_v27  ;;  %v569_v30 = vld [vmem:[%s2020_s22 + $0x1a70] sm:$0xff] }
  0x80   : > { %566 = vst [vmem:[%s2025_s23 + $0x6e0] sm:$0xff] %v565_v28  ;;  %568 = vst [vmem:[%s2025_s23 + $0x6e8] sm:$0xff] %v567_v29  ;;  %v571_v31 = vld [vmem:[%s2020_s22 + $0x1a78] sm:$0xff]  ;;  %v573_v32 = vld [vmem:[%s2020_s22 + $0x1c00] sm:$0xff] }
  0x81   : > { %570 = vst [vmem:[%s2025_s23 + $0x6f0] sm:$0xff] %v569_v30  ;;  %572 = vst [vmem:[%s2025_s23 + $0x6f8] sm:$0xff] %v571_v31  ;;  %v575_v33 = vld [vmem:[%s2020_s22 + $0x1c08] sm:$0xff]  ;;  %v577_v34 = vld [vmem:[%s2020_s22 + $0x1c10] sm:$0xff] }
  0x82   : > { %574 = vst [vmem:[%s2025_s23 + $0x700] sm:$0xff] %v573_v32  ;;  %v579_v35 = vld [vmem:[%s2020_s22 + $0x1c18] sm:$0xff]  ;;  %576 = vst [vmem:[%s2025_s23 + $0x708] sm:$0xff] %v575_v33  ;;  %v581_v36 = vld [vmem:[%s2020_s22 + $0x1c20] sm:$0xff] }
  0x83   : > { %578 = vst [vmem:[%s2025_s23 + $0x710] sm:$0xff] %v577_v34  ;;  %580 = vst [vmem:[%s2025_s23 + $0x718] sm:$0xff] %v579_v35  ;;  %v583_v37 = vld [vmem:[%s2020_s22 + $0x1c28] sm:$0xff]  ;;  %v585_v38 = vld [vmem:[%s2020_s22 + $0x1c30] sm:$0xff] }
  0x84   : > { %582 = vst [vmem:[%s2025_s23 + $0x720] sm:$0xff] %v581_v36  ;;  %584 = vst [vmem:[%s2025_s23 + $0x728] sm:$0xff] %v583_v37  ;;  %v587_v39 = vld [vmem:[%s2020_s22 + $0x1c38] sm:$0xff]  ;;  %v589_v40 = vld [vmem:[%s2020_s22 + $0x1c40] sm:$0xff] }
  0x85   : > { %586 = vst [vmem:[%s2025_s23 + $0x730] sm:$0xff] %v585_v38  ;;  %v591_v41 = vld [vmem:[%s2020_s22 + $0x1c48] sm:$0xff]  ;;  %588 = vst [vmem:[%s2025_s23 + $0x738] sm:$0xff] %v587_v39  ;;  %v593_v42 = vld [vmem:[%s2020_s22 + $0x1c50] sm:$0xff] }
  0x86   : > { %590 = vst [vmem:[%s2025_s23 + $0x740] sm:$0xff] %v589_v40  ;;  %592 = vst [vmem:[%s2025_s23 + $0x748] sm:$0xff] %v591_v41  ;;  %v595_v43 = vld [vmem:[%s2020_s22 + $0x1c58] sm:$0xff]  ;;  %v597_v44 = vld [vmem:[%s2020_s22 + $0x1c60] sm:$0xff] }
  0x87   : > { %594 = vst [vmem:[%s2025_s23 + $0x750] sm:$0xff] %v593_v42  ;;  %596 = vst [vmem:[%s2025_s23 + $0x758] sm:$0xff] %v595_v43  ;;  %v599_v45 = vld [vmem:[%s2020_s22 + $0x1c68] sm:$0xff]  ;;  %v601_v46 = vld [vmem:[%s2020_s22 + $0x1c70] sm:$0xff] }
  0x88   : > { %598 = vst [vmem:[%s2025_s23 + $0x760] sm:$0xff] %v597_v44  ;;  %v603_v47 = vld [vmem:[%s2020_s22 + $0x1c78] sm:$0xff]  ;;  %600 = vst [vmem:[%s2025_s23 + $0x768] sm:$0xff] %v599_v45  ;;  %v605_v48 = vld [vmem:[%s2020_s22 + $0x1e00] sm:$0xff] }
  0x89   : > { %602 = vst [vmem:[%s2025_s23 + $0x770] sm:$0xff] %v601_v46  ;;  %604 = vst [vmem:[%s2025_s23 + $0x778] sm:$0xff] %v603_v47  ;;  %v607_v49 = vld [vmem:[%s2020_s22 + $0x1e08] sm:$0xff]  ;;  %v609_v50 = vld [vmem:[%s2020_s22 + $0x1e10] sm:$0xff] }
  0x8a   : > { %606 = vst [vmem:[%s2025_s23 + $0x780] sm:$0xff] %v605_v48  ;;  %608 = vst [vmem:[%s2025_s23 + $0x788] sm:$0xff] %v607_v49  ;;  %v611_v51 = vld [vmem:[%s2020_s22 + $0x1e18] sm:$0xff]  ;;  %v613_v52 = vld [vmem:[%s2020_s22 + $0x1e20] sm:$0xff] }
  0x8b   : > { %610 = vst [vmem:[%s2025_s23 + $0x790] sm:$0xff] %v609_v50  ;;  %v615_v53 = vld [vmem:[%s2020_s22 + $0x1e28] sm:$0xff]  ;;  %612 = vst [vmem:[%s2025_s23 + $0x798] sm:$0xff] %v611_v51  ;;  %v617_v54 = vld [vmem:[%s2020_s22 + $0x1e30] sm:$0xff] }
  0x8c   : > { %614 = vst [vmem:[%s2025_s23 + $0x7a0] sm:$0xff] %v613_v52  ;;  %616 = vst [vmem:[%s2025_s23 + $0x7a8] sm:$0xff] %v615_v53  ;;  %v619_v55 = vld [vmem:[%s2020_s22 + $0x1e38] sm:$0xff]  ;;  %v621_v56 = vld [vmem:[%s2020_s22 + $0x1e40] sm:$0xff] }
  0x8d   : > { %618 = vst [vmem:[%s2025_s23 + $0x7b0] sm:$0xff] %v617_v54  ;;  %620 = vst [vmem:[%s2025_s23 + $0x7b8] sm:$0xff] %v619_v55  ;;  %v623_v57 = vld [vmem:[%s2020_s22 + $0x1e48] sm:$0xff]  ;;  %v625_v58 = vld [vmem:[%s2020_s22 + $0x1e50] sm:$0xff] }
  0x8e   : > { %622 = vst [vmem:[%s2025_s23 + $0x7c0] sm:$0xff] %v621_v56  ;;  %v627_v59 = vld [vmem:[%s2020_s22 + $0x1e58] sm:$0xff]  ;;  %624 = vst [vmem:[%s2025_s23 + $0x7c8] sm:$0xff] %v623_v57  ;;  %v629_v60 = vld [vmem:[%s2020_s22 + $0x1e60] sm:$0xff] }
  0x8f   : > { %626 = vst [vmem:[%s2025_s23 + $0x7d0] sm:$0xff] %v625_v58  ;;  %628 = vst [vmem:[%s2025_s23 + $0x7d8] sm:$0xff] %v627_v59  ;;  %v631_v61 = vld [vmem:[%s2020_s22 + $0x1e68] sm:$0xff]  ;;  %v633_v62 = vld [vmem:[%s2020_s22 + $0x1e70] sm:$0xff] }
  0x90   : > { %630 = vst [vmem:[%s2025_s23 + $0x7e0] sm:$0xff] %v629_v60  ;;  %632 = vst [vmem:[%s2025_s23 + $0x7e8] sm:$0xff] %v631_v61  ;;  %v635_v63 = vld [vmem:[%s2020_s22 + $0x1e78] sm:$0xff] }
  0x91   : > { %634 = vst [vmem:[%s2025_s23 + $0x7f0] sm:$0xff] %v633_v62  ;;  %636 = vst [vmem:[%s2025_s23 + $0x7f8] sm:$0xff] %v635_v63 }
  0x92 PF: > { %p1626_p5 = scmp.ge.s32.totalorder %s1968_s11, 1  ;;  %p641_p6 = scmp.lt.s32.totalorder %s1968_s11, 5 }
  0x94   : > { %p642_p7 = pnand %p1626_p5, %p641_p6 }
  0x95   : > { %s648_s24 = sand.u32 (!%p642_p7), 1, %s1960_s9   ;;  %v1970_v0 = vmov (!%p642_p7), 0.0   ;;  %s1628_s29 = sshll.u32 (!%p642_p7), %s1619_s12, 4 }
  0x96   : > { %645 = sbr.rel (%p642_p7) target bundleno = 513 (0x201), region = 47  ;;  %s1627_s25 = sshll.u32 (!%p642_p7), %s648_s24, 11  ;;  %997 = vmatprep.mubr.f32.mxu0 (!%p642_p7), %v1970_v0  ;;  %1068 = vmatprep.mubr.f32.mxu1 (!%p642_p7), %v1970_v0 }
  0x97   : > { %s2541_s26 = scalar_lea.vmem (!%p642_p7), [#allocation2], %s1627_s25  ;;  %p671_p8 = scmp.lt.s32.totalorder (!%p642_p7), %s1628_s29, 63 }
  0x98   : > { %v678_v1 = vld [vmem:[%s2541_s26 + $0x8] sm:$0xff] (!%p642_p7)  ;;  %v680_v3 = vld [vmem:[%s2541_s26 + $0x18] sm:$0xff] (!%p642_p7)  ;;  %v677_v6 = vld [vmem:[%s2541_s26] sm:$0xff] (!%p642_p7) }
  0x99   : > { %v694_v2 = vld [vmem:[%s2541_s26 + $0x88] sm:$0xff] (!%p642_p7)  ;;  %v696_v5 = vld [vmem:[%s2541_s26 + $0x98] sm:$0xff] (!%p642_p7)  ;;  %v693_v7 = vld [vmem:[%s2541_s26 + $0x80] sm:$0xff] (!%p642_p7) }
  0x9a   : > { %v1633_v4 = vpack.c.bf16 (!%p642_p7), %v694_v2, %v678_v1  ;;  %v1665_v8 = vpack.c.bf16 (!%p642_p7), %v696_v5, %v680_v3  ;;  %v1635_v9 = vpack.c.bf16 (!%p642_p7), %v693_v7, %v677_v6  ;;  %v679_v10 = vld [vmem:[%s2541_s26 + $0x10] sm:$0xff] (!%p642_p7)  ;;  %v710_v12 = vld [vmem:[%s2541_s26 + $0x108] sm:$0xff] (!%p642_p7)  ;;  %v712_v15 = vld [vmem:[%s2541_s26 + $0x118] sm:$0xff] (!%p642_p7) }
  0x9b   : > { %v695_v11 = vld [vmem:[%s2541_s26 + $0x90] sm:$0xff] (!%p642_p7)  ;;  %v726_v14 = vld [vmem:[%s2541_s26 + $0x188] sm:$0xff] (!%p642_p7)  ;;  %v728_v16 = vld [vmem:[%s2541_s26 + $0x198] sm:$0xff] (!%p642_p7) }
  0x9c   : > { %1634 = vmatprep.subr.bf16.mxu0 (!%p642_p7), %v1633_v4  ;;  %v1667_v13 = vpack.c.bf16 (!%p642_p7), %v695_v11, %v679_v10  ;;  %1666 = vmatprep.subr.bf16.mxu1 (!%p642_p7), %v1665_v8  ;;  %v1637_v17 = vpack.c.bf16 (!%p642_p7), %v726_v14, %v710_v12  ;;  %v1669_v18 = vpack.c.bf16 (!%p642_p7), %v728_v16, %v712_v15  ;;  %v709_v19 = vld [vmem:[%s2541_s26 + $0x100] sm:$0xff] (!%p642_p7)  ;;  %v711_v21 = vld [vmem:[%s2541_s26 + $0x110] sm:$0xff] (!%p642_p7)  ;;  %v742_v24 = vld [vmem:[%s2541_s26 + $0x208] sm:$0xff] (!%p642_p7) }
  0x9d   : > { %1636 = vmatpush1.bf16.msra.mxu0 %v1635_v9  ;;  %v725_v20 = vld [vmem:[%s2541_s26 + $0x180] sm:$0xff]  ;;  %v727_v23 = vld [vmem:[%s2541_s26 + $0x190] sm:$0xff]  ;;  %v758_v25 = vld [vmem:[%s2541_s26 + $0x288] sm:$0xff]  ;;  %s2850_s29 = smov (!%p671_p8, %s1628_s29), 63 }
  0x9e   : > { %1668 = vmatpush1.bf16.msra.mxu1 %v1667_v13  ;;  %v1639_v22 = vpack.c.bf16 %v725_v20, %v709_v19  ;;  %1638 = vmatprep.subr.bf16.mxu0 %v1637_v17  ;;  %v1671_v26 = vpack.c.bf16 %v727_v23, %v711_v21  ;;  %v1641_v27 = vpack.c.bf16 %v758_v25, %v742_v24  ;;  %v744_v28 = vld [vmem:[%s2541_s26 + $0x218] sm:$0xff]  ;;  %v741_v30 = vld [vmem:[%s2541_s26 + $0x200] sm:$0xff]  ;;  %v743_v33 = vld [vmem:[%s2541_s26 + $0x210] sm:$0xff]  ;;  %s1629_s30 = sshll.u32 %s2850_s29, 2 }
  0x9f   : > { %1670 = vmatprep.subr.bf16.mxu1 %v1669_v18  ;;  %v760_v29 = vld [vmem:[%s2541_s26 + $0x298] sm:$0xff]  ;;  %v757_v32 = vld [vmem:[%s2541_s26 + $0x280] sm:$0xff]  ;;  %v759_v34 = vld [vmem:[%s2541_s26 + $0x290] sm:$0xff]  ;;  %s2823_s5 = scalar_lea.vmem %s2845_s2, %s1629_s30 }
  0xa0   : > { %v1673_v31 = vpack.c.bf16 %v760_v29, %v744_v28  ;;  %v1643_v35 = vpack.c.bf16 %v757_v32, %v741_v30  ;;  %v774_v36 = vld [vmem:[%s2541_s26 + $0x308] sm:$0xff]  ;;  %v776_v38 = vld [vmem:[%s2541_s26 + $0x318] sm:$0xff]  ;;  %v1675_v39 = vpack.c.bf16 %v759_v34, %v743_v33  ;;  %v773_v42 = vld [vmem:[%s2541_s26 + $0x300] sm:$0xff] }
  0xa1   : > { %1640 = vmatpush1.bf16.msra.mxu0 %v1639_v22  ;;  %v790_v37 = vld [vmem:[%s2541_s26 + $0x388] sm:$0xff]  ;;  %v792_v41 = vld [vmem:[%s2541_s26 + $0x398] sm:$0xff]  ;;  %v789_v43 = vld [vmem:[%s2541_s26 + $0x380] sm:$0xff] }
  0xa2   : > { %1672 = vmatpush1.bf16.msra.mxu1 %v1671_v26  ;;  %1642 = vmatprep.subr.bf16.mxu0 %v1641_v27  ;;  %v1645_v40 = vpack.c.bf16 %v790_v37, %v774_v36  ;;  %v1677_v44 = vpack.c.bf16 %v792_v41, %v776_v38  ;;  %v775_v45 = vld [vmem:[%s2541_s26 + $0x310] sm:$0xff]  ;;  %v806_v47 = vld [vmem:[%s2541_s26 + $0x408] sm:$0xff]  ;;  %v808_v49 = vld [vmem:[%s2541_s26 + $0x418] sm:$0xff]  ;;  %v1647_v51 = vpack.c.bf16 %v789_v43, %v773_v42 }
  0xa3   : > { %1674 = vmatprep.subr.bf16.mxu1 %v1673_v31  ;;  %v791_v46 = vld [vmem:[%s2541_s26 + $0x390] sm:$0xff]  ;;  %v822_v48 = vld [vmem:[%s2541_s26 + $0x488] sm:$0xff]  ;;  %v824_v50 = vld [vmem:[%s2541_s26 + $0x498] sm:$0xff] }
  0xa4   : > { %v1679_v52 = vpack.c.bf16 %v791_v46, %v775_v45  ;;  %v1649_v53 = vpack.c.bf16 %v822_v48, %v806_v47  ;;  %v805_v54 = vld [vmem:[%s2541_s26 + $0x400] sm:$0xff]  ;;  %v807_v56 = vld [vmem:[%s2541_s26 + $0x410] sm:$0xff]  ;;  %v1681_v57 = vpack.c.bf16 %v824_v50, %v808_v49  ;;  %v838_v59 = vld [vmem:[%s2541_s26 + $0x508] sm:$0xff] }
  0xa5   : > { %1644 = vmatpush1.bf16.msra.mxu0 %v1643_v35  ;;  %v821_v55 = vld [vmem:[%s2541_s26 + $0x480] sm:$0xff]  ;;  %v823_v58 = vld [vmem:[%s2541_s26 + $0x490] sm:$0xff]  ;;  %v854_v60 = vld [vmem:[%s2541_s26 + $0x588] sm:$0xff] }
  0xa6   : > { %1676 = vmatpush1.bf16.msra.mxu1 %v1675_v39  ;;  %1646 = vmatprep.subr.bf16.mxu0 %v1645_v40  ;;  %v840_v61 = vld [vmem:[%s2541_s26 + $0x518] sm:$0xff]  ;;  %v1651_v63 = vpack.c.bf16 %v821_v55, %v805_v54  ;;  %v1683_v1 = vpack.c.bf16 %v823_v58, %v807_v56  ;;  %v1653_v2 = vpack.c.bf16 %v854_v60, %v838_v59  ;;  %v837_v3 = vld [vmem:[%s2541_s26 + $0x500] sm:$0xff]  ;;  %v839_v5 = vld [vmem:[%s2541_s26 + $0x510] sm:$0xff] }
  0xa7   : > { %1678 = vmatprep.subr.bf16.mxu1 %v1677_v44  ;;  %v856_v62 = vld [vmem:[%s2541_s26 + $0x598] sm:$0xff]  ;;  %v853_v4 = vld [vmem:[%s2541_s26 + $0x580] sm:$0xff]  ;;  %v855_v7 = vld [vmem:[%s2541_s26 + $0x590] sm:$0xff] }
  0xa8   : > { %v1685_v6 = vpack.c.bf16 %v856_v62, %v840_v61  ;;  %v870_v8 = vld [vmem:[%s2541_s26 + $0x608] sm:$0xff]  ;;  %v872_v10 = vld [vmem:[%s2541_s26 + $0x618] sm:$0xff]  ;;  %v1655_v12 = vpack.c.bf16 %v853_v4, %v837_v3  ;;  %v1687_v13 = vpack.c.bf16 %v855_v7, %v839_v5  ;;  %v869_v15 = vld [vmem:[%s2541_s26 + $0x600] sm:$0xff] }
  0xa9   : > { %1648 = vmatpush1.bf16.msra.mxu0 %v1647_v51  ;;  %v886_v9 = vld [vmem:[%s2541_s26 + $0x688] sm:$0xff]  ;;  %v888_v11 = vld [vmem:[%s2541_s26 + $0x698] sm:$0xff]  ;;  %v885_v16 = vld [vmem:[%s2541_s26 + $0x680] sm:$0xff] }
  0xaa   : > { %1680 = vmatpush1.bf16.msra.mxu1 %v1679_v52  ;;  %1650 = vmatprep.subr.bf16.mxu0 %v1649_v53  ;;  %v1657_v14 = vpack.c.bf16 %v886_v9, %v870_v8  ;;  %v871_v17 = vld [vmem:[%s2541_s26 + $0x610] sm:$0xff]  ;;  %v1689_v18 = vpack.c.bf16 %v888_v11, %v872_v10  ;;  %v902_v20 = vld [vmem:[%s2541_s26 + $0x708] sm:$0xff]  ;;  %v904_v22 = vld [vmem:[%s2541_s26 + $0x718] sm:$0xff]  ;;  %v1659_v24 = vpack.c.bf16 %v885_v16, %v869_v15 }
  0xab   : > { %1682 = vmatprep.subr.bf16.mxu1 %v1681_v57  ;;  %v887_v19 = vld [vmem:[%s2541_s26 + $0x690] sm:$0xff]  ;;  %v918_v21 = vld [vmem:[%s2541_s26 + $0x788] sm:$0xff]  ;;  %v920_v23 = vld [vmem:[%s2541_s26 + $0x798] sm:$0xff] }
  0xac   : > { %v1691_v25 = vpack.c.bf16 %v887_v19, %v871_v17  ;;  %v1661_v26 = vpack.c.bf16 %v918_v21, %v902_v20  ;;  %v901_v27 = vld [vmem:[%s2541_s26 + $0x700] sm:$0xff]  ;;  %v903_v29 = vld [vmem:[%s2541_s26 + $0x710] sm:$0xff]  ;;  %v1693_v30 = vpack.c.bf16 %v920_v23, %v904_v22  ;;  %v682_v32 = vld [vmem:[%s2541_s26 + $0x28] sm:$0xff] }
  0xad   : > { %1652 = vmatpush1.bf16.msra.mxu0 %v1651_v63  ;;  %v917_v28 = vld [vmem:[%s2541_s26 + $0x780] sm:$0xff]  ;;  %v919_v31 = vld [vmem:[%s2541_s26 + $0x790] sm:$0xff]  ;;  %v698_v33 = vld [vmem:[%s2541_s26 + $0xa8] sm:$0xff] }
  0xae   : > { %1684 = vmatpush1.bf16.msra.mxu1 %v1683_v1  ;;  %1654 = vmatprep.subr.bf16.mxu0 %v1653_v2  ;;  %v684_v34 = vld [vmem:[%s2541_s26 + $0x38] sm:$0xff]  ;;  %v1663_v36 = vpack.c.bf16 %v917_v28, %v901_v27  ;;  %v1695_v37 = vpack.c.bf16 %v919_v31, %v903_v29  ;;  %v1697_v38 = vpack.c.bf16 %v698_v33, %v682_v32  ;;  %v681_v39 = vld [vmem:[%s2541_s26 + $0x20] sm:$0xff]  ;;  %v683_v41 = vld [vmem:[%s2541_s26 + $0x30] sm:$0xff] }
  0xaf   : > { %1686 = vmatprep.subr.bf16.mxu1 %v1685_v6  ;;  %v700_v35 = vld [vmem:[%s2541_s26 + $0xb8] sm:$0xff]  ;;  %v697_v40 = vld [vmem:[%s2541_s26 + $0xa0] sm:$0xff]  ;;  %v699_v43 = vld [vmem:[%s2541_s26 + $0xb0] sm:$0xff] }
  0xb0   : > { %v1729_v42 = vpack.c.bf16 %v700_v35, %v684_v34  ;;  %v714_v44 = vld [vmem:[%s2541_s26 + $0x128] sm:$0xff]  ;;  %v716_v46 = vld [vmem:[%s2541_s26 + $0x138] sm:$0xff]  ;;  %v2622_v48 = vld [vmem:[%s2843_s0] sm:$0x7]  ;;  %v1699_v49 = vpack.c.bf16 %v697_v40, %v681_v39  ;;  %v1731_v50 = vpack.c.bf16 %v699_v43, %v683_v41 }
  0xb1   : > { %1656 = vmatpush1.bf16.msra.mxu0 %v1655_v12  ;;  %v730_v45 = vld [vmem:[%s2541_s26 + $0x1a8] sm:$0xff]  ;;  %v732_v47 = vld [vmem:[%s2541_s26 + $0x1b8] sm:$0xff]  ;;  %v713_v52 = vld [vmem:[%s2541_s26 + $0x120] sm:$0xff] }
  0xb2   : > { %1688 = vmatpush1.bf16.msra.mxu1 %v1687_v13  ;;  %1658 = vmatprep.subr.bf16.mxu0 %v1657_v14  ;;  %v1701_v51 = vpack.c.bf16 %v730_v45, %v714_v44  ;;  %v729_v53 = vld [vmem:[%s2541_s26 + $0x1a0] sm:$0xff]  ;;  %v715_v54 = vld [vmem:[%s2541_s26 + $0x130] sm:$0xff]  ;;  %v1733_v55 = vpack.c.bf16 %v732_v47, %v716_v46  ;;  %v746_v57 = vld [vmem:[%s2541_s26 + $0x228] sm:$0xff] }
  0xb3   : > { %1690 = vmatprep.subr.bf16.mxu1 %v1689_v18  ;;  %v731_v56 = vld [vmem:[%s2541_s26 + $0x1b0] sm:$0xff]  ;;  %v762_v58 = vld [vmem:[%s2541_s26 + $0x2a8] sm:$0xff]  ;;  %v748_v59 = vld [vmem:[%s2541_s26 + $0x238] sm:$0xff]  ;;  %v1703_v61 = vpack.c.bf16 %v729_v53, %v713_v52 }
  0xb4   : > { %v764_v60 = vld [vmem:[%s2541_s26 + $0x2b8] sm:$0xff]  ;;  %v1735_v62 = vpack.c.bf16 %v731_v56, %v715_v54  ;;  %v1705_v63 = vpack.c.bf16 %v762_v58, %v746_v57  ;;  %v745_v1 = vld [vmem:[%s2541_s26 + $0x220] sm:$0xff]  ;;  %v747_v3 = vld [vmem:[%s2541_s26 + $0x230] sm:$0xff] }
  0xb5   : > { %1660 = vmatpush1.bf16.msra.mxu0 %v1659_v24  ;;  %v761_v2 = vld [vmem:[%s2541_s26 + $0x2a0] sm:$0xff]  ;;  %v1737_v4 = vpack.c.bf16 %v764_v60, %v748_v59  ;;  %v763_v5 = vld [vmem:[%s2541_s26 + $0x2b0] sm:$0xff]  ;;  %v778_v6 = vld [vmem:[%s2541_s26 + $0x328] sm:$0xff] }
  0xb6   : > { %1692 = vmatpush1.bf16.msra.mxu1 %v1691_v25  ;;  %1662 = vmatprep.subr.bf16.mxu0 %v1661_v26  ;;  %v794_v7 = vld [vmem:[%s2541_s26 + $0x3a8] sm:$0xff]  ;;  %v780_v8 = vld [vmem:[%s2541_s26 + $0x338] sm:$0xff]  ;;  %v1707_v10 = vpack.c.bf16 %v761_v2, %v745_v1  ;;  %v1739_v11 = vpack.c.bf16 %v763_v5, %v747_v3  ;;  %v777_v13 = vld [vmem:[%s2541_s26 + $0x320] sm:$0xff] }
  0xb7   : > { %1694 = vmatprep.subr.bf16.mxu1 %v1693_v30  ;;  %v796_v9 = vld [vmem:[%s2541_s26 + $0x3b8] sm:$0xff]  ;;  %v1709_v12 = vpack.c.bf16 %v794_v7, %v778_v6  ;;  %v793_v14 = vld [vmem:[%s2541_s26 + $0x3a0] sm:$0xff]  ;;  %v779_v15 = vld [vmem:[%s2541_s26 + $0x330] sm:$0xff] }
  0xb8   : > { %v1741_v16 = vpack.c.bf16 %v796_v9, %v780_v8  ;;  %v795_v17 = vld [vmem:[%s2541_s26 + $0x3b0] sm:$0xff]  ;;  %v810_v18 = vld [vmem:[%s2541_s26 + $0x428] sm:$0xff]  ;;  %v812_v20 = vld [vmem:[%s2541_s26 + $0x438] sm:$0xff]  ;;  %v1711_v22 = vpack.c.bf16 %v793_v14, %v777_v13 }
  0xb9   : > { %1664 = vmatpush1.bf16.msra.mxu0 %v1663_v36  ;;  %v826_v19 = vld [vmem:[%s2541_s26 + $0x4a8] sm:$0xff]  ;;  %v828_v21 = vld [vmem:[%s2541_s26 + $0x4b8] sm:$0xff]  ;;  %v1743_v23 = vpack.c.bf16 %v795_v17, %v779_v15  ;;  %v809_v25 = vld [vmem:[%s2541_s26 + $0x420] sm:$0xff] }
  0xba   : > { %1696 = vmatpush1.bf16.msra.mxu1 %v1695_v37  ;;  %1698 = vmatprep.subr.bf16.mxu0 %v1697_v38  ;;  %v1713_v24 = vpack.c.bf16 %v826_v19, %v810_v18  ;;  %v825_v26 = vld [vmem:[%s2541_s26 + $0x4a0] sm:$0xff]  ;;  %v811_v27 = vld [vmem:[%s2541_s26 + $0x430] sm:$0xff]  ;;  %v1745_v28 = vpack.c.bf16 %v828_v21, %v812_v20  ;;  %v842_v30 = vld [vmem:[%s2541_s26 + $0x528] sm:$0xff] }
  0xbb   : > { %1730 = vmatprep.subr.bf16.mxu1 %v1729_v42  ;;  %v827_v29 = vld [vmem:[%s2541_s26 + $0x4b0] sm:$0xff]  ;;  %v858_v31 = vld [vmem:[%s2541_s26 + $0x5a8] sm:$0xff]  ;;  %v844_v32 = vld [vmem:[%s2541_s26 + $0x538] sm:$0xff]  ;;  %v1715_v34 = vpack.c.bf16 %v825_v26, %v809_v25 }
  0xbc   : > { %998 = vmatmul.mubr.f32.vlgmr.msra.gmra.mrb[0].mxu0 %v2622_v48  ;;  %v860_v33 = vld [vmem:[%s2541_s26 + $0x5b8] sm:$0xff]  ;;  %v1747_v35 = vpack.c.bf16 %v827_v29, %v811_v27  ;;  %v1717_v36 = vpack.c.bf16 %v858_v31, %v842_v30  ;;  %v841_v37 = vld [vmem:[%s2541_s26 + $0x520] sm:$0xff]  ;;  %v843_v39 = vld [vmem:[%s2541_s26 + $0x530] sm:$0xff] }
  0xbd   : > { %1069 = vmatmul.mubr.f32.vlgmr.msra.gmra.mrb[0].mxu1 %v2622_v48  ;;  %1700 = vmatpush1.bf16.msra.mxu0 %v1699_v49  ;;  %v857_v38 = vld [vmem:[%s2541_s26 + $0x5a0] sm:$0xff]  ;;  %v1749_v40 = vpack.c.bf16 %v860_v33, %v844_v32  ;;  %v859_v41 = vld [vmem:[%s2541_s26 + $0x5b0] sm:$0xff]  ;;  %v874_v42 = vld [vmem:[%s2541_s26 + $0x628] sm:$0xff] }
  0xbe   : > { %1732 = vmatpush1.bf16.msra.mxu1 %v1731_v50  ;;  %1702 = vmatprep.subr.bf16.mxu0 %v1701_v51  ;;  %v890_v43 = vld [vmem:[%s2541_s26 + $0x6a8] sm:$0xff]  ;;  %v876_v44 = vld [vmem:[%s2541_s26 + $0x638] sm:$0xff]  ;;  %v1719_v46 = vpack.c.bf16 %v857_v38, %v841_v37  ;;  %v1751_v47 = vpack.c.bf16 %v859_v41, %v843_v39  ;;  %v873_v50 = vld [vmem:[%s2541_s26 + $0x620] sm:$0xff] }
  0xbf   : > { %1734 = vmatprep.subr.bf16.mxu1 %v1733_v55  ;;  %1139 = vmatprep.mubr.f32.mxu0 %v1970_v0  ;;  %v892_v45 = vld [vmem:[%s2541_s26 + $0x6b8] sm:$0xff]  ;;  %v1721_v49 = vpack.c.bf16 %v890_v43, %v874_v42  ;;  %v889_v51 = vld [vmem:[%s2541_s26 + $0x6a0] sm:$0xff]  ;;  %v875_v52 = vld [vmem:[%s2541_s26 + $0x630] sm:$0xff] }
  0xc0   : > { %1210 = vmatprep.mubr.f32.mxu1 %v1970_v0  ;;  %v1753_v53 = vpack.c.bf16 %v892_v45, %v876_v44  ;;  %v891_v54 = vld [vmem:[%s2541_s26 + $0x6b0] sm:$0xff]  ;;  %v906_v55 = vld [vmem:[%s2541_s26 + $0x728] sm:$0xff]  ;;  %v908_v57 = vld [vmem:[%s2541_s26 + $0x738] sm:$0xff]  ;;  %v1723_v59 = vpack.c.bf16 %v889_v51, %v873_v50 }
  0xc1   : > { %1704 = vmatpush1.bf16.msra.mxu0 %v1703_v61  ;;  %v922_v56 = vld [vmem:[%s2541_s26 + $0x7a8] sm:$0xff]  ;;  %v924_v58 = vld [vmem:[%s2541_s26 + $0x7b8] sm:$0xff]  ;;  %v1755_v60 = vpack.c.bf16 %v891_v54, %v875_v52  ;;  %v907_v1 = vld [vmem:[%s2541_s26 + $0x730] sm:$0xff] }
  0xc2   : > { %1736 = vmatpush1.bf16.msra.mxu1 %v1735_v62  ;;  %1706 = vmatprep.subr.bf16.mxu0 %v1705_v63  ;;  %v1725_v61 = vpack.c.bf16 %v922_v56, %v906_v55  ;;  %v905_v62 = vld [vmem:[%s2541_s26 + $0x720] sm:$0xff]  ;;  %v1757_v2 = vpack.c.bf16 %v924_v58, %v908_v57  ;;  %v923_v3 = vld [vmem:[%s2541_s26 + $0x7b0] sm:$0xff]  ;;  %v702_v5 = vld [vmem:[%s2541_s26 + $0xc8] sm:$0xff] }
  0xc3   : > { %1738 = vmatprep.subr.bf16.mxu1 %v1737_v4  ;;  %v921_v63 = vld [vmem:[%s2541_s26 + $0x7a0] sm:$0xff]  ;;  %v686_v4 = vld [vmem:[%s2541_s26 + $0x48] sm:$0xff]  ;;  %v688_v6 = vld [vmem:[%s2541_s26 + $0x58] sm:$0xff]  ;;  %v1759_v9 = vpack.c.bf16 %v923_v3, %v907_v1 }
  0xc4   : > { %v704_v7 = vld [vmem:[%s2541_s26 + $0xd8] sm:$0xff]  ;;  %v1727_v8 = vpack.c.bf16 %v921_v63, %v905_v62  ;;  %v687_v13 = vld [vmem:[%s2541_s26 + $0x50] sm:$0xff]  ;;  %v734_v17 = vld [vmem:[%s2541_s26 + $0x1c8] sm:$0xff] }
  0xc5   : > { %1708 = vmatpush1.bf16.msra.mxu0 %v1707_v10  ;;  %v1761_v10 = vpack.c.bf16 %v702_v5, %v686_v4  ;;  %v1793_v14 = vpack.c.bf16 %v704_v7, %v688_v6  ;;  %v703_v15 = vld [vmem:[%s2541_s26 + $0xd0] sm:$0xff]  ;;  %v720_v18 = vld [vmem:[%s2541_s26 + $0x158] sm:$0xff]  ;;  %v766_v29 = vld [vmem:[%s2541_s26 + $0x2c8] sm:$0xff] }
  0xc6   : > { %1740 = vmatpush1.bf16.msra.mxu1 %v1739_v11  ;;  %1710 = vmatprep.subr.bf16.mxu0 %v1709_v12  ;;  %v685_v11 = vld [vmem:[%s2541_s26 + $0x40] sm:$0xff]  ;;  %v736_v19 = vld [vmem:[%s2541_s26 + $0x1d8] sm:$0xff]  ;;  %v1795_v21 = vpack.c.bf16 %v703_v15, %v687_v13  ;;  %v719_v25 = vld [vmem:[%s2541_s26 + $0x150] sm:$0xff] }
  0xc7   : > { %1742 = vmatprep.subr.bf16.mxu1 %v1741_v16  ;;  %v701_v12 = vld [vmem:[%s2541_s26 + $0xc0] sm:$0xff]  ;;  %v718_v16 = vld [vmem:[%s2541_s26 + $0x148] sm:$0xff]  ;;  %v1797_v26 = vpack.c.bf16 %v736_v19, %v720_v18  ;;  %v735_v27 = vld [vmem:[%s2541_s26 + $0x1d0] sm:$0xff] }
  0xc8   : > { %v1763_v20 = vpack.c.bf16 %v701_v12, %v685_v11  ;;  %v752_v30 = vld [vmem:[%s2541_s26 + $0x258] sm:$0xff]  ;;  %v1799_v33 = vpack.c.bf16 %v735_v27, %v719_v25  ;;  %v751_v37 = vld [vmem:[%s2541_s26 + $0x250] sm:$0xff]  ;;  %v798_v41 = vld [vmem:[%s2541_s26 + $0x3c8] sm:$0xff] }
  0xc9   : > { %1712 = vmatpush1.bf16.msra.mxu0 %v1711_v22  ;;  %v1765_v22 = vpack.c.bf16 %v734_v17, %v718_v16  ;;  %v768_v31 = vld [vmem:[%s2541_s26 + $0x2d8] sm:$0xff]  ;;  %v767_v39 = vld [vmem:[%s2541_s26 + $0x2d0] sm:$0xff]  ;;  %v830_v54 = vld [vmem:[%s2541_s26 + $0x4c8] sm:$0xff] }
  0xca   : > { %1744 = vmatpush1.bf16.msra.mxu1 %v1743_v23  ;;  %1714 = vmatprep.subr.bf16.mxu0 %v1713_v24  ;;  %v717_v23 = vld [vmem:[%s2541_s26 + $0x140] sm:$0xff]  ;;  %v1801_v38 = vpack.c.bf16 %v768_v31, %v752_v30  ;;  %v784_v42 = vld [vmem:[%s2541_s26 + $0x358] sm:$0xff]  ;;  %v1803_v45 = vpack.c.bf16 %v767_v39, %v751_v37  ;;  %v783_v50 = vld [vmem:[%s2541_s26 + $0x350] sm:$0xff] }
  0xcb   : > { %1746 = vmatprep.subr.bf16.mxu1 %v1745_v28  ;;  %v733_v24 = vld [vmem:[%s2541_s26 + $0x1c0] sm:$0xff]  ;;  %v750_v28 = vld [vmem:[%s2541_s26 + $0x248] sm:$0xff]  ;;  %v800_v43 = vld [vmem:[%s2541_s26 + $0x3d8] sm:$0xff] }
  0xcc   : > { %v1767_v32 = vpack.c.bf16 %v733_v24, %v717_v23  ;;  %v1805_v51 = vpack.c.bf16 %v800_v43, %v784_v42  ;;  %v799_v52 = vld [vmem:[%s2541_s26 + $0x3d0] sm:$0xff]  ;;  %v816_v55 = vld [vmem:[%s2541_s26 + $0x458] sm:$0xff]  ;;  %v862_v3 = vld [vmem:[%s2541_s26 + $0x5c8] sm:$0xff] }
  0xcd   : > { %1716 = vmatpush1.bf16.msra.mxu0 %v1715_v34  ;;  %v1769_v34 = vpack.c.bf16 %v766_v29, %v750_v28  ;;  %v832_v56 = vld [vmem:[%s2541_s26 + $0x4d8] sm:$0xff]  ;;  %v1807_v58 = vpack.c.bf16 %v799_v52, %v783_v50  ;;  %v815_v62 = vld [vmem:[%s2541_s26 + $0x450] sm:$0xff]  ;;  %v894_v15 = vld [vmem:[%s2541_s26 + $0x6c8] sm:$0xff] }
  0xce   : > { %1748 = vmatpush1.bf16.msra.mxu1 %v1747_v35  ;;  %1718 = vmatprep.subr.bf16.mxu0 %v1717_v36  ;;  %v749_v35 = vld [vmem:[%s2541_s26 + $0x240] sm:$0xff]  ;;  %v1809_v63 = vpack.c.bf16 %v832_v56, %v816_v55  ;;  %v831_v1 = vld [vmem:[%s2541_s26 + $0x4d0] sm:$0xff]  ;;  %v848_v4 = vld [vmem:[%s2541_s26 + $0x558] sm:$0xff] }
  0xcf   : > { %1750 = vmatprep.subr.bf16.mxu1 %v1749_v40  ;;  %v765_v36 = vld [vmem:[%s2541_s26 + $0x2c0] sm:$0xff]  ;;  %v782_v40 = vld [vmem:[%s2541_s26 + $0x348] sm:$0xff]  ;;  %v864_v5 = vld [vmem:[%s2541_s26 + $0x5d8] sm:$0xff]  ;;  %v1811_v7 = vpack.c.bf16 %v831_v1, %v815_v62 }
  0xd0   : > { %v1771_v44 = vpack.c.bf16 %v765_v36, %v749_v35  ;;  %v847_v11 = vld [vmem:[%s2541_s26 + $0x550] sm:$0xff]  ;;  %v1813_v12 = vpack.c.bf16 %v864_v5, %v848_v4  ;;  %v880_v16 = vld [vmem:[%s2541_s26 + $0x658] sm:$0xff]  ;;  %v926_v27 = vld [vmem:[%s2541_s26 + $0x7c8] sm:$0xff] }
  0xd1   : > { %1720 = vmatpush1.bf16.msra.mxu0 %v1719_v46  ;;  %v1773_v46 = vpack.c.bf16 %v798_v41, %v782_v40  ;;  %v863_v13 = vld [vmem:[%s2541_s26 + $0x5d0] sm:$0xff]  ;;  %v896_v17 = vld [vmem:[%s2541_s26 + $0x6d8] sm:$0xff]  ;;  %v706_v39 = vld [vmem:[%s2541_s26 + $0xe8] sm:$0xff] }
  0xd2   : > { %1752 = vmatpush1.bf16.msra.mxu1 %v1751_v47  ;;  %1722 = vmatprep.subr.bf16.mxu0 %v1721_v49  ;;  %v781_v47 = vld [vmem:[%s2541_s26 + $0x340] sm:$0xff]  ;;  %v1815_v19 = vpack.c.bf16 %v863_v13, %v847_v11  ;;  %v879_v23 = vld [vmem:[%s2541_s26 + $0x650] sm:$0xff]  ;;  %v1817_v24 = vpack.c.bf16 %v896_v17, %v880_v16  ;;  %v912_v28 = vld [vmem:[%s2541_s26 + $0x758] sm:$0xff] }
  0xd3   : > { %1754 = vmatprep.subr.bf16.mxu1 %v1753_v53  ;;  %v797_v49 = vld [vmem:[%s2541_s26 + $0x3c0] sm:$0xff]  ;;  %v814_v53 = vld [vmem:[%s2541_s26 + $0x448] sm:$0xff]  ;;  %v895_v25 = vld [vmem:[%s2541_s26 + $0x6d0] sm:$0xff] }
  0xd4   : > { %v1775_v57 = vpack.c.bf16 %v797_v49, %v781_v47  ;;  %v928_v29 = vld [vmem:[%s2541_s26 + $0x7d8] sm:$0xff]  ;;  %v1819_v31 = vpack.c.bf16 %v895_v25, %v879_v23  ;;  %v911_v35 = vld [vmem:[%s2541_s26 + $0x750] sm:$0xff]  ;;  %v738_v52 = vld [vmem:[%s2541_s26 + $0x1e8] sm:$0xff] }
  0xd5   : > { %1724 = vmatpush1.bf16.msra.mxu0 %v1723_v59  ;;  %v1777_v59 = vpack.c.bf16 %v830_v54, %v814_v53  ;;  %v1821_v36 = vpack.c.bf16 %v928_v29, %v912_v28  ;;  %v927_v37 = vld [vmem:[%s2541_s26 + $0x7d0] sm:$0xff]  ;;  %v692_v40 = vld [vmem:[%s2541_s26 + $0x78] sm:$0xff]  ;;  %v770_v1 = vld [vmem:[%s2541_s26 + $0x2e8] sm:$0xff] }
  0xd6   : > { %1756 = vmatpush1.bf16.msra.mxu1 %v1755_v60  ;;  %1726 = vmatprep.subr.bf16.mxu0 %v1725_v61  ;;  %v813_v60 = vld [vmem:[%s2541_s26 + $0x440] sm:$0xff]  ;;  %v708_v41 = vld [vmem:[%s2541_s26 + $0xf8] sm:$0xff]  ;;  %v1823_v43 = vpack.c.bf16 %v927_v37, %v911_v35  ;;  %v691_v47 = vld [vmem:[%s2541_s26 + $0x70] sm:$0xff] }
  0xd7   : > { %1758 = vmatprep.subr.bf16.mxu1 %v1757_v2  ;;  %v829_v61 = vld [vmem:[%s2541_s26 + $0x4c0] sm:$0xff]  ;;  %v846_v2 = vld [vmem:[%s2541_s26 + $0x548] sm:$0xff]  ;;  %v1857_v49 = vpack.c.bf16 %v708_v41, %v692_v40  ;;  %v707_v50 = vld [vmem:[%s2541_s26 + $0xf0] sm:$0xff] }
  0xd8   : > { %v1779_v6 = vpack.c.bf16 %v829_v61, %v813_v60  ;;  %v724_v53 = vld [vmem:[%s2541_s26 + $0x178] sm:$0xff]  ;;  %v1859_v56 = vpack.c.bf16 %v707_v50, %v691_v47  ;;  %v723_v60 = vld [vmem:[%s2541_s26 + $0x170] sm:$0xff]  ;;  %v802_v13 = vld [vmem:[%s2541_s26 + $0x3e8] sm:$0xff] }
  0xd9   : > { %1728 = vmatpush1.bf16.msra.mxu0 %v1727_v8  ;;  %v1781_v8 = vpack.c.bf16 %v862_v3, %v846_v2  ;;  %v740_v54 = vld [vmem:[%s2541_s26 + $0x1f8] sm:$0xff]  ;;  %v739_v62 = vld [vmem:[%s2541_s26 + $0x1f0] sm:$0xff]  ;;  %v850_v35 = vld [vmem:[%s2541_s26 + $0x568] sm:$0xff] }
  0xda   : > { %1760 = vmatpush1.bf16.msra.mxu1 %v1759_v9  ;;  %1762 = vmatprep.subr.bf16.mxu0 %v1761_v10  ;;  %v845_v9 = vld [vmem:[%s2541_s26 + $0x540] sm:$0xff]  ;;  %v1861_v61 = vpack.c.bf16 %v740_v54, %v724_v53  ;;  %v756_v2 = vld [vmem:[%s2541_s26 + $0x278] sm:$0xff]  ;;  %v1863_v5 = vpack.c.bf16 %v739_v62, %v723_v60  ;;  %v771_v11 = vld [vmem:[%s2541_s26 + $0x2f0] sm:$0xff] }
  0xdb   : > { %1794 = vmatprep.subr.bf16.mxu1 %v1793_v14  ;;  %v861_v10 = vld [vmem:[%s2541_s26 + $0x5c0] sm:$0xff]  ;;  %v878_v14 = vld [vmem:[%s2541_s26 + $0x648] sm:$0xff]  ;;  %v772_v3 = vld [vmem:[%s2541_s26 + $0x2f8] sm:$0xff] }
  0xdc   : > { %1140 = vmatmul.mubr.f32.vlgmr.msra.gmra.mrb[2].mxu0 %v2622_v48  ;;  %v1783_v18 = vpack.c.bf16 %v861_v10, %v845_v9  ;;  %v755_v9 = vld [vmem:[%s2541_s26 + $0x270] sm:$0xff]  ;;  %v1865_v10 = vpack.c.bf16 %v772_v3, %v756_v2  ;;  %v820_v25 = vld [vmem:[%s2541_s26 + $0x478] sm:$0xff]  ;;  %v882_v47 = vld [vmem:[%s2541_s26 + $0x668] sm:$0xff] }
  0xdd   : > { %1211 = vmatmul.mubr.f32.vlgmr.msra.gmra.mrb[2].mxu1 %v2622_v48  ;;  %1764 = vmatpush1.bf16.msra.mxu0 %v1763_v20  ;;  %v1785_v20 = vpack.c.bf16 %v894_v15, %v878_v14  ;;  %v788_v14 = vld [vmem:[%s2541_s26 + $0x378] sm:$0xff]  ;;  %v1867_v17 = vpack.c.bf16 %v771_v11, %v755_v9  ;;  %v803_v23 = vld [vmem:[%s2541_s26 + $0x3f0] sm:$0xff]  ;;  %v914_v60 = vld [vmem:[%s2541_s26 + $0x768] sm:$0xff] }
  0xde   : > { %1796 = vmatpush1.bf16.msra.mxu1 %v1795_v21  ;;  %1766 = vmatprep.subr.bf16.mxu0 %v1765_v22  ;;  %v877_v21 = vld [vmem:[%s2541_s26 + $0x640] sm:$0xff]  ;;  %v804_v15 = vld [vmem:[%s2541_s26 + $0x3f8] sm:$0xff] }
  0xdf   : > { %1798 = vmatprep.subr.bf16.mxu1 %v1797_v26  ;;  %1281 = vmatprep.mubr.f32.mxu0 %v1970_v0  ;;  %v893_v22 = vld [vmem:[%s2541_s26 + $0x6c0] sm:$0xff]  ;;  %v910_v26 = vld [vmem:[%s2541_s26 + $0x748] sm:$0xff]  ;;  %v852_v37 = vld [vmem:[%s2541_s26 + $0x578] sm:$0xff] }
  0xe0   : > { %1352 = vmatprep.mubr.f32.mxu1 %v1970_v0  ;;  %v1787_v30 = vpack.c.bf16 %v893_v22, %v877_v21  ;;  %v787_v21 = vld [vmem:[%s2541_s26 + $0x370] sm:$0xff]  ;;  %v1869_v22 = vpack.c.bf16 %v804_v15, %v788_v14  ;;  %v884_v50 = vld [vmem:[%s2541_s26 + $0x678] sm:$0xff] }
  0xe1   : > { %1768 = vmatpush1.bf16.msra.mxu0 %v1767_v32  ;;  %v1789_v32 = vpack.c.bf16 %v926_v27, %v910_v26  ;;  %v836_v26 = vld [vmem:[%s2541_s26 + $0x4f8] sm:$0xff]  ;;  %v1871_v28 = vpack.c.bf16 %v803_v23, %v787_v21 }
  0xe2   : > { %1800 = vmatpush1.bf16.msra.mxu1 %v1799_v33  ;;  %1770 = vmatprep.subr.bf16.mxu0 %v1769_v34  ;;  %v909_v33 = vld [vmem:[%s2541_s26 + $0x740] sm:$0xff]  ;;  %v916_v62 = vld [vmem:[%s2541_s26 + $0x778] sm:$0xff] }
  0xe3   : > { %1802 = vmatprep.subr.bf16.mxu1 %v1801_v38  ;;  %v925_v34 = vld [vmem:[%s2541_s26 + $0x7c0] sm:$0xff]  ;;  %v690_v38 = vld [vmem:[%s2541_s26 + $0x68] sm:$0xff] }
  0xe4   : > { %v1791_v42 = vpack.c.bf16 %v925_v34, %v909_v33  ;;  %v1873_v33 = vpack.c.bf16 %v836_v26, %v820_v25  ;;  %v835_v34 = vld [vmem:[%s2541_s26 + $0x4f0] sm:$0xff] }
  0xe5   : > { %1772 = vmatpush1.bf16.msra.mxu0 %v1771_v44  ;;  %v1825_v44 = vpack.c.bf16 %v706_v39, %v690_v38  ;;  %v868_v38 = vld [vmem:[%s2541_s26 + $0x5f8] sm:$0xff] }
  0xe6   : > { %1804 = vmatpush1.bf16.msra.mxu1 %v1803_v45  ;;  %1774 = vmatprep.subr.bf16.mxu0 %v1773_v46  ;;  %v689_v45 = vld [vmem:[%s2541_s26 + $0x60] sm:$0xff] }
  0xe7   : > { %1806 = vmatprep.subr.bf16.mxu1 %v1805_v51  ;;  %v705_v46 = vld [vmem:[%s2541_s26 + $0xe0] sm:$0xff]  ;;  %v722_v51 = vld [vmem:[%s2541_s26 + $0x168] sm:$0xff] }
  0xe8   : > { %v1827_v55 = vpack.c.bf16 %v705_v46, %v689_v45  ;;  %v1877_v45 = vpack.c.bf16 %v868_v38, %v852_v37  ;;  %v867_v46 = vld [vmem:[%s2541_s26 + $0x5f0] sm:$0xff] }
  0xe9   : > { %1776 = vmatpush1.bf16.msra.mxu0 %v1775_v57  ;;  %v1829_v57 = vpack.c.bf16 %v738_v52, %v722_v51  ;;  %v900_v51 = vld [vmem:[%s2541_s26 + $0x6f8] sm:$0xff] }
  0xea   : > { %1808 = vmatpush1.bf16.msra.mxu1 %v1807_v58  ;;  %1778 = vmatprep.subr.bf16.mxu0 %v1777_v59  ;;  %v721_v58 = vld [vmem:[%s2541_s26 + $0x160] sm:$0xff] }
  0xeb   : > { %1810 = vmatprep.subr.bf16.mxu1 %v1809_v63  ;;  %v737_v59 = vld [vmem:[%s2541_s26 + $0x1e0] sm:$0xff]  ;;  %v754_v63 = vld [vmem:[%s2541_s26 + $0x268] sm:$0xff] }
  0xec   : > { %v1831_v4 = vpack.c.bf16 %v737_v59, %v721_v58  ;;  %v1881_v58 = vpack.c.bf16 %v900_v51, %v884_v50  ;;  %v899_v59 = vld [vmem:[%s2541_s26 + $0x6f0] sm:$0xff] }
  0xed   : > { %1780 = vmatpush1.bf16.msra.mxu0 %v1779_v6  ;;  %v1833_v6 = vpack.c.bf16 %v770_v1, %v754_v63  ;;  %v932_v63 = vld [vmem:[%s2541_s26 + $0x7f8] sm:$0xff] }
  0xee   : > { %1812 = vmatpush1.bf16.msra.mxu1 %v1811_v7  ;;  %1782 = vmatprep.subr.bf16.mxu0 %v1781_v8  ;;  %v753_v7 = vld [vmem:[%s2541_s26 + $0x260] sm:$0xff] }
  0xef   : > { %1814 = vmatprep.subr.bf16.mxu1 %v1813_v12  ;;  %v769_v8 = vld [vmem:[%s2541_s26 + $0x2e0] sm:$0xff]  ;;  %v786_v12 = vld [vmem:[%s2541_s26 + $0x368] sm:$0xff] }
  0xf0   : > { %v1835_v16 = vpack.c.bf16 %v769_v8, %v753_v7  ;;  %v915_v7 = vld [vmem:[%s2541_s26 + $0x770] sm:$0xff] }
  0xf1   : > { %1784 = vmatpush1.bf16.msra.mxu0 %v1783_v18  ;;  %v1837_v18 = vpack.c.bf16 %v802_v13, %v786_v12  ;;  %v931_v8 = vld [vmem:[%s2541_s26 + $0x7f0] sm:$0xff] }
  0xf2   : > { %1816 = vmatpush1.bf16.msra.mxu1 %v1815_v19  ;;  %1786 = vmatprep.subr.bf16.mxu0 %v1785_v20  ;;  %v785_v19 = vld [vmem:[%s2541_s26 + $0x360] sm:$0xff] }
  0xf3   : > { %1818 = vmatprep.subr.bf16.mxu1 %v1817_v24  ;;  %v801_v20 = vld [vmem:[%s2541_s26 + $0x3e0] sm:$0xff]  ;;  %v818_v24 = vld [vmem:[%s2541_s26 + $0x468] sm:$0xff] }
  0xf4   : > { %v1839_v27 = vpack.c.bf16 %v801_v20, %v785_v19 }
  0xf5   : > { %1788 = vmatpush1.bf16.msra.mxu0 %v1787_v30  ;;  %v817_v30 = vld [vmem:[%s2541_s26 + $0x460] sm:$0xff] }
  0xf6   : > { %1820 = vmatpush1.bf16.msra.mxu1 %v1819_v31  ;;  %1790 = vmatprep.subr.bf16.mxu0 %v1789_v32  ;;  %v833_v31 = vld [vmem:[%s2541_s26 + $0x4e0] sm:$0xff]  ;;  %v819_v32 = vld [vmem:[%s2541_s26 + $0x470] sm:$0xff] }
  0xf7   : > { %1822 = vmatprep.subr.bf16.mxu1 %v1821_v36  ;;  %v866_v36 = vld [vmem:[%s2541_s26 + $0x5e8] sm:$0xff]  ;;  %v1843_v39 = vpack.c.bf16 %v833_v31, %v817_v30  ;;  %v1875_v40 = vpack.c.bf16 %v835_v34, %v819_v32 }
  0xf8   : > { %v1845_v41 = vpack.c.bf16 %v866_v36, %v850_v35 }
  0xf9   : > { %1792 = vmatpush1.bf16.msra.mxu0 %v1791_v42  ;;  %v849_v42 = vld [vmem:[%s2541_s26 + $0x560] sm:$0xff] }
  0xfa   : > { %1824 = vmatpush1.bf16.msra.mxu1 %v1823_v43  ;;  %1826 = vmatprep.subr.bf16.mxu0 %v1825_v44  ;;  %v865_v43 = vld [vmem:[%s2541_s26 + $0x5e0] sm:$0xff]  ;;  %v851_v44 = vld [vmem:[%s2541_s26 + $0x570] sm:$0xff] }
  0xfb   : > { %1858 = vmatprep.subr.bf16.mxu1 %v1857_v49  ;;  %v898_v49 = vld [vmem:[%s2541_s26 + $0x6e8] sm:$0xff]  ;;  %v1847_v52 = vpack.c.bf16 %v865_v43, %v849_v42  ;;  %v1879_v53 = vpack.c.bf16 %v867_v46, %v851_v44 }
  0xfc   : > { %1282 = vmatmul.mubr.f32.vlgmr.msra.gmra.mrb[4].mxu0 %v2622_v48  ;;  %v1849_v54 = vpack.c.bf16 %v898_v49, %v882_v47 }
  0xfd   : > { %1353 = vmatmul.mubr.f32.vlgmr.msra.gmra.mrb[4].mxu1 %v2622_v48  ;;  %1828 = vmatpush1.bf16.msra.mxu0 %v1827_v55  ;;  %v881_v55 = vld [vmem:[%s2541_s26 + $0x660] sm:$0xff] }
  0xfe   : > { %1860 = vmatpush1.bf16.msra.mxu1 %v1859_v56  ;;  %1830 = vmatprep.subr.bf16.mxu0 %v1829_v57  ;;  %v897_v56 = vld [vmem:[%s2541_s26 + $0x6e0] sm:$0xff]  ;;  %v883_v57 = vld [vmem:[%s2541_s26 + $0x670] sm:$0xff] }
  0xff   : > { %1862 = vmatprep.subr.bf16.mxu1 %v1861_v61  ;;  %1423 = vmatprep.mubr.f32.mxu0 %v1970_v0  ;;  %v930_v61 = vld [vmem:[%s2541_s26 + $0x7e8] sm:$0xff]  ;;  %v1851_v1 = vpack.c.bf16 %v897_v56, %v881_v55  ;;  %v1883_v2 = vpack.c.bf16 %v899_v59, %v883_v57 }
 0x100   : > { %1494 = vmatprep.mubr.f32.mxu1 %v1970_v0  ;;  %v834_v0 = vld [vmem:[%s2541_s26 + $0x4e8] sm:$0xff]  ;;  %v1853_v3 = vpack.c.bf16 %v930_v61, %v914_v60 }
 0x101   : > { %1832 = vmatpush1.bf16.msra.mxu0 %v1831_v4  ;;  %v1841_v29 = vpack.c.bf16 %v834_v0, %v818_v24  ;;  %v913_v4 = vld [vmem:[%s2541_s26 + $0x760] sm:$0xff] }
 0x102   : > { %1864 = vmatpush1.bf16.msra.mxu1 %v1863_v5  ;;  %1834 = vmatprep.subr.bf16.mxu0 %v1833_v6  ;;  %v929_v5 = vld [vmem:[%s2541_s26 + $0x7e0] sm:$0xff]  ;;  %v1885_v6 = vpack.c.bf16 %v932_v63, %v916_v62 }
 0x103   : > { %1866 = vmatprep.subr.bf16.mxu1 %v1865_v10  ;;  %v1855_v9 = vpack.c.bf16 %v929_v5, %v913_v4  ;;  %v1887_v10 = vpack.c.bf16 %v931_v8, %v915_v7 }
 0x105   : > { %1836 = vmatpush1.bf16.msra.mxu0 %v1835_v16 }
 0x106   : > { %1868 = vmatpush1.bf16.msra.mxu1 %v1867_v17  ;;  %1838 = vmatprep.subr.bf16.mxu0 %v1837_v18 }
 0x107   : > { %1870 = vmatprep.subr.bf16.mxu1 %v1869_v22 }
 0x109   : > { %1840 = vmatpush1.bf16.msra.mxu0 %v1839_v27 }
 0x10a   : > { %1872 = vmatpush1.bf16.msra.mxu1 %v1871_v28  ;;  %1842 = vmatprep.subr.bf16.mxu0 %v1841_v29 }
 0x10b   : > { %1874 = vmatprep.subr.bf16.mxu1 %v1873_v33 }
 0x10d   : > { %1844 = vmatpush1.bf16.msra.mxu0 %v1843_v39 }
 0x10e   : > { %1876 = vmatpush1.bf16.msra.mxu1 %v1875_v40  ;;  %1846 = vmatprep.subr.bf16.mxu0 %v1845_v41 }
 0x10f   : > { %1878 = vmatprep.subr.bf16.mxu1 %v1877_v45 }
 0x111   : > { %1848 = vmatpush1.bf16.msra.mxu0 %v1847_v52 }
 0x112   : > { %1880 = vmatpush1.bf16.msra.mxu1 %v1879_v53  ;;  %1850 = vmatprep.subr.bf16.mxu0 %v1849_v54 }
 0x113   : > { %1882 = vmatprep.subr.bf16.mxu1 %v1881_v58 }
 0x115   : > { %1852 = vmatpush1.bf16.msra.mxu0 %v1851_v1 }
 0x116   : > { %1884 = vmatpush1.bf16.msra.mxu1 %v1883_v2  ;;  %1854 = vmatprep.subr.bf16.mxu0 %v1853_v3 }
 0x117   : > { %1886 = vmatprep.subr.bf16.mxu1 %v1885_v6 }
 0x119   : > { %1856 = vmatpush1.bf16.msra.mxu0 %v1855_v9 }
 0x11a   : > { %1888 = vmatpush1.bf16.msra.mxu1 %v1887_v10 }
 0x11c   : > { %1424 = vmatmul.mubr.f32.vlgmr.msra.gmra.mrb[6].mxu0 %v2622_v48 }
 0x11d   : > { %1495 = vmatmul.mubr.f32.vlgmr.msra.gmra.mrb[6].mxu1 %v2622_v48 }
 0x18f   : > { %v999_v11 = vpop.f32.mrb[0].mxu0 }
 0x190   : > { %1914 = vtanh.f32 %v999_v11  ;;  %v1070_v12 = vpop.f32.mrb[0].mxu1  ;;  %v1001_v13 = vpop.f32.mrb[1].mxu0 }
 0x191   : > { %1916 = vtanh.f32 %v1070_v12  ;;  %v1072_v14 = vpop.f32.mrb[1].mxu1 }
 0x192   : > { %1918 = vtanh.f32 %v1001_v13 }
 0x193   : > { %1920 = vtanh.f32 %v1072_v14 }
 0x19a   : > { %v1915_v15 = vpop.eup %1914 }
 0x19b   : > { %v1917_v16 = vpop.eup %1916 }
 0x19c   : > { %v1919_v17 = vpop.eup %1918 }
 0x19d   : > { %v1921_v48 = vpop.eup %1920  ;;  %v1533_v18 = vcombine.low %v1915_v15, %v1919_v17 }
 0x19e   : > { %v1534_v19 = vcombine.low %v1917_v16, %v1921_v48 }
 0x19f   : > { %1549 = vst [vmem:[%s2823_s5] sm:$0x77] %v1533_v18 }
 0x1a0   : > { %1550 = vst [vmem:[%s2823_s5 + $0x8] sm:$0x77] %v1534_v19 }
 0x1af   : > { %v1141_v20 = vpop.f32.mrb[2].mxu0 }
 0x1b0   : > { %1922 = vtanh.f32 %v1141_v20  ;;  %v1212_v21 = vpop.f32.mrb[2].mxu1  ;;  %v1143_v22 = vpop.f32.mrb[3].mxu0 }
 0x1b1   : > { %1924 = vtanh.f32 %v1212_v21  ;;  %v1214_v23 = vpop.f32.mrb[3].mxu1 }
 0x1b2   : > { %1926 = vtanh.f32 %v1143_v22 }
 0x1b3   : > { %1928 = vtanh.f32 %v1214_v23 }
 0x1ba   : > { %v1923_v24 = vpop.eup %1922 }
 0x1bb   : > { %v1925_v0 = vpop.eup %1924 }
 0x1bc   : > { %v1927_v25 = vpop.eup %1926 }
 0x1bd   : > { %v1929_v26 = vpop.eup %1928  ;;  %v1535_v27 = vcombine.low %v1923_v24, %v1927_v25 }
 0x1be   : > { %v1536_v28 = vcombine.low %v1925_v0, %v1929_v26 }
 0x1bf   : > { %1551 = vst [vmem:[%s2823_s5 + $0x10] sm:$0x77] %v1535_v27 }
 0x1c0   : > { %1552 = vst [vmem:[%s2823_s5 + $0x18] sm:$0x77] %v1536_v28 }
 0x1cf   : > { %v1283_v29 = vpop.f32.mrb[4].mxu0 }
 0x1d0   : > { %1930 = vtanh.f32 %v1283_v29  ;;  %v1354_v30 = vpop.f32.mrb[4].mxu1  ;;  %v1285_v31 = vpop.f32.mrb[5].mxu0 }
 0x1d1   : > { %1932 = vtanh.f32 %v1354_v30  ;;  %v1356_v32 = vpop.f32.mrb[5].mxu1 }
 0x1d2   : > { %1934 = vtanh.f32 %v1285_v31 }
 0x1d3   : > { %1936 = vtanh.f32 %v1356_v32 }
 0x1da   : > { %v1931_v33 = vpop.eup %1930 }
 0x1db   : > { %v1933_v34 = vpop.eup %1932 }
 0x1dc   : > { %v1935_v35 = vpop.eup %1934 }
 0x1dd   : > { %v1937_v36 = vpop.eup %1936  ;;  %v1537_v37 = vcombine.low %v1931_v33, %v1935_v35 }
 0x1de   : > { %v1538_v38 = vcombine.low %v1933_v34, %v1937_v36 }
 0x1df   : > { %1553 = vst [vmem:[%s2823_s5 + $0x20] sm:$0x77] %v1537_v37 }
 0x1e0   : > { %1554 = vst [vmem:[%s2823_s5 + $0x28] sm:$0x77] %v1538_v38 }
 0x1ef   : > { %v1425_v39 = vpop.f32.mrb[6].mxu0 }
 0x1f0   : > { %1938 = vtanh.f32 %v1425_v39  ;;  %v1496_v40 = vpop.f32.mrb[6].mxu1  ;;  %v1427_v41 = vpop.f32.mrb[7].mxu0 }
 0x1f1   : > { %1940 = vtanh.f32 %v1496_v40  ;;  %v1498_v42 = vpop.f32.mrb[7].mxu1 }
 0x1f2   : > { %1942 = vtanh.f32 %v1427_v41 }
 0x1f3   : > { %1944 = vtanh.f32 %v1498_v42 }
 0x1fa   : > { %v1939_v43 = vpop.eup %1938 }
 0x1fb   : > { %v1941_v44 = vpop.eup %1940 }
 0x1fc   : > { %v1943_v45 = vpop.eup %1942 }
 0x1fd   : > { %v1945_v46 = vpop.eup %1944  ;;  %v1539_v47 = vcombine.low %v1939_v43, %v1943_v45 }
 0x1fe   : > { %v1540_v49 = vcombine.low %v1941_v44, %v1945_v46 }
 0x1ff   : > { %1555 = vst [vmem:[%s2823_s5 + $0x30] sm:$0x77] %v1539_v47 }
 0x200   : > { %1556 = vst [vmem:[%s2823_s5 + $0x38] sm:$0x77] %v1540_v49 }
 0x201 PF: > { %p9_p9 = scmp.ge.s32.totalorder %s2003_s13, 6   ;;  %s2846_s9 = smov %s1964_s10 }
 0x202   : > { %s2847_s10 = smov %s2012_s16  ;;  %s2848_s11 = smov %s2003_s13 }
 0x203   :  { %11 = sbr.rel (!%p9_p9) target bundleno = 2 (0x2), region = 86 }

</bundles_post_ra>
